<compile_context>
chip_gen: v7x
topology: tpu7x:2x2x1
jax: 0.10.0
libtpu: 0.0.40
codegen_flags: <defaults>
</compile_context>

<pallas_src>
import functools
import math
from statistics import mean as stat_mean, stdev as stat_stdev

import jax
import jax.numpy as jnp
from jax.experimental import pallas as pl
from jax.experimental.pallas import tpu as pltpu

# ----------------------------- configuration -------------------------------
B = 2                       # batch
C_IN = 3                    # image channels
IMG = 16                    # image H == W
PATCH = 8                   # patch size
NUM_PATCHES = (IMG // PATCH) ** 2          # 4 spatial patches
SEQ = NUM_PATCHES + 1                      # +1 cls token
D = 32                      # embed dim
NUM_HEADS = 2
HEAD_DIM = D // NUM_HEADS   # 16
MLP_RATIO = 4
NUM_BLOCKS = 4              # total ViT blocks
NUM_CLASSES = 10
LAYER_INDICES = (2, 3)                     # PatchMaskerConfig.layer_indices
NUM_PATCHES_RESERVED = (4, 3)              # PatchMaskerConfig.num_patches_reserved
BASE_LIFE = LAYER_INDICES[0]
MAX_LIFE = NUM_BLOCKS
DTYPE = jnp.float32


# --------------------- CustomBlocks static helpers (Python) ----------------
def generate_num_patches_per_layers(layer_indices, num_patches_reserved, num_layers):
    def get_num_patches(layer_idx):
        i = next(
            filter(lambda i: layer_indices[i + 1] > layer_idx,
                   range(len(layer_indices) - 1)),
            len(layer_indices) - 1)
        return num_patches_reserved[i]
    return tuple(get_num_patches(l) for l in range(layer_indices[0], num_layers))


def compute_patch_life_mean_std(layer_indices, num_patches_reserved, num_patches,
                                base_layer_index, num_layers):
    num_patches_reserved = tuple(num_patches_reserved)
    prev = [num_patches, *num_patches_reserved]
    num_lifes = [p - c for p, c in zip(prev, num_patches_reserved + (0,))]
    lin = [(i - base_layer_index) / (num_layers - base_layer_index)
           for i in layer_indices] + [1.0]
    lifes = []
    for l, n in zip(lin, num_lifes):
        lifes.extend([l] * n)
    return stat_mean(lifes), stat_stdev(lifes)


NUM_PATCHES_PER_LAYERS = generate_num_patches_per_layers(
    LAYER_INDICES, NUM_PATCHES_RESERVED, NUM_BLOCKS)
LIFE_MEAN, LIFE_STD = compute_patch_life_mean_std(
    LAYER_INDICES, NUM_PATCHES_RESERVED, NUM_PATCHES, BASE_LIFE, NUM_BLOCKS)

# order in which per-block weights are flattened into pallas_call arguments
BLOCK_PARAM_NAMES = (
    "norm1_g", "norm1_b",
    "q_w", "k_w", "v_w", "q_b", "k_b", "v_b",
    "proj_w", "proj_b",
    "norm2_g", "norm2_b",
    "fc1_w", "fc1_b", "fc2_w", "fc2_b",
)
N_BP = len(BLOCK_PARAM_NAMES)


# --------------------------- in-kernel building blocks ----------------------
def _ln(x, g, b, eps):
    """LayerNorm over last dim. x: (N, D) f32; g, b: (1, D)."""
    mu = jnp.mean(x, axis=-1, keepdims=True)
    var = jnp.mean((x - mu) ** 2, axis=-1, keepdims=True)
    return (x - mu) * jax.lax.rsqrt(var + eps) * g + b


def _block_compute(x, p):
    """One timm ViT Block (pre-norm attn + MLP), fully fused, x: (N, D) f32."""
    scale = HEAD_DIM ** -0.5
    h = _ln(x, p["norm1_g"], p["norm1_b"], 1e-6)
    attn_acc = None
    for hi in range(NUM_HEADS):
        q = jnp.dot(h, p["q_w"][hi], preferred_element_type=jnp.float32) + p["q_b"][hi]
        k = jnp.dot(h, p["k_w"][hi], preferred_element_type=jnp.float32) + p["k_b"][hi]
        v = jnp.dot(h, p["v_w"][hi], preferred_element_type=jnp.float32) + p["v_b"][hi]
        s = jax.lax.dot_general(q, k, (((1,), (1,)), ((), ())),
                                preferred_element_type=jnp.float32) * scale
        s = s - jnp.max(s, axis=-1, keepdims=True)
        e = jnp.exp(s)
        # softmax denominator on the EUP path (overlaps VALU/MXU work)
        pr = e * pl.reciprocal(jnp.sum(e, axis=-1, keepdims=True), approx=True)
        o = jnp.dot(pr, v, preferred_element_type=jnp.float32)
        contrib = jnp.dot(o, p["proj_w"][hi], preferred_element_type=jnp.float32)
        attn_acc = contrib if attn_acc is None else attn_acc + contrib
    x = x + attn_acc + p["proj_b"]                 # fused residual add
    h2 = _ln(x, p["norm2_g"], p["norm2_b"], 1e-6)
    h2 = jnp.dot(h2, p["fc1_w"], preferred_element_type=jnp.float32) + p["fc1_b"]
    # TODO(synk): timm's default Mlp uses exact (erf) GELU; tanh approximation
    # is used here since it maps onto the guaranteed TPU EUP path.
    h2 = jax.nn.gelu(h2, approximate=True)
    h2 = jnp.dot(h2, p["fc2_w"], preferred_element_type=jnp.float32) + p["fc2_b"]
    return x + h2                                  # fused residual add


def _unpack_block_values(refs, n_blk):
    blocks = []
    for i in range(n_blk):
        chunk = refs[i * N_BP:(i + 1) * N_BP]
        blocks.append({name: r[...] for name, r in zip(BLOCK_PARAM_NAMES, chunk)})
    return blocks


# ------------------------------ fused kernels -------------------------------
def _head_kernel(*refs):
    """patch-embed + cls/pos + head blocks + plugin LN + life predictor."""
    n_blk = BASE_LIFE
    patches_ref, pe_w_ref, pe_b_ref, cls_ref, pos_ref = refs[0:5]
    idx = 5
    blk_refs = refs[idx: idx + n_blk * N_BP]; idx += n_blk * N_BP
    plug_g_ref, plug_b_ref, life_w_ref, life_b_ref = refs[idx: idx + 4]; idx += 4
    x_out_ref, life_out_ref = refs[idx: idx + 2]; idx += 2
    xbuf_ref = refs[idx]                                  # VMEM scratch (SEQ, D)

    blocks = _unpack_block_values(blk_refs, n_blk)

    # ---- patch embedding + cls token + positional embedding ----
    patches = patches_ref[0].astype(jnp.float32)          # (Np, C*p*p)
    tok = jnp.dot(patches, pe_w_ref[...],
                  preferred_element_type=jnp.float32) + pe_b_ref[...]   # (Np, D)
    pos = pos_ref[...].astype(jnp.float32)                # (SEQ, D)
    xbuf_ref[0:1, :] = cls_ref[...].astype(jnp.float32) + pos[0:1, :]
    xbuf_ref[1:SEQ, :] = tok + pos[1:SEQ, :]
    x = xbuf_ref[...]                                     # (SEQ, D)

    # ---- head blocks ----
    for bp in blocks:
        x = _block_compute(x, bp)
    x_out_ref[0] = x.astype(x_out_ref.dtype)

    # ---- plugin LayerNorm + patch-life predictor (lane-dense (1, SEQ) row) ----
    xn = _ln(x, plug_g_ref[...], plug_b_ref[...], 1e-5)
    # TODO(synk): PatchLifePredictor internals are not given in the reference;
    # modeled as Linear(D->1) followed by sigmoid(score*std + mean) in [0,1].
    life = jax.lax.dot_general(life_w_ref[...], xn, (((1,), (1,)), ((), ())),
                               preferred_element_type=jnp.float32)      # (1, SEQ)
    life = life + life_b_ref[...]
    life_out_ref[0] = jax.nn.sigmoid(life * LIFE_STD + LIFE_MEAN).astype(
        life_out_ref.dtype)


def _tail_kernel(*refs):
    """tail blocks with static pruning + final LN + classifier head."""
    n_blk = NUM_BLOCKS - BASE_LIFE
    x_ref = refs[0]
    blk_refs = refs[1: 1 + n_blk * N_BP]
    norm_g_ref, norm_b_ref, head_w_ref, head_b_ref = \
        refs[1 + n_blk * N_BP: 5 + n_blk * N_BP]
    logits_ref = refs[5 + n_blk * N_BP]

    blocks = _unpack_block_values(blk_refs, n_blk)
    x = x_ref[0].astype(jnp.float32)                      # (SEQ, D)
    for i, bp in enumerate(blocks):
        num_p = NUM_PATCHES_PER_LAYERS[i]                 # static prune
        x = x[:num_p, :]
        x = _block_compute(x, bp)

    # final LN is per-token, so applying it only to the cls row is equivalent
    xcls = _ln(x[0:1, :], norm_g_ref[...], norm_b_ref[...], 1e-6)
    logits = jnp.dot(xcls, head_w_ref[...],
                     preferred_element_type=jnp.float32) + head_b_ref[...]
    logits_ref[0] = logits.astype(logits_ref.dtype)


# ------------------------------ pallas_call wrappers -------------------------
def _full_spec(arr):
    nd = arr.ndim
    return pl.BlockSpec(arr.shape, lambda b, _nd=nd: (0,) * _nd)


def fused_head_call(patches, kp):
    blocks_flat = []
    for bp in kp["blocks"][:BASE_LIFE]:
        blocks_flat.extend(bp[name] for name in BLOCK_PARAM_NAMES)
    inputs = ([patches, kp["pe_w"], kp["pe_b"], kp["cls"], kp["pos"]]
              + blocks_flat
              + [kp["plug_g"], kp["plug_b"], kp["life_w_t"], kp["life_b"]])

    in_specs = [pl.BlockSpec((1,) + patches.shape[1:], lambda b: (b, 0, 0))]
    in_specs += [_full_spec(a) for a in inputs[1:]]
    out_specs = [pl.BlockSpec((1, SEQ, D), lambda b: (b, 0, 0)),
                 pl.BlockSpec((1, 1, SEQ), lambda b: (b, 0, 0))]
    out_shape = [jax.ShapeDtypeStruct((B, SEQ, D), DTYPE),
                 jax.ShapeDtypeStruct((B, 1, SEQ), DTYPE)]
    return pl.pallas_call(
        _head_kernel,
        out_shape=out_shape,
        grid=(B,),
        in_specs=in_specs,
        out_specs=out_specs,
        scratch_shapes=[pltpu.VMEM((SEQ, D), jnp.float32)],
        compiler_params=pltpu.CompilerParams(dimension_semantics=("parallel",)),
    )(*inputs)


def fused_tail_call(x_sorted, kp):
    blocks_flat = []
    for bp in kp["blocks"][BASE_LIFE:]:
        blocks_flat.extend(bp[name] for name in BLOCK_PARAM_NAMES)
    inputs = ([x_sorted] + blocks_flat
              + [kp["norm_g"], kp["norm_b"], kp["head_w"], kp["head_b"]])

    in_specs = [pl.BlockSpec((1, SEQ, D), lambda b: (b, 0, 0))]
    in_specs += [_full_spec(a) for a in inputs[1:]]
    out_specs = pl.BlockSpec((1, 1, NUM_CLASSES), lambda b: (b, 0, 0))
    return pl.pallas_call(
        _tail_kernel,
        out_shape=jax.ShapeDtypeStruct((B, 1, NUM_CLASSES), DTYPE),
        grid=(B,),
        in_specs=in_specs,
        out_specs=out_specs,
        compiler_params=pltpu.CompilerParams(dimension_semantics=("parallel",)),
    )(*inputs)


# ------------------------------ parameter init ------------------------------
def init_params(key):
    def nrm(k, shape, scale=0.02):
        return (scale * jax.random.normal(k, shape)).astype(DTYPE)

    keys = jax.random.split(key, 8 + NUM_BLOCKS)
    p = {}
    p["pe_w"] = nrm(keys[0], (C_IN * PATCH * PATCH, D))
    p["pe_b"] = jnp.zeros((D,), DTYPE)
    p["cls_token"] = nrm(keys[1], (1, 1, D))
    p["pos_embed"] = nrm(keys[2], (1, SEQ, D))
    p["plug_g"] = jnp.ones((D,), DTYPE)
    p["plug_b"] = jnp.zeros((D,), DTYPE)
    p["life_w"] = nrm(keys[3], (D, 1))
    p["life_b"] = jnp.zeros((1,), DTYPE)
    p["norm_g"] = jnp.ones((D,), DTYPE)
    p["norm_b"] = jnp.zeros((D,), DTYPE)
    p["head_w"] = nrm(keys[4], (D, NUM_CLASSES))
    p["head_b"] = jnp.zeros((NUM_CLASSES,), DTYPE)

    blocks = []
    for i in range(NUM_BLOCKS):
        bk = jax.random.split(keys[8 + i], 4)
        blocks.append({
            "norm1_g": jnp.ones((D,), DTYPE), "norm1_b": jnp.zeros((D,), DTYPE),
            "qkv_w": nrm(bk[0], (D, 3 * D)), "qkv_b": jnp.zeros((3 * D,), DTYPE),
            "proj_w": nrm(bk[1], (D, D)), "proj_b": jnp.zeros((D,), DTYPE),
            "norm2_g": jnp.ones((D,), DTYPE), "norm2_b": jnp.zeros((D,), DTYPE),
            "fc1_w": nrm(bk[2], (D, MLP_RATIO * D)),
            "fc1_b": jnp.zeros((MLP_RATIO * D,), DTYPE),
            "fc2_w": nrm(bk[3], (MLP_RATIO * D, D)),
            "fc2_b": jnp.zeros((D,), DTYPE),
        })
    p["blocks"] = blocks
    return p


def prepare_block(bp):
    """Repack canonical timm-layout weights into head-major slabs for the kernel."""
    qkv_w = bp["qkv_w"].reshape(D, 3, NUM_HEADS, HEAD_DIM)
    qkv_w = jnp.transpose(qkv_w, (1, 2, 0, 3))            # (3, H, D, dh)
    qkv_b = bp["qkv_b"].reshape(3, NUM_HEADS, 1, HEAD_DIM)
    proj_w = bp["proj_w"].reshape(NUM_HEADS, HEAD_DIM, D)  # head-major input rows
    return {
        "norm1_g": bp["norm1_g"].reshape(1, D), "norm1_b": bp["norm1_b"].reshape(1, D),
        "q_w": qkv_w[0], "k_w": qkv_w[1], "v_w": qkv_w[2],
        "q_b": qkv_b[0], "k_b": qkv_b[1], "v_b": qkv_b[2],
        "proj_w": proj_w, "proj_b": bp["proj_b"].reshape(1, D),
        "norm2_g": bp["norm2_g"].reshape(1, D), "norm2_b": bp["norm2_b"].reshape(1, D),
        "fc1_w": bp["fc1_w"], "fc1_b": bp["fc1_b"].reshape(1, MLP_RATIO * D),
        "fc2_w": bp["fc2_w"], "fc2_b": bp["fc2_b"].reshape(1, D),
    }


def prepare_kernel_params(p):
    return {
        "pe_w": p["pe_w"], "pe_b": p["pe_b"].reshape(1, D),
        "cls": p["cls_token"].reshape(1, D),
        "pos": p["pos_embed"].reshape(SEQ, D),
        "plug_g": p["plug_g"].reshape(1, D), "plug_b": p["plug_b"].reshape(1, D),
        "life_w_t": jnp.transpose(p["life_w"]),            # (1, D)
        "life_b": p["life_b"].reshape(1, 1),
        "norm_g": p["norm_g"].reshape(1, D), "norm_b": p["norm_b"].reshape(1, D),
        "head_w": p["head_w"], "head_b": p["head_b"].reshape(1, NUM_CLASSES),
        "blocks": [prepare_block(bp) for bp in p["blocks"]],
    }


# ------------------------------ model forward -------------------------------
def im2col(x):
    # x: (B, C, H, W) NCHW -> (B, Np, C*p*p), patch channel-major like Conv2d.
    Bb, C, H, W = x.shape
    p = PATCH
    x = x.reshape(Bb, C, H // p, p, W // p, p)
    x = jnp.transpose(x, (0, 2, 4, 1, 3, 5))
    return x.reshape(Bb, (H // p) * (W // p), C * p * p)


def timm_vit_adapter_forward(x_img, params):
    """predict_forward == eval_forward of TimmVitAdapter. Returns (logits, real_life)."""
    kp = prepare_kernel_params(params)

    # ---------------- head_forward + head blocks + life predictor (Kernel A) ----
    patches = im2col(x_img)                                # (B, Np, C*p*p)
    x_at_layer_index, life3 = fused_head_call(patches, kp)
    life_normed = life3[:, 0, :]                           # (B, SEQ)
    real_life = life_normed * (MAX_LIFE - BASE_LIFE) + BASE_LIFE

    # ---------------- pruning reorder (data-dependent, plain-JAX glue) ----------
    life = life_normed.at[:, 0].set(100000.0)              # cls token always kept
    order = jnp.argsort(-life, axis=-1)                    # descending
    x_sorted = jnp.take_along_axis(x_at_layer_index, order[:, :, None], axis=1)

    # ---------------- tail blocks + final norm + classifier head (Kernel B) -----
    logits3 = fused_tail_call(x_sorted, kp)
    logits = logits3[:, 0, :]                              # (B, NUM_CLASSES)
    return logits, real_life


# ------------------------------------ main -----------------------------------
if __name__ == "__main__":
    key = jax.random.PRNGKey(0)
    k_param, k_input = jax.random.split(key)
    params = init_params(k_param)
    x = jax.random.normal(k_input, (B, C_IN, IMG, IMG), dtype=DTYPE)

    fwd = jax.jit(timm_vit_adapter_forward)
    logits, real_life = fwd(x, params)
    jax.block_until_ready(logits)
    jax.block_until_ready(real_life)

    assert logits.shape == (B, NUM_CLASSES)
    assert real_life.shape == (B, SEQ)
    assert bool(jnp.all(jnp.isfinite(logits)))
    assert bool(jnp.all(jnp.isfinite(real_life)))
    print("KERNEL_OK")
</pallas_src>

<mosaic_0001>
module attributes {stable_mosaic.version = 11 : i64} {
  func.func @_head_kernel(%arg0: i32, %arg1: memref<1x4x192xf32, #tpu.memory_space<vmem>>, %arg2: memref<192x32xf32, #tpu.memory_space<vmem>>, %arg3: memref<1x32xf32, #tpu.memory_space<vmem>>, %arg4: memref<1x32xf32, #tpu.memory_space<vmem>>, %arg5: memref<5x32xf32, #tpu.memory_space<vmem>>, %arg6: memref<1x32xf32, #tpu.memory_space<vmem>>, %arg7: memref<1x32xf32, #tpu.memory_space<vmem>>, %arg8: memref<2x32x16xf32, #tpu.memory_space<vmem>>, %arg9: memref<2x32x16xf32, #tpu.memory_space<vmem>>, %arg10: memref<2x32x16xf32, #tpu.memory_space<vmem>>, %arg11: memref<2x1x16xf32, #tpu.memory_space<vmem>>, %arg12: memref<2x1x16xf32, #tpu.memory_space<vmem>>, %arg13: memref<2x1x16xf32, #tpu.memory_space<vmem>>, %arg14: memref<2x16x32xf32, #tpu.memory_space<vmem>>, %arg15: memref<1x32xf32, #tpu.memory_space<vmem>>, %arg16: memref<1x32xf32, #tpu.memory_space<vmem>>, %arg17: memref<1x32xf32, #tpu.memory_space<vmem>>, %arg18: memref<32x128xf32, #tpu.memory_space<vmem>>, %arg19: memref<1x128xf32, #tpu.memory_space<vmem>>, %arg20: memref<128x32xf32, #tpu.memory_space<vmem>>, %arg21: memref<1x32xf32, #tpu.memory_space<vmem>>, %arg22: memref<1x32xf32, #tpu.memory_space<vmem>>, %arg23: memref<1x32xf32, #tpu.memory_space<vmem>>, %arg24: memref<2x32x16xf32, #tpu.memory_space<vmem>>, %arg25: memref<2x32x16xf32, #tpu.memory_space<vmem>>, %arg26: memref<2x32x16xf32, #tpu.memory_space<vmem>>, %arg27: memref<2x1x16xf32, #tpu.memory_space<vmem>>, %arg28: memref<2x1x16xf32, #tpu.memory_space<vmem>>, %arg29: memref<2x1x16xf32, #tpu.memory_space<vmem>>, %arg30: memref<2x16x32xf32, #tpu.memory_space<vmem>>, %arg31: memref<1x32xf32, #tpu.memory_space<vmem>>, %arg32: memref<1x32xf32, #tpu.memory_space<vmem>>, %arg33: memref<1x32xf32, #tpu.memory_space<vmem>>, %arg34: memref<32x128xf32, #tpu.memory_space<vmem>>, %arg35: memref<1x128xf32, #tpu.memory_space<vmem>>, %arg36: memref<128x32xf32, #tpu.memory_space<vmem>>, %arg37: memref<1x32xf32, #tpu.memory_space<vmem>>, %arg38: memref<1x32xf32, #tpu.memory_space<vmem>>, %arg39: memref<1x32xf32, #tpu.memory_space<vmem>>, %arg40: memref<1x32xf32, #tpu.memory_space<vmem>>, %arg41: memref<1x1xf32, #tpu.memory_space<vmem>>, %arg42: memref<1x5x32xf32, #tpu.memory_space<vmem>>, %arg43: memref<1x1x5xf32, #tpu.memory_space<vmem>>, %arg44: memref<5x32xf32, #tpu.memory_space<vmem>>) attributes {dimension_semantics = [#tpu.dimension_semantics<parallel>], iteration_bounds = array<i64: 2>, scalar_prefetch = 0 : i64, scratch_operands = 1 : i64, tpu.core_type = #tpu.core_type<tc>, window_params = [{transform_indices = @transform_0, window_bounds = array<i64: 1, 4, 192>}, {pipeline_mode = #tpu.pipeline_mode<synchronous>, transform_indices = @transform_1, window_bounds = array<i64: 192, 32>}, {pipeline_mode = #tpu.pipeline_mode<synchronous>, transform_indices = @transform_2, window_bounds = array<i64: 1, 32>}, {pipeline_mode = #tpu.pipeline_mode<synchronous>, transform_indices = @transform_3, window_bounds = array<i64: 1, 32>}, {pipeline_mode = #tpu.pipeline_mode<synchronous>, transform_indices = @transform_4, window_bounds = array<i64: 5, 32>}, {pipeline_mode = #tpu.pipeline_mode<synchronous>, transform_indices = @transform_5, window_bounds = array<i64: 1, 32>}, {pipeline_mode = #tpu.pipeline_mode<synchronous>, transform_indices = @transform_6, window_bounds = array<i64: 1, 32>}, {pipeline_mode = #tpu.pipeline_mode<synchronous>, transform_indices = @transform_7, window_bounds = array<i64: 2, 32, 16>}, {pipeline_mode = #tpu.pipeline_mode<synchronous>, transform_indices = @transform_8, window_bounds = array<i64: 2, 32, 16>}, {pipeline_mode = #tpu.pipeline_mode<synchronous>, transform_indices = @transform_9, window_bounds = array<i64: 2, 32, 16>}, {pipeline_mode = #tpu.pipeline_mode<synchronous>, transform_indices = @transform_10, window_bounds = array<i64: 2, 1, 16>}, {pipeline_mode = #tpu.pipeline_mode<synchronous>, transform_indices = @transform_11, window_bounds = array<i64: 2, 1, 16>}, {pipeline_mode = #tpu.pipeline_mode<synchronous>, transform_indices = @transform_12, window_bounds = array<i64: 2, 1, 16>}, {pipeline_mode = #tpu.pipeline_mode<synchronous>, transform_indices = @transform_13, window_bounds = array<i64: 2, 16, 32>}, {pipeline_mode = #tpu.pipeline_mode<synchronous>, transform_indices = @transform_14, window_bounds = array<i64: 1, 32>}, {pipeline_mode = #tpu.pipeline_mode<synchronous>, transform_indices = @transform_15, window_bounds = array<i64: 1, 32>}, {pipeline_mode = #tpu.pipeline_mode<synchronous>, transform_indices = @transform_16, window_bounds = array<i64: 1, 32>}, {pipeline_mode = #tpu.pipeline_mode<synchronous>, transform_indices = @transform_17, window_bounds = array<i64: 32, 128>}, {pipeline_mode = #tpu.pipeline_mode<synchronous>, transform_indices = @transform_18, window_bounds = array<i64: 1, 128>}, {pipeline_mode = #tpu.pipeline_mode<synchronous>, transform_indices = @transform_19, window_bounds = array<i64: 128, 32>}, {pipeline_mode = #tpu.pipeline_mode<synchronous>, transform_indices = @transform_20, window_bounds = array<i64: 1, 32>}, {pipeline_mode = #tpu.pipeline_mode<synchronous>, transform_indices = @transform_21, window_bounds = array<i64: 1, 32>}, {pipeline_mode = #tpu.pipeline_mode<synchronous>, transform_indices = @transform_22, window_bounds = array<i64: 1, 32>}, {pipeline_mode = #tpu.pipeline_mode<synchronous>, transform_indices = @transform_23, window_bounds = array<i64: 2, 32, 16>}, {pipeline_mode = #tpu.pipeline_mode<synchronous>, transform_indices = @transform_24, window_bounds = array<i64: 2, 32, 16>}, {pipeline_mode = #tpu.pipeline_mode<synchronous>, transform_indices = @transform_25, window_bounds = array<i64: 2, 32, 16>}, {pipeline_mode = #tpu.pipeline_mode<synchronous>, transform_indices = @transform_26, window_bounds = array<i64: 2, 1, 16>}, {pipeline_mode = #tpu.pipeline_mode<synchronous>, transform_indices = @transform_27, window_bounds = array<i64: 2, 1, 16>}, {pipeline_mode = #tpu.pipeline_mode<synchronous>, transform_indices = @transform_28, window_bounds = array<i64: 2, 1, 16>}, {pipeline_mode = #tpu.pipeline_mode<synchronous>, transform_indices = @transform_29, window_bounds = array<i64: 2, 16, 32>}, {pipeline_mode = #tpu.pipeline_mode<synchronous>, transform_indices = @transform_30, window_bounds = array<i64: 1, 32>}, {pipeline_mode = #tpu.pipeline_mode<synchronous>, transform_indices = @transform_31, window_bounds = array<i64: 1, 32>}, {pipeline_mode = #tpu.pipeline_mode<synchronous>, transform_indices = @transform_32, window_bounds = array<i64: 1, 32>}, {pipeline_mode = #tpu.pipeline_mode<synchronous>, transform_indices = @transform_33, window_bounds = array<i64: 32, 128>}, {pipeline_mode = #tpu.pipeline_mode<synchronous>, transform_indices = @transform_34, window_bounds = array<i64: 1, 128>}, {pipeline_mode = #tpu.pipeline_mode<synchronous>, transform_indices = @transform_35, window_bounds = array<i64: 128, 32>}, {pipeline_mode = #tpu.pipeline_mode<synchronous>, transform_indices = @transform_36, window_bounds = array<i64: 1, 32>}, {pipeline_mode = #tpu.pipeline_mode<synchronous>, transform_indices = @transform_37, window_bounds = array<i64: 1, 32>}, {pipeline_mode = #tpu.pipeline_mode<synchronous>, transform_indices = @transform_38, window_bounds = array<i64: 1, 32>}, {pipeline_mode = #tpu.pipeline_mode<synchronous>, transform_indices = @transform_39, window_bounds = array<i64: 1, 32>}, {pipeline_mode = #tpu.pipeline_mode<synchronous>, transform_indices = @transform_40, window_bounds = array<i64: 1, 1>}, {transform_indices = @transform_41, window_bounds = array<i64: 1, 5, 32>}, {transform_indices = @transform_42, window_bounds = array<i64: 1, 1, 5>}]} {
    %c0 = arith.constant 0 : index
    %c0_0 = arith.constant 0 : index
    %0 = vector.load %arg6[%c0, %c0_0] : memref<1x32xf32, #tpu.memory_space<vmem>>, vector<1x32xf32>
    %c0_1 = arith.constant 0 : index
    %c0_2 = arith.constant 0 : index
    %1 = vector.load %arg7[%c0_1, %c0_2] : memref<1x32xf32, #tpu.memory_space<vmem>>, vector<1x32xf32>
    %c0_3 = arith.constant 0 : index
    %c0_4 = arith.constant 0 : index
    %c0_5 = arith.constant 0 : index
    %2 = vector.load %arg8[%c0_3, %c0_4, %c0_5] : memref<2x32x16xf32, #tpu.memory_space<vmem>>, vector<2x32x16xf32>
    %c0_6 = arith.constant 0 : index
    %c0_7 = arith.constant 0 : index
    %c0_8 = arith.constant 0 : index
    %3 = vector.load %arg9[%c0_6, %c0_7, %c0_8] : memref<2x32x16xf32, #tpu.memory_space<vmem>>, vector<2x32x16xf32>
    %c0_9 = arith.constant 0 : index
    %c0_10 = arith.constant 0 : index
    %c0_11 = arith.constant 0 : index
    %4 = vector.load %arg10[%c0_9, %c0_10, %c0_11] : memref<2x32x16xf32, #tpu.memory_space<vmem>>, vector<2x32x16xf32>
    %c0_12 = arith.constant 0 : index
    %c0_13 = arith.constant 0 : index
    %c0_14 = arith.constant 0 : index
    %5 = vector.load %arg11[%c0_12, %c0_13, %c0_14] : memref<2x1x16xf32, #tpu.memory_space<vmem>>, vector<2x1x16xf32>
    %c0_15 = arith.constant 0 : index
    %c0_16 = arith.constant 0 : index
    %c0_17 = arith.constant 0 : index
    %6 = vector.load %arg12[%c0_15, %c0_16, %c0_17] : memref<2x1x16xf32, #tpu.memory_space<vmem>>, vector<2x1x16xf32>
    %c0_18 = arith.constant 0 : index
    %c0_19 = arith.constant 0 : index
    %c0_20 = arith.constant 0 : index
    %7 = vector.load %arg13[%c0_18, %c0_19, %c0_20] : memref<2x1x16xf32, #tpu.memory_space<vmem>>, vector<2x1x16xf32>
    %c0_21 = arith.constant 0 : index
    %c0_22 = arith.constant 0 : index
    %c0_23 = arith.constant 0 : index
    %8 = vector.load %arg14[%c0_21, %c0_22, %c0_23] : memref<2x16x32xf32, #tpu.memory_space<vmem>>, vector<2x16x32xf32>
    %c0_24 = arith.constant 0 : index
    %c0_25 = arith.constant 0 : index
    %9 = vector.load %arg15[%c0_24, %c0_25] : memref<1x32xf32, #tpu.memory_space<vmem>>, vector<1x32xf32>
    %c0_26 = arith.constant 0 : index
    %c0_27 = arith.constant 0 : index
    %10 = vector.load %arg16[%c0_26, %c0_27] : memref<1x32xf32, #tpu.memory_space<vmem>>, vector<1x32xf32>
    %c0_28 = arith.constant 0 : index
    %c0_29 = arith.constant 0 : index
    %11 = vector.load %arg17[%c0_28, %c0_29] : memref<1x32xf32, #tpu.memory_space<vmem>>, vector<1x32xf32>
    %c0_30 = arith.constant 0 : index
    %c0_31 = arith.constant 0 : index
    %12 = vector.load %arg18[%c0_30, %c0_31] : memref<32x128xf32, #tpu.memory_space<vmem>>, vector<32x128xf32>
    %c0_32 = arith.constant 0 : index
    %c0_33 = arith.constant 0 : index
    %13 = vector.load %arg19[%c0_32, %c0_33] : memref<1x128xf32, #tpu.memory_space<vmem>>, vector<1x128xf32>
    %c0_34 = arith.constant 0 : index
    %c0_35 = arith.constant 0 : index
    %14 = vector.load %arg20[%c0_34, %c0_35] : memref<128x32xf32, #tpu.memory_space<vmem>>, vector<128x32xf32>
    %c0_36 = arith.constant 0 : index
    %c0_37 = arith.constant 0 : index
    %15 = vector.load %arg21[%c0_36, %c0_37] : memref<1x32xf32, #tpu.memory_space<vmem>>, vector<1x32xf32>
    %c0_38 = arith.constant 0 : index
    %c0_39 = arith.constant 0 : index
    %16 = vector.load %arg22[%c0_38, %c0_39] : memref<1x32xf32, #tpu.memory_space<vmem>>, vector<1x32xf32>
    %c0_40 = arith.constant 0 : index
    %c0_41 = arith.constant 0 : index
    %17 = vector.load %arg23[%c0_40, %c0_41] : memref<1x32xf32, #tpu.memory_space<vmem>>, vector<1x32xf32>
    %c0_42 = arith.constant 0 : index
    %c0_43 = arith.constant 0 : index
    %c0_44 = arith.constant 0 : index
    %18 = vector.load %arg24[%c0_42, %c0_43, %c0_44] : memref<2x32x16xf32, #tpu.memory_space<vmem>>, vector<2x32x16xf32>
    %c0_45 = arith.constant 0 : index
    %c0_46 = arith.constant 0 : index
    %c0_47 = arith.constant 0 : index
    %19 = vector.load %arg25[%c0_45, %c0_46, %c0_47] : memref<2x32x16xf32, #tpu.memory_space<vmem>>, vector<2x32x16xf32>
    %c0_48 = arith.constant 0 : index
    %c0_49 = arith.constant 0 : index
    %c0_50 = arith.constant 0 : index
    %20 = vector.load %arg26[%c0_48, %c0_49, %c0_50] : memref<2x32x16xf32, #tpu.memory_space<vmem>>, vector<2x32x16xf32>
    %c0_51 = arith.constant 0 : index
    %c0_52 = arith.constant 0 : index
    %c0_53 = arith.constant 0 : index
    %21 = vector.load %arg27[%c0_51, %c0_52, %c0_53] : memref<2x1x16xf32, #tpu.memory_space<vmem>>, vector<2x1x16xf32>
    %c0_54 = arith.constant 0 : index
    %c0_55 = arith.constant 0 : index
    %c0_56 = arith.constant 0 : index
    %22 = vector.load %arg28[%c0_54, %c0_55, %c0_56] : memref<2x1x16xf32, #tpu.memory_space<vmem>>, vector<2x1x16xf32>
    %c0_57 = arith.constant 0 : index
    %c0_58 = arith.constant 0 : index
    %c0_59 = arith.constant 0 : index
    %23 = vector.load %arg29[%c0_57, %c0_58, %c0_59] : memref<2x1x16xf32, #tpu.memory_space<vmem>>, vector<2x1x16xf32>
    %c0_60 = arith.constant 0 : index
    %c0_61 = arith.constant 0 : index
    %c0_62 = arith.constant 0 : index
    %24 = vector.load %arg30[%c0_60, %c0_61, %c0_62] : memref<2x16x32xf32, #tpu.memory_space<vmem>>, vector<2x16x32xf32>
    %c0_63 = arith.constant 0 : index
    %c0_64 = arith.constant 0 : index
    %25 = vector.load %arg31[%c0_63, %c0_64] : memref<1x32xf32, #tpu.memory_space<vmem>>, vector<1x32xf32>
    %c0_65 = arith.constant 0 : index
    %c0_66 = arith.constant 0 : index
    %26 = vector.load %arg32[%c0_65, %c0_66] : memref<1x32xf32, #tpu.memory_space<vmem>>, vector<1x32xf32>
    %c0_67 = arith.constant 0 : index
    %c0_68 = arith.constant 0 : index
    %27 = vector.load %arg33[%c0_67, %c0_68] : memref<1x32xf32, #tpu.memory_space<vmem>>, vector<1x32xf32>
    %c0_69 = arith.constant 0 : index
    %c0_70 = arith.constant 0 : index
    %28 = vector.load %arg34[%c0_69, %c0_70] : memref<32x128xf32, #tpu.memory_space<vmem>>, vector<32x128xf32>
    %c0_71 = arith.constant 0 : index
    %c0_72 = arith.constant 0 : index
    %29 = vector.load %arg35[%c0_71, %c0_72] : memref<1x128xf32, #tpu.memory_space<vmem>>, vector<1x128xf32>
    %c0_73 = arith.constant 0 : index
    %c0_74 = arith.constant 0 : index
    %30 = vector.load %arg36[%c0_73, %c0_74] : memref<128x32xf32, #tpu.memory_space<vmem>>, vector<128x32xf32>
    %c0_75 = arith.constant 0 : index
    %c0_76 = arith.constant 0 : index
    %31 = vector.load %arg37[%c0_75, %c0_76] : memref<1x32xf32, #tpu.memory_space<vmem>>, vector<1x32xf32>
    %c0_77 = arith.constant 0 : index
    %c0_78 = arith.constant 0 : index
    %c0_79 = arith.constant 0 : index
    %32 = vector.load %arg1[%c0_77, %c0_78, %c0_79] : memref<1x4x192xf32, #tpu.memory_space<vmem>>, vector<1x4x192xf32>
    %33 = vector.shape_cast %32 : vector<1x4x192xf32> to vector<4x192xf32>
    %c0_80 = arith.constant 0 : index
    %c0_81 = arith.constant 0 : index
    %34 = vector.load %arg2[%c0_80, %c0_81] : memref<192x32xf32, #tpu.memory_space<vmem>>, vector<192x32xf32>
    %cst = arith.constant dense<0.000000e+00> : vector<4x32xf32>
    %35 = tpu.matmul %33, %34, %cst {dimension_numbers = #tpu.dot_dimension_numbers<[1], [0], [0], [1], [0, 0, 1, 1], [], []>} : vector<4x192xf32>, vector<192x32xf32>, vector<4x32xf32> -> vector<4x32xf32>
    %c0_82 = arith.constant 0 : index
    %c0_83 = arith.constant 0 : index
    %36 = vector.load %arg3[%c0_82, %c0_83] : memref<1x32xf32, #tpu.memory_space<vmem>>, vector<1x32xf32>
    %37 = vector.broadcast %36 : vector<1x32xf32> to vector<4x32xf32>
    %38 = arith.addf %35, %37 : vector<4x32xf32>
    %c0_84 = arith.constant 0 : index
    %c0_85 = arith.constant 0 : index
    %39 = vector.load %arg5[%c0_84, %c0_85] : memref<5x32xf32, #tpu.memory_space<vmem>>, vector<5x32xf32>
    %c0_86 = arith.constant 0 : index
    %c0_87 = arith.constant 0 : index
    %40 = vector.load %arg4[%c0_86, %c0_87] : memref<1x32xf32, #tpu.memory_space<vmem>>, vector<1x32xf32>
    %41 = vector.extract_strided_slice %39 {offsets = [0, 0], sizes = [1, 32], strides = [1, 1]} : vector<5x32xf32> to vector<1x32xf32>
    %42 = arith.addf %40, %41 : vector<1x32xf32>
    %c0_88 = arith.constant 0 : index
    %c0_89 = arith.constant 0 : index
    %43 = vector.load %arg44[%c0_88, %c0_89] : memref<5x32xf32, #tpu.memory_space<vmem>>, vector<1x32xf32>
    tpu.vector_store %arg44[%c0_88, %c0_89], %42 {strides = array<i32>} : memref<5x32xf32, #tpu.memory_space<vmem>>, vector<1x32xf32>,
    %44 = vector.extract_strided_slice %39 {offsets = [1, 0], sizes = [4, 32], strides = [1, 1]} : vector<5x32xf32> to vector<4x32xf32>
    %45 = arith.addf %38, %44 : vector<4x32xf32>
    %c1 = arith.constant 1 : index
    %c0_90 = arith.constant 0 : index
    %46 = vector.load %arg44[%c1, %c0_90] : memref<5x32xf32, #tpu.memory_space<vmem>>, vector<4x32xf32>
    tpu.vector_store %arg44[%c1, %c0_90], %45 {strides = array<i32>} : memref<5x32xf32, #tpu.memory_space<vmem>>, vector<4x32xf32>,
    %c0_91 = arith.constant 0 : index
    %c0_92 = arith.constant 0 : index
    %47 = vector.load %arg44[%c0_91, %c0_92] : memref<5x32xf32, #tpu.memory_space<vmem>>, vector<5x32xf32>
    %cst_93 = arith.constant dense<0.000000e+00> : vector<5xf32>
    %48 = vector.multi_reduction <add>, %47, %cst_93 [1] : vector<5x32xf32> to vector<5xf32>
    %49 = vector.shape_cast %48 : vector<5xf32> to vector<5x1xf32>
    %cst_94 = arith.constant 3.200000e+01 : f32
    %50 = vector.broadcast %cst_94 : f32 to vector<5x1xf32>
    %51 = arith.divf %49, %50 : vector<5x1xf32>
    %52 = vector.broadcast %51 : vector<5x1xf32> to vector<5x32xf32>
    %53 = arith.subf %47, %52 : vector<5x32xf32>
    %54 = arith.mulf %53, %53 : vector<5x32xf32>
    %cst_95 = arith.constant dense<0.000000e+00> : vector<5xf32>
    %55 = vector.multi_reduction <add>, %54, %cst_95 [1] : vector<5x32xf32> to vector<5xf32>
    %56 = vector.shape_cast %55 : vector<5xf32> to vector<5x1xf32>
    %cst_96 = arith.constant 3.200000e+01 : f32
    %57 = vector.broadcast %cst_96 : f32 to vector<5x1xf32>
    %58 = arith.divf %56, %57 : vector<5x1xf32>
    %59 = vector.broadcast %51 : vector<5x1xf32> to vector<5x32xf32>
    %60 = arith.subf %47, %59 : vector<5x32xf32>
    %cst_97 = arith.constant 9.99999997E-7 : f32
    %61 = vector.broadcast %cst_97 : f32 to vector<5x1xf32>
    %62 = arith.addf %58, %61 : vector<5x1xf32>
    %63 = math.rsqrt %62 : vector<5x1xf32>
    %64 = vector.broadcast %63 : vector<5x1xf32> to vector<5x32xf32>
    %65 = arith.mulf %60, %64 : vector<5x32xf32>
    %66 = vector.broadcast %0 : vector<1x32xf32> to vector<5x32xf32>
    %67 = arith.mulf %65, %66 : vector<5x32xf32>
    %68 = vector.broadcast %1 : vector<1x32xf32> to vector<5x32xf32>
    %69 = arith.addf %67, %68 : vector<5x32xf32>
    %70 = vector.extract_strided_slice %2 {offsets = [0, 0, 0], sizes = [1, 32, 16], strides = [1, 1, 1]} : vector<2x32x16xf32> to vector<1x32x16xf32>
    %71 = vector.shape_cast %70 : vector<1x32x16xf32> to vector<32x16xf32>
    %cst_98 = arith.constant dense<0.000000e+00> : vector<5x16xf32>
    %72 = tpu.matmul %69, %71, %cst_98 {dimension_numbers = #tpu.dot_dimension_numbers<[1], [0], [0], [1], [0, 0, 1, 1], [], []>} : vector<5x32xf32>, vector<32x16xf32>, vector<5x16xf32> -> vector<5x16xf32>
    %73 = vector.extract_strided_slice %5 {offsets = [0, 0, 0], sizes = [1, 1, 16], strides = [1, 1, 1]} : vector<2x1x16xf32> to vector<1x1x16xf32>
    %74 = vector.shape_cast %73 : vector<1x1x16xf32> to vector<1x16xf32>
    %75 = vector.broadcast %74 : vector<1x16xf32> to vector<5x16xf32>
    %76 = arith.addf %72, %75 : vector<5x16xf32>
    %77 = vector.extract_strided_slice %3 {offsets = [0, 0, 0], sizes = [1, 32, 16], strides = [1, 1, 1]} : vector<2x32x16xf32> to vector<1x32x16xf32>
    %78 = vector.shape_cast %77 : vector<1x32x16xf32> to vector<32x16xf32>
    %cst_99 = arith.constant dense<0.000000e+00> : vector<5x16xf32>
    %79 = tpu.matmul %69, %78, %cst_99 {dimension_numbers = #tpu.dot_dimension_numbers<[1], [0], [0], [1], [0, 0, 1, 1], [], []>} : vector<5x32xf32>, vector<32x16xf32>, vector<5x16xf32> -> vector<5x16xf32>
    %80 = vector.extract_strided_slice %6 {offsets = [0, 0, 0], sizes = [1, 1, 16], strides = [1, 1, 1]} : vector<2x1x16xf32> to vector<1x1x16xf32>
    %81 = vector.shape_cast %80 : vector<1x1x16xf32> to vector<1x16xf32>
    %82 = vector.broadcast %81 : vector<1x16xf32> to vector<5x16xf32>
    %83 = arith.addf %79, %82 : vector<5x16xf32>
    %84 = vector.extract_strided_slice %4 {offsets = [0, 0, 0], sizes = [1, 32, 16], strides = [1, 1, 1]} : vector<2x32x16xf32> to vector<1x32x16xf32>
    %85 = vector.shape_cast %84 : vector<1x32x16xf32> to vector<32x16xf32>
    %cst_100 = arith.constant dense<0.000000e+00> : vector<5x16xf32>
    %86 = tpu.matmul %69, %85, %cst_100 {dimension_numbers = #tpu.dot_dimension_numbers<[1], [0], [0], [1], [0, 0, 1, 1], [], []>} : vector<5x32xf32>, vector<32x16xf32>, vector<5x16xf32> -> vector<5x16xf32>
    %87 = vector.extract_strided_slice %7 {offsets = [0, 0, 0], sizes = [1, 1, 16], strides = [1, 1, 1]} : vector<2x1x16xf32> to vector<1x1x16xf32>
    %88 = vector.shape_cast %87 : vector<1x1x16xf32> to vector<1x16xf32>
    %89 = vector.broadcast %88 : vector<1x16xf32> to vector<5x16xf32>
    %90 = arith.addf %86, %89 : vector<5x16xf32>
    %cst_101 = arith.constant dense<0.000000e+00> : vector<5x5xf32>
    %91 = tpu.matmul %76, %83, %cst_101 {dimension_numbers = #tpu.dot_dimension_numbers<[1], [1], [0], [0], [0, 0, 1, 0], [], []>} : vector<5x16xf32>, vector<5x16xf32>, vector<5x5xf32> -> vector<5x5xf32>
    %cst_102 = arith.constant 2.500000e-01 : f32
    %92 = vector.broadcast %cst_102 : f32 to vector<5x5xf32>
    %93 = arith.mulf %91, %92 : vector<5x5xf32>
    %cst_103 = arith.constant dense<0xFF800000> : vector<5xf32>
    %94 = vector.multi_reduction <maximumf>, %93, %cst_103 [1] : vector<5x5xf32> to vector<5xf32>
    %95 = vector.shape_cast %94 : vector<5xf32> to vector<5x1xf32>
    %96 = vector.broadcast %95 : vector<5x1xf32> to vector<5x5xf32>
    %97 = arith.subf %93, %96 : vector<5x5xf32>
    %98 = math.exp %97 : vector<5x5xf32>
    %cst_104 = arith.constant dense<0.000000e+00> : vector<5xf32>
    %99 = vector.multi_reduction <add>, %98, %cst_104 [1] : vector<5x5xf32> to vector<5xf32>
    %100 = vector.shape_cast %99 : vector<5xf32> to vector<5x1xf32>
    %101 = tpu.reciprocal %100 {approx = true} : vector<5x1xf32> -> vector<5x1xf32>
    %102 = vector.broadcast %101 : vector<5x1xf32> to vector<5x5xf32>
    %103 = arith.mulf %98, %102 : vector<5x5xf32>
    %cst_105 = arith.constant dense<0.000000e+00> : vector<5x16xf32>
    %104 = tpu.matmul %103, %90, %cst_105 {dimension_numbers = #tpu.dot_dimension_numbers<[1], [0], [0], [1], [0, 0, 1, 1], [], []>} : vector<5x5xf32>, vector<5x16xf32>, vector<5x16xf32> -> vector<5x16xf32>
    %105 = vector.extract_strided_slice %8 {offsets = [0, 0, 0], sizes = [1, 16, 32], strides = [1, 1, 1]} : vector<2x16x32xf32> to vector<1x16x32xf32>
    %106 = vector.shape_cast %105 : vector<1x16x32xf32> to vector<16x32xf32>
    %cst_106 = arith.constant dense<0.000000e+00> : vector<5x32xf32>
    %107 = tpu.matmul %104, %106, %cst_106 {dimension_numbers = #tpu.dot_dimension_numbers<[1], [0], [0], [1], [0, 0, 1, 1], [], []>} : vector<5x16xf32>, vector<16x32xf32>, vector<5x32xf32> -> vector<5x32xf32>
    %108 = vector.extract_strided_slice %2 {offsets = [1, 0, 0], sizes = [1, 32, 16], strides = [1, 1, 1]} : vector<2x32x16xf32> to vector<1x32x16xf32>
    %109 = vector.shape_cast %108 : vector<1x32x16xf32> to vector<32x16xf32>
    %cst_107 = arith.constant dense<0.000000e+00> : vector<5x16xf32>
    %110 = tpu.matmul %69, %109, %cst_107 {dimension_numbers = #tpu.dot_dimension_numbers<[1], [0], [0], [1], [0, 0, 1, 1], [], []>} : vector<5x32xf32>, vector<32x16xf32>, vector<5x16xf32> -> vector<5x16xf32>
    %111 = vector.extract_strided_slice %5 {offsets = [1, 0, 0], sizes = [1, 1, 16], strides = [1, 1, 1]} : vector<2x1x16xf32> to vector<1x1x16xf32>
    %112 = vector.shape_cast %111 : vector<1x1x16xf32> to vector<1x16xf32>
    %113 = vector.broadcast %112 : vector<1x16xf32> to vector<5x16xf32>
    %114 = arith.addf %110, %113 : vector<5x16xf32>
    %115 = vector.extract_strided_slice %3 {offsets = [1, 0, 0], sizes = [1, 32, 16], strides = [1, 1, 1]} : vector<2x32x16xf32> to vector<1x32x16xf32>
    %116 = vector.shape_cast %115 : vector<1x32x16xf32> to vector<32x16xf32>
    %cst_108 = arith.constant dense<0.000000e+00> : vector<5x16xf32>
    %117 = tpu.matmul %69, %116, %cst_108 {dimension_numbers = #tpu.dot_dimension_numbers<[1], [0], [0], [1], [0, 0, 1, 1], [], []>} : vector<5x32xf32>, vector<32x16xf32>, vector<5x16xf32> -> vector<5x16xf32>
    %118 = vector.extract_strided_slice %6 {offsets = [1, 0, 0], sizes = [1, 1, 16], strides = [1, 1, 1]} : vector<2x1x16xf32> to vector<1x1x16xf32>
    %119 = vector.shape_cast %118 : vector<1x1x16xf32> to vector<1x16xf32>
    %120 = vector.broadcast %119 : vector<1x16xf32> to vector<5x16xf32>
    %121 = arith.addf %117, %120 : vector<5x16xf32>
    %122 = vector.extract_strided_slice %4 {offsets = [1, 0, 0], sizes = [1, 32, 16], strides = [1, 1, 1]} : vector<2x32x16xf32> to vector<1x32x16xf32>
    %123 = vector.shape_cast %122 : vector<1x32x16xf32> to vector<32x16xf32>
    %cst_109 = arith.constant dense<0.000000e+00> : vector<5x16xf32>
    %124 = tpu.matmul %69, %123, %cst_109 {dimension_numbers = #tpu.dot_dimension_numbers<[1], [0], [0], [1], [0, 0, 1, 1], [], []>} : vector<5x32xf32>, vector<32x16xf32>, vector<5x16xf32> -> vector<5x16xf32>
    %125 = vector.extract_strided_slice %7 {offsets = [1, 0, 0], sizes = [1, 1, 16], strides = [1, 1, 1]} : vector<2x1x16xf32> to vector<1x1x16xf32>
    %126 = vector.shape_cast %125 : vector<1x1x16xf32> to vector<1x16xf32>
    %127 = vector.broadcast %126 : vector<1x16xf32> to vector<5x16xf32>
    %128 = arith.addf %124, %127 : vector<5x16xf32>
    %cst_110 = arith.constant dense<0.000000e+00> : vector<5x5xf32>
    %129 = tpu.matmul %114, %121, %cst_110 {dimension_numbers = #tpu.dot_dimension_numbers<[1], [1], [0], [0], [0, 0, 1, 0], [], []>} : vector<5x16xf32>, vector<5x16xf32>, vector<5x5xf32> -> vector<5x5xf32>
    %cst_111 = arith.constant 2.500000e-01 : f32
    %130 = vector.broadcast %cst_111 : f32 to vector<5x5xf32>
    %131 = arith.mulf %129, %130 : vector<5x5xf32>
    %cst_112 = arith.constant dense<0xFF800000> : vector<5xf32>
    %132 = vector.multi_reduction <maximumf>, %131, %cst_112 [1] : vector<5x5xf32> to vector<5xf32>
    %133 = vector.shape_cast %132 : vector<5xf32> to vector<5x1xf32>
    %134 = vector.broadcast %133 : vector<5x1xf32> to vector<5x5xf32>
    %135 = arith.subf %131, %134 : vector<5x5xf32>
    %136 = math.exp %135 : vector<5x5xf32>
    %cst_113 = arith.constant dense<0.000000e+00> : vector<5xf32>
    %137 = vector.multi_reduction <add>, %136, %cst_113 [1] : vector<5x5xf32> to vector<5xf32>
    %138 = vector.shape_cast %137 : vector<5xf32> to vector<5x1xf32>
    %139 = tpu.reciprocal %138 {approx = true} : vector<5x1xf32> -> vector<5x1xf32>
    %140 = vector.broadcast %139 : vector<5x1xf32> to vector<5x5xf32>
    %141 = arith.mulf %136, %140 : vector<5x5xf32>
    %cst_114 = arith.constant dense<0.000000e+00> : vector<5x16xf32>
    %142 = tpu.matmul %141, %128, %cst_114 {dimension_numbers = #tpu.dot_dimension_numbers<[1], [0], [0], [1], [0, 0, 1, 1], [], []>} : vector<5x5xf32>, vector<5x16xf32>, vector<5x16xf32> -> vector<5x16xf32>
    %143 = vector.extract_strided_slice %8 {offsets = [1, 0, 0], sizes = [1, 16, 32], strides = [1, 1, 1]} : vector<2x16x32xf32> to vector<1x16x32xf32>
    %144 = vector.shape_cast %143 : vector<1x16x32xf32> to vector<16x32xf32>
    %cst_115 = arith.constant dense<0.000000e+00> : vector<5x32xf32>
    %145 = tpu.matmul %142, %144, %cst_115 {dimension_numbers = #tpu.dot_dimension_numbers<[1], [0], [0], [1], [0, 0, 1, 1], [], []>} : vector<5x16xf32>, vector<16x32xf32>, vector<5x32xf32> -> vector<5x32xf32>
    %146 = arith.addf %107, %145 : vector<5x32xf32>
    %147 = arith.addf %47, %146 : vector<5x32xf32>
    %148 = vector.broadcast %9 : vector<1x32xf32> to vector<5x32xf32>
    %149 = arith.addf %147, %148 : vector<5x32xf32>
    %cst_116 = arith.constant dense<0.000000e+00> : vector<5xf32>
    %150 = vector.multi_reduction <add>, %149, %cst_116 [1] : vector<5x32xf32> to vector<5xf32>
    %151 = vector.shape_cast %150 : vector<5xf32> to vector<5x1xf32>
    %cst_117 = arith.constant 3.200000e+01 : f32
    %152 = vector.broadcast %cst_117 : f32 to vector<5x1xf32>
    %153 = arith.divf %151, %152 : vector<5x1xf32>
    %154 = vector.broadcast %153 : vector<5x1xf32> to vector<5x32xf32>
    %155 = arith.subf %149, %154 : vector<5x32xf32>
    %156 = arith.mulf %155, %155 : vector<5x32xf32>
    %cst_118 = arith.constant dense<0.000000e+00> : vector<5xf32>
    %157 = vector.multi_reduction <add>, %156, %cst_118 [1] : vector<5x32xf32> to vector<5xf32>
    %158 = vector.shape_cast %157 : vector<5xf32> to vector<5x1xf32>
    %cst_119 = arith.constant 3.200000e+01 : f32
    %159 = vector.broadcast %cst_119 : f32 to vector<5x1xf32>
    %160 = arith.divf %158, %159 : vector<5x1xf32>
    %161 = vector.broadcast %153 : vector<5x1xf32> to vector<5x32xf32>
    %162 = arith.subf %149, %161 : vector<5x32xf32>
    %cst_120 = arith.constant 9.99999997E-7 : f32
    %163 = vector.broadcast %cst_120 : f32 to vector<5x1xf32>
    %164 = arith.addf %160, %163 : vector<5x1xf32>
    %165 = math.rsqrt %164 : vector<5x1xf32>
    %166 = vector.broadcast %165 : vector<5x1xf32> to vector<5x32xf32>
    %167 = arith.mulf %162, %166 : vector<5x32xf32>
    %168 = vector.broadcast %10 : vector<1x32xf32> to vector<5x32xf32>
    %169 = arith.mulf %167, %168 : vector<5x32xf32>
    %170 = vector.broadcast %11 : vector<1x32xf32> to vector<5x32xf32>
    %171 = arith.addf %169, %170 : vector<5x32xf32>
    %cst_121 = arith.constant dense<0.000000e+00> : vector<5x128xf32>
    %172 = tpu.matmul %171, %12, %cst_121 {dimension_numbers = #tpu.dot_dimension_numbers<[1], [0], [0], [1], [0, 0, 1, 1], [], []>} : vector<5x32xf32>, vector<32x128xf32>, vector<5x128xf32> -> vector<5x128xf32>
    %173 = vector.broadcast %13 : vector<1x128xf32> to vector<5x128xf32>
    %174 = arith.addf %172, %173 : vector<5x128xf32>
    %175 = arith.mulf %174, %174 : vector<5x128xf32>
    %176 = arith.mulf %174, %175 : vector<5x128xf32>
    %cst_122 = arith.constant 4.471500e-02 : f32
    %177 = vector.broadcast %cst_122 : f32 to vector<5x128xf32>
    %178 = arith.mulf %177, %176 : vector<5x128xf32>
    %179 = arith.addf %174, %178 : vector<5x128xf32>
    %cst_123 = arith.constant 0.797884583 : f32
    %180 = vector.broadcast %cst_123 : f32 to vector<5x128xf32>
    %181 = arith.mulf %180, %179 : vector<5x128xf32>
    %182 = math.tanh %181 : vector<5x128xf32>
    %cst_124 = arith.constant 1.000000e+00 : f32
    %183 = vector.broadcast %cst_124 : f32 to vector<5x128xf32>
    %184 = arith.addf %183, %182 : vector<5x128xf32>
    %cst_125 = arith.constant 5.000000e-01 : f32
    %185 = vector.broadcast %cst_125 : f32 to vector<5x128xf32>
    %186 = arith.mulf %185, %184 : vector<5x128xf32>
    %187 = arith.mulf %174, %186 : vector<5x128xf32>
    %cst_126 = arith.constant dense<0.000000e+00> : vector<5x32xf32>
    %188 = tpu.matmul %187, %14, %cst_126 {dimension_numbers = #tpu.dot_dimension_numbers<[1], [0], [0], [1], [0, 0, 1, 1], [], []>} : vector<5x128xf32>, vector<128x32xf32>, vector<5x32xf32> -> vector<5x32xf32>
    %189 = vector.broadcast %15 : vector<1x32xf32> to vector<5x32xf32>
    %190 = arith.addf %188, %189 : vector<5x32xf32>
    %191 = arith.addf %149, %190 : vector<5x32xf32>
    %cst_127 = arith.constant dense<0.000000e+00> : vector<5xf32>
    %192 = vector.multi_reduction <add>, %191, %cst_127 [1] : vector<5x32xf32> to vector<5xf32>
    %193 = vector.shape_cast %192 : vector<5xf32> to vector<5x1xf32>
    %cst_128 = arith.constant 3.200000e+01 : f32
    %194 = vector.broadcast %cst_128 : f32 to vector<5x1xf32>
    %195 = arith.divf %193, %194 : vector<5x1xf32>
    %196 = vector.broadcast %195 : vector<5x1xf32> to vector<5x32xf32>
    %197 = arith.subf %191, %196 : vector<5x32xf32>
    %198 = arith.mulf %197, %197 : vector<5x32xf32>
    %cst_129 = arith.constant dense<0.000000e+00> : vector<5xf32>
    %199 = vector.multi_reduction <add>, %198, %cst_129 [1] : vector<5x32xf32> to vector<5xf32>
    %200 = vector.shape_cast %199 : vector<5xf32> to vector<5x1xf32>
    %cst_130 = arith.constant 3.200000e+01 : f32
    %201 = vector.broadcast %cst_130 : f32 to vector<5x1xf32>
    %202 = arith.divf %200, %201 : vector<5x1xf32>
    %203 = vector.broadcast %195 : vector<5x1xf32> to vector<5x32xf32>
    %204 = arith.subf %191, %203 : vector<5x32xf32>
    %cst_131 = arith.constant 9.99999997E-7 : f32
    %205 = vector.broadcast %cst_131 : f32 to vector<5x1xf32>
    %206 = arith.addf %202, %205 : vector<5x1xf32>
    %207 = math.rsqrt %206 : vector<5x1xf32>
    %208 = vector.broadcast %207 : vector<5x1xf32> to vector<5x32xf32>
    %209 = arith.mulf %204, %208 : vector<5x32xf32>
    %210 = vector.broadcast %16 : vector<1x32xf32> to vector<5x32xf32>
    %211 = arith.mulf %209, %210 : vector<5x32xf32>
    %212 = vector.broadcast %17 : vector<1x32xf32> to vector<5x32xf32>
    %213 = arith.addf %211, %212 : vector<5x32xf32>
    %214 = vector.extract_strided_slice %18 {offsets = [0, 0, 0], sizes = [1, 32, 16], strides = [1, 1, 1]} : vector<2x32x16xf32> to vector<1x32x16xf32>
    %215 = vector.shape_cast %214 : vector<1x32x16xf32> to vector<32x16xf32>
    %cst_132 = arith.constant dense<0.000000e+00> : vector<5x16xf32>
    %216 = tpu.matmul %213, %215, %cst_132 {dimension_numbers = #tpu.dot_dimension_numbers<[1], [0], [0], [1], [0, 0, 1, 1], [], []>} : vector<5x32xf32>, vector<32x16xf32>, vector<5x16xf32> -> vector<5x16xf32>
    %217 = vector.extract_strided_slice %21 {offsets = [0, 0, 0], sizes = [1, 1, 16], strides = [1, 1, 1]} : vector<2x1x16xf32> to vector<1x1x16xf32>
    %218 = vector.shape_cast %217 : vector<1x1x16xf32> to vector<1x16xf32>
    %219 = vector.broadcast %218 : vector<1x16xf32> to vector<5x16xf32>
    %220 = arith.addf %216, %219 : vector<5x16xf32>
    %221 = vector.extract_strided_slice %19 {offsets = [0, 0, 0], sizes = [1, 32, 16], strides = [1, 1, 1]} : vector<2x32x16xf32> to vector<1x32x16xf32>
    %222 = vector.shape_cast %221 : vector<1x32x16xf32> to vector<32x16xf32>
    %cst_133 = arith.constant dense<0.000000e+00> : vector<5x16xf32>
    %223 = tpu.matmul %213, %222, %cst_133 {dimension_numbers = #tpu.dot_dimension_numbers<[1], [0], [0], [1], [0, 0, 1, 1], [], []>} : vector<5x32xf32>, vector<32x16xf32>, vector<5x16xf32> -> vector<5x16xf32>
    %224 = vector.extract_strided_slice %22 {offsets = [0, 0, 0], sizes = [1, 1, 16], strides = [1, 1, 1]} : vector<2x1x16xf32> to vector<1x1x16xf32>
    %225 = vector.shape_cast %224 : vector<1x1x16xf32> to vector<1x16xf32>
    %226 = vector.broadcast %225 : vector<1x16xf32> to vector<5x16xf32>
    %227 = arith.addf %223, %226 : vector<5x16xf32>
    %228 = vector.extract_strided_slice %20 {offsets = [0, 0, 0], sizes = [1, 32, 16], strides = [1, 1, 1]} : vector<2x32x16xf32> to vector<1x32x16xf32>
    %229 = vector.shape_cast %228 : vector<1x32x16xf32> to vector<32x16xf32>
    %cst_134 = arith.constant dense<0.000000e+00> : vector<5x16xf32>
    %230 = tpu.matmul %213, %229, %cst_134 {dimension_numbers = #tpu.dot_dimension_numbers<[1], [0], [0], [1], [0, 0, 1, 1], [], []>} : vector<5x32xf32>, vector<32x16xf32>, vector<5x16xf32> -> vector<5x16xf32>
    %231 = vector.extract_strided_slice %23 {offsets = [0, 0, 0], sizes = [1, 1, 16], strides = [1, 1, 1]} : vector<2x1x16xf32> to vector<1x1x16xf32>
    %232 = vector.shape_cast %231 : vector<1x1x16xf32> to vector<1x16xf32>
    %233 = vector.broadcast %232 : vector<1x16xf32> to vector<5x16xf32>
    %234 = arith.addf %230, %233 : vector<5x16xf32>
    %cst_135 = arith.constant dense<0.000000e+00> : vector<5x5xf32>
    %235 = tpu.matmul %220, %227, %cst_135 {dimension_numbers = #tpu.dot_dimension_numbers<[1], [1], [0], [0], [0, 0, 1, 0], [], []>} : vector<5x16xf32>, vector<5x16xf32>, vector<5x5xf32> -> vector<5x5xf32>
    %cst_136 = arith.constant 2.500000e-01 : f32
    %236 = vector.broadcast %cst_136 : f32 to vector<5x5xf32>
    %237 = arith.mulf %235, %236 : vector<5x5xf32>
    %cst_137 = arith.constant dense<0xFF800000> : vector<5xf32>
    %238 = vector.multi_reduction <maximumf>, %237, %cst_137 [1] : vector<5x5xf32> to vector<5xf32>
    %239 = vector.shape_cast %238 : vector<5xf32> to vector<5x1xf32>
    %240 = vector.broadcast %239 : vector<5x1xf32> to vector<5x5xf32>
    %241 = arith.subf %237, %240 : vector<5x5xf32>
    %242 = math.exp %241 : vector<5x5xf32>
    %cst_138 = arith.constant dense<0.000000e+00> : vector<5xf32>
    %243 = vector.multi_reduction <add>, %242, %cst_138 [1] : vector<5x5xf32> to vector<5xf32>
    %244 = vector.shape_cast %243 : vector<5xf32> to vector<5x1xf32>
    %245 = tpu.reciprocal %244 {approx = true} : vector<5x1xf32> -> vector<5x1xf32>
    %246 = vector.broadcast %245 : vector<5x1xf32> to vector<5x5xf32>
    %247 = arith.mulf %242, %246 : vector<5x5xf32>
    %cst_139 = arith.constant dense<0.000000e+00> : vector<5x16xf32>
    %248 = tpu.matmul %247, %234, %cst_139 {dimension_numbers = #tpu.dot_dimension_numbers<[1], [0], [0], [1], [0, 0, 1, 1], [], []>} : vector<5x5xf32>, vector<5x16xf32>, vector<5x16xf32> -> vector<5x16xf32>
    %249 = vector.extract_strided_slice %24 {offsets = [0, 0, 0], sizes = [1, 16, 32], strides = [1, 1, 1]} : vector<2x16x32xf32> to vector<1x16x32xf32>
    %250 = vector.shape_cast %249 : vector<1x16x32xf32> to vector<16x32xf32>
    %cst_140 = arith.constant dense<0.000000e+00> : vector<5x32xf32>
    %251 = tpu.matmul %248, %250, %cst_140 {dimension_numbers = #tpu.dot_dimension_numbers<[1], [0], [0], [1], [0, 0, 1, 1], [], []>} : vector<5x16xf32>, vector<16x32xf32>, vector<5x32xf32> -> vector<5x32xf32>
    %252 = vector.extract_strided_slice %18 {offsets = [1, 0, 0], sizes = [1, 32, 16], strides = [1, 1, 1]} : vector<2x32x16xf32> to vector<1x32x16xf32>
    %253 = vector.shape_cast %252 : vector<1x32x16xf32> to vector<32x16xf32>
    %cst_141 = arith.constant dense<0.000000e+00> : vector<5x16xf32>
    %254 = tpu.matmul %213, %253, %cst_141 {dimension_numbers = #tpu.dot_dimension_numbers<[1], [0], [0], [1], [0, 0, 1, 1], [], []>} : vector<5x32xf32>, vector<32x16xf32>, vector<5x16xf32> -> vector<5x16xf32>
    %255 = vector.extract_strided_slice %21 {offsets = [1, 0, 0], sizes = [1, 1, 16], strides = [1, 1, 1]} : vector<2x1x16xf32> to vector<1x1x16xf32>
    %256 = vector.shape_cast %255 : vector<1x1x16xf32> to vector<1x16xf32>
    %257 = vector.broadcast %256 : vector<1x16xf32> to vector<5x16xf32>
    %258 = arith.addf %254, %257 : vector<5x16xf32>
    %259 = vector.extract_strided_slice %19 {offsets = [1, 0, 0], sizes = [1, 32, 16], strides = [1, 1, 1]} : vector<2x32x16xf32> to vector<1x32x16xf32>
    %260 = vector.shape_cast %259 : vector<1x32x16xf32> to vector<32x16xf32>
    %cst_142 = arith.constant dense<0.000000e+00> : vector<5x16xf32>
    %261 = tpu.matmul %213, %260, %cst_142 {dimension_numbers = #tpu.dot_dimension_numbers<[1], [0], [0], [1], [0, 0, 1, 1], [], []>} : vector<5x32xf32>, vector<32x16xf32>, vector<5x16xf32> -> vector<5x16xf32>
    %262 = vector.extract_strided_slice %22 {offsets = [1, 0, 0], sizes = [1, 1, 16], strides = [1, 1, 1]} : vector<2x1x16xf32> to vector<1x1x16xf32>
    %263 = vector.shape_cast %262 : vector<1x1x16xf32> to vector<1x16xf32>
    %264 = vector.broadcast %263 : vector<1x16xf32> to vector<5x16xf32>
    %265 = arith.addf %261, %264 : vector<5x16xf32>
    %266 = vector.extract_strided_slice %20 {offsets = [1, 0, 0], sizes = [1, 32, 16], strides = [1, 1, 1]} : vector<2x32x16xf32> to vector<1x32x16xf32>
    %267 = vector.shape_cast %266 : vector<1x32x16xf32> to vector<32x16xf32>
    %cst_143 = arith.constant dense<0.000000e+00> : vector<5x16xf32>
    %268 = tpu.matmul %213, %267, %cst_143 {dimension_numbers = #tpu.dot_dimension_numbers<[1], [0], [0], [1], [0, 0, 1, 1], [], []>} : vector<5x32xf32>, vector<32x16xf32>, vector<5x16xf32> -> vector<5x16xf32>
    %269 = vector.extract_strided_slice %23 {offsets = [1, 0, 0], sizes = [1, 1, 16], strides = [1, 1, 1]} : vector<2x1x16xf32> to vector<1x1x16xf32>
    %270 = vector.shape_cast %269 : vector<1x1x16xf32> to vector<1x16xf32>
    %271 = vector.broadcast %270 : vector<1x16xf32> to vector<5x16xf32>
    %272 = arith.addf %268, %271 : vector<5x16xf32>
    %cst_144 = arith.constant dense<0.000000e+00> : vector<5x5xf32>
    %273 = tpu.matmul %258, %265, %cst_144 {dimension_numbers = #tpu.dot_dimension_numbers<[1], [1], [0], [0], [0, 0, 1, 0], [], []>} : vector<5x16xf32>, vector<5x16xf32>, vector<5x5xf32> -> vector<5x5xf32>
    %cst_145 = arith.constant 2.500000e-01 : f32
    %274 = vector.broadcast %cst_145 : f32 to vector<5x5xf32>
    %275 = arith.mulf %273, %274 : vector<5x5xf32>
    %cst_146 = arith.constant dense<0xFF800000> : vector<5xf32>
    %276 = vector.multi_reduction <maximumf>, %275, %cst_146 [1] : vector<5x5xf32> to vector<5xf32>
    %277 = vector.shape_cast %276 : vector<5xf32> to vector<5x1xf32>
    %278 = vector.broadcast %277 : vector<5x1xf32> to vector<5x5xf32>
    %279 = arith.subf %275, %278 : vector<5x5xf32>
    %280 = math.exp %279 : vector<5x5xf32>
    %cst_147 = arith.constant dense<0.000000e+00> : vector<5xf32>
    %281 = vector.multi_reduction <add>, %280, %cst_147 [1] : vector<5x5xf32> to vector<5xf32>
    %282 = vector.shape_cast %281 : vector<5xf32> to vector<5x1xf32>
    %283 = tpu.reciprocal %282 {approx = true} : vector<5x1xf32> -> vector<5x1xf32>
    %284 = vector.broadcast %283 : vector<5x1xf32> to vector<5x5xf32>
    %285 = arith.mulf %280, %284 : vector<5x5xf32>
    %cst_148 = arith.constant dense<0.000000e+00> : vector<5x16xf32>
    %286 = tpu.matmul %285, %272, %cst_148 {dimension_numbers = #tpu.dot_dimension_numbers<[1], [0], [0], [1], [0, 0, 1, 1], [], []>} : vector<5x5xf32>, vector<5x16xf32>, vector<5x16xf32> -> vector<5x16xf32>
    %287 = vector.extract_strided_slice %24 {offsets = [1, 0, 0], sizes = [1, 16, 32], strides = [1, 1, 1]} : vector<2x16x32xf32> to vector<1x16x32xf32>
    %288 = vector.shape_cast %287 : vector<1x16x32xf32> to vector<16x32xf32>
    %cst_149 = arith.constant dense<0.000000e+00> : vector<5x32xf32>
    %289 = tpu.matmul %286, %288, %cst_149 {dimension_numbers = #tpu.dot_dimension_numbers<[1], [0], [0], [1], [0, 0, 1, 1], [], []>} : vector<5x16xf32>, vector<16x32xf32>, vector<5x32xf32> -> vector<5x32xf32>
    %290 = arith.addf %251, %289 : vector<5x32xf32>
    %291 = arith.addf %191, %290 : vector<5x32xf32>
    %292 = vector.broadcast %25 : vector<1x32xf32> to vector<5x32xf32>
    %293 = arith.addf %291, %292 : vector<5x32xf32>
    %cst_150 = arith.constant dense<0.000000e+00> : vector<5xf32>
    %294 = vector.multi_reduction <add>, %293, %cst_150 [1] : vector<5x32xf32> to vector<5xf32>
    %295 = vector.shape_cast %294 : vector<5xf32> to vector<5x1xf32>
    %cst_151 = arith.constant 3.200000e+01 : f32
    %296 = vector.broadcast %cst_151 : f32 to vector<5x1xf32>
    %297 = arith.divf %295, %296 : vector<5x1xf32>
    %298 = vector.broadcast %297 : vector<5x1xf32> to vector<5x32xf32>
    %299 = arith.subf %293, %298 : vector<5x32xf32>
    %300 = arith.mulf %299, %299 : vector<5x32xf32>
    %cst_152 = arith.constant dense<0.000000e+00> : vector<5xf32>
    %301 = vector.multi_reduction <add>, %300, %cst_152 [1] : vector<5x32xf32> to vector<5xf32>
    %302 = vector.shape_cast %301 : vector<5xf32> to vector<5x1xf32>
    %cst_153 = arith.constant 3.200000e+01 : f32
    %303 = vector.broadcast %cst_153 : f32 to vector<5x1xf32>
    %304 = arith.divf %302, %303 : vector<5x1xf32>
    %305 = vector.broadcast %297 : vector<5x1xf32> to vector<5x32xf32>
    %306 = arith.subf %293, %305 : vector<5x32xf32>
    %cst_154 = arith.constant 9.99999997E-7 : f32
    %307 = vector.broadcast %cst_154 : f32 to vector<5x1xf32>
    %308 = arith.addf %304, %307 : vector<5x1xf32>
    %309 = math.rsqrt %308 : vector<5x1xf32>
    %310 = vector.broadcast %309 : vector<5x1xf32> to vector<5x32xf32>
    %311 = arith.mulf %306, %310 : vector<5x32xf32>
    %312 = vector.broadcast %26 : vector<1x32xf32> to vector<5x32xf32>
    %313 = arith.mulf %311, %312 : vector<5x32xf32>
    %314 = vector.broadcast %27 : vector<1x32xf32> to vector<5x32xf32>
    %315 = arith.addf %313, %314 : vector<5x32xf32>
    %cst_155 = arith.constant dense<0.000000e+00> : vector<5x128xf32>
    %316 = tpu.matmul %315, %28, %cst_155 {dimension_numbers = #tpu.dot_dimension_numbers<[1], [0], [0], [1], [0, 0, 1, 1], [], []>} : vector<5x32xf32>, vector<32x128xf32>, vector<5x128xf32> -> vector<5x128xf32>
    %317 = vector.broadcast %29 : vector<1x128xf32> to vector<5x128xf32>
    %318 = arith.addf %316, %317 : vector<5x128xf32>
    %319 = arith.mulf %318, %318 : vector<5x128xf32>
    %320 = arith.mulf %318, %319 : vector<5x128xf32>
    %cst_156 = arith.constant 4.471500e-02 : f32
    %321 = vector.broadcast %cst_156 : f32 to vector<5x128xf32>
    %322 = arith.mulf %321, %320 : vector<5x128xf32>
    %323 = arith.addf %318, %322 : vector<5x128xf32>
    %cst_157 = arith.constant 0.797884583 : f32
    %324 = vector.broadcast %cst_157 : f32 to vector<5x128xf32>
    %325 = arith.mulf %324, %323 : vector<5x128xf32>
    %326 = math.tanh %325 : vector<5x128xf32>
    %cst_158 = arith.constant 1.000000e+00 : f32
    %327 = vector.broadcast %cst_158 : f32 to vector<5x128xf32>
    %328 = arith.addf %327, %326 : vector<5x128xf32>
    %cst_159 = arith.constant 5.000000e-01 : f32
    %329 = vector.broadcast %cst_159 : f32 to vector<5x128xf32>
    %330 = arith.mulf %329, %328 : vector<5x128xf32>
    %331 = arith.mulf %318, %330 : vector<5x128xf32>
    %cst_160 = arith.constant dense<0.000000e+00> : vector<5x32xf32>
    %332 = tpu.matmul %331, %30, %cst_160 {dimension_numbers = #tpu.dot_dimension_numbers<[1], [0], [0], [1], [0, 0, 1, 1], [], []>} : vector<5x128xf32>, vector<128x32xf32>, vector<5x32xf32> -> vector<5x32xf32>
    %333 = vector.broadcast %31 : vector<1x32xf32> to vector<5x32xf32>
    %334 = arith.addf %332, %333 : vector<5x32xf32>
    %335 = arith.addf %293, %334 : vector<5x32xf32>
    %c0_161 = arith.constant 0 : index
    %c0_162 = arith.constant 0 : index
    %c0_163 = arith.constant 0 : index
    %336 = vector.load %arg42[%c0_161, %c0_162, %c0_163] : memref<1x5x32xf32, #tpu.memory_space<vmem>>, vector<1x5x32xf32>
    %337 = vector.shape_cast %336 : vector<1x5x32xf32> to vector<5x32xf32>
    %338 = vector.shape_cast %335 : vector<5x32xf32> to vector<1x5x32xf32>
    tpu.vector_store %arg42[%c0_161, %c0_162, %c0_163], %338 {strides = array<i32>} : memref<1x5x32xf32, #tpu.memory_space<vmem>>, vector<1x5x32xf32>,
    %c0_164 = arith.constant 0 : index
    %c0_165 = arith.constant 0 : index
    %339 = vector.load %arg38[%c0_164, %c0_165] : memref<1x32xf32, #tpu.memory_space<vmem>>, vector<1x32xf32>
    %c0_166 = arith.constant 0 : index
    %c0_167 = arith.constant 0 : index
    %340 = vector.load %arg39[%c0_166, %c0_167] : memref<1x32xf32, #tpu.memory_space<vmem>>, vector<1x32xf32>
    %cst_168 = arith.constant dense<0.000000e+00> : vector<5xf32>
    %341 = vector.multi_reduction <add>, %335, %cst_168 [1] : vector<5x32xf32> to vector<5xf32>
    %342 = vector.shape_cast %341 : vector<5xf32> to vector<5x1xf32>
    %cst_169 = arith.constant 3.200000e+01 : f32
    %343 = vector.broadcast %cst_169 : f32 to vector<5x1xf32>
    %344 = arith.divf %342, %343 : vector<5x1xf32>
    %345 = vector.broadcast %344 : vector<5x1xf32> to vector<5x32xf32>
    %346 = arith.subf %335, %345 : vector<5x32xf32>
    %347 = arith.mulf %346, %346 : vector<5x32xf32>
    %cst_170 = arith.constant dense<0.000000e+00> : vector<5xf32>
    %348 = vector.multi_reduction <add>, %347, %cst_170 [1] : vector<5x32xf32> to vector<5xf32>
    %349 = vector.shape_cast %348 : vector<5xf32> to vector<5x1xf32>
    %cst_171 = arith.constant 3.200000e+01 : f32
    %350 = vector.broadcast %cst_171 : f32 to vector<5x1xf32>
    %351 = arith.divf %349, %350 : vector<5x1xf32>
    %352 = vector.broadcast %344 : vector<5x1xf32> to vector<5x32xf32>
    %353 = arith.subf %335, %352 : vector<5x32xf32>
    %cst_172 = arith.constant 9.99999974E-6 : f32
    %354 = vector.broadcast %cst_172 : f32 to vector<5x1xf32>
    %355 = arith.addf %351, %354 : vector<5x1xf32>
    %356 = math.rsqrt %355 : vector<5x1xf32>
    %357 = vector.broadcast %356 : vector<5x1xf32> to vector<5x32xf32>
    %358 = arith.mulf %353, %357 : vector<5x32xf32>
    %359 = vector.broadcast %339 : vector<1x32xf32> to vector<5x32xf32>
    %360 = arith.mulf %358, %359 : vector<5x32xf32>
    %361 = vector.broadcast %340 : vector<1x32xf32> to vector<5x32xf32>
    %362 = arith.addf %360, %361 : vector<5x32xf32>
    %c0_173 = arith.constant 0 : index
    %c0_174 = arith.constant 0 : index
    %363 = vector.load %arg40[%c0_173, %c0_174] : memref<1x32xf32, #tpu.memory_space<vmem>>, vector<1x32xf32>
    %cst_175 = arith.constant dense<0.000000e+00> : vector<1x5xf32>
    %364 = tpu.matmul %363, %362, %cst_175 {dimension_numbers = #tpu.dot_dimension_numbers<[1], [1], [0], [0], [0, 0, 1, 0], [], []>} : vector<1x32xf32>, vector<5x32xf32>, vector<1x5xf32> -> vector<1x5xf32>
    %c0_176 = arith.constant 0 : index
    %c0_177 = arith.constant 0 : index
    %365 = vector.load %arg41[%c0_176, %c0_177] : memref<1x1xf32, #tpu.memory_space<vmem>>, vector<1x1xf32>
    %366 = vector.broadcast %365 : vector<1x1xf32> to vector<1x5xf32>
    %367 = arith.addf %364, %366 : vector<1x5xf32>
    %cst_178 = arith.constant 2.500000e-01 : f32
    %368 = vector.broadcast %cst_178 : f32 to vector<1x5xf32>
    %369 = arith.mulf %367, %368 : vector<1x5xf32>
    %cst_179 = arith.constant 8.750000e-01 : f32
    %370 = vector.broadcast %cst_179 : f32 to vector<1x5xf32>
    %371 = arith.addf %369, %370 : vector<1x5xf32>
    %372 = arith.negf %371 : vector<1x5xf32>
    %373 = math.exp %372 : vector<1x5xf32>
    %cst_180 = arith.constant 1.000000e+00 : f32
    %374 = vector.broadcast %cst_180 : f32 to vector<1x5xf32>
    %375 = arith.addf %374, %373 : vector<1x5xf32>
    %376 = arith.divf %374, %375 : vector<1x5xf32>
    %c0_181 = arith.constant 0 : index
    %c0_182 = arith.constant 0 : index
    %c0_183 = arith.constant 0 : index
    %377 = vector.load %arg43[%c0_181, %c0_182, %c0_183] : memref<1x1x5xf32, #tpu.memory_space<vmem>>, vector<1x1x5xf32>
    %378 = vector.shape_cast %377 : vector<1x1x5xf32> to vector<1x5xf32>
    %379 = vector.shape_cast %376 : vector<1x5xf32> to vector<1x1x5xf32>
    tpu.vector_store %arg43[%c0_181, %c0_182, %c0_183], %379 {strides = array<i32>} : memref<1x1x5xf32, #tpu.memory_space<vmem>>, vector<1x1x5xf32>,
    return
  }
  func.func @transform_0(%arg0: i32) -> (i32, i32, i32) {
    %c0_i32 = arith.constant 0 : i32
    %c0_i32_0 = arith.constant 0 : i32
    %c0_i32_1 = arith.constant 0 : i32
    return %arg0, %c0_i32, %c0_i32_0 : i32, i32, i32
  }
  func.func @transform_1(%arg0: i32) -> (i32, i32) {
    %c0_i32 = arith.constant 0 : i32
    %c0_i32_0 = arith.constant 0 : i32
    %c0_i32_1 = arith.constant 0 : i32
    return %c0_i32, %c0_i32_0 : i32, i32
  }
  func.func @transform_2(%arg0: i32) -> (i32, i32) {
    %c0_i32 = arith.constant 0 : i32
    %c0_i32_0 = arith.constant 0 : i32
    %c0_i32_1 = arith.constant 0 : i32
    return %c0_i32, %c0_i32_0 : i32, i32
  }
  func.func @transform_3(%arg0: i32) -> (i32, i32) {
    %c0_i32 = arith.constant 0 : i32
    %c0_i32_0 = arith.constant 0 : i32
    %c0_i32_1 = arith.constant 0 : i32
    return %c0_i32, %c0_i32_0 : i32, i32
  }
  func.func @transform_4(%arg0: i32) -> (i32, i32) {
    %c0_i32 = arith.constant 0 : i32
    %c0_i32_0 = arith.constant 0 : i32
    %c0_i32_1 = arith.constant 0 : i32
    return %c0_i32, %c0_i32_0 : i32, i32
  }
  func.func @transform_5(%arg0: i32) -> (i32, i32) {
    %c0_i32 = arith.constant 0 : i32
    %c0_i32_0 = arith.constant 0 : i32
    %c0_i32_1 = arith.constant 0 : i32
    return %c0_i32, %c0_i32_0 : i32, i32
  }
  func.func @transform_6(%arg0: i32) -> (i32, i32) {
    %c0_i32 = arith.constant 0 : i32
    %c0_i32_0 = arith.constant 0 : i32
    %c0_i32_1 = arith.constant 0 : i32
    return %c0_i32, %c0_i32_0 : i32, i32
  }
  func.func @transform_7(%arg0: i32) -> (i32, i32, i32) {
    %c0_i32 = arith.constant 0 : i32
    %c0_i32_0 = arith.constant 0 : i32
    %c0_i32_1 = arith.constant 0 : i32
    %c0_i32_2 = arith.constant 0 : i32
    return %c0_i32, %c0_i32_0, %c0_i32_1 : i32, i32, i32
  }
  func.func @transform_8(%arg0: i32) -> (i32, i32, i32) {
    %c0_i32 = arith.constant 0 : i32
    %c0_i32_0 = arith.constant 0 : i32
    %c0_i32_1 = arith.constant 0 : i32
    %c0_i32_2 = arith.constant 0 : i32
    return %c0_i32, %c0_i32_0, %c0_i32_1 : i32, i32, i32
  }
  func.func @transform_9(%arg0: i32) -> (i32, i32, i32) {
    %c0_i32 = arith.constant 0 : i32
    %c0_i32_0 = arith.constant 0 : i32
    %c0_i32_1 = arith.constant 0 : i32
    %c0_i32_2 = arith.constant 0 : i32
    return %c0_i32, %c0_i32_0, %c0_i32_1 : i32, i32, i32
  }
  func.func @transform_10(%arg0: i32) -> (i32, i32, i32) {
    %c0_i32 = arith.constant 0 : i32
    %c0_i32_0 = arith.constant 0 : i32
    %c0_i32_1 = arith.constant 0 : i32
    %c0_i32_2 = arith.constant 0 : i32
    return %c0_i32, %c0_i32_0, %c0_i32_1 : i32, i32, i32
  }
  func.func @transform_11(%arg0: i32) -> (i32, i32, i32) {
    %c0_i32 = arith.constant 0 : i32
    %c0_i32_0 = arith.constant 0 : i32
    %c0_i32_1 = arith.constant 0 : i32
    %c0_i32_2 = arith.constant 0 : i32
    return %c0_i32, %c0_i32_0, %c0_i32_1 : i32, i32, i32
  }
  func.func @transform_12(%arg0: i32) -> (i32, i32, i32) {
    %c0_i32 = arith.constant 0 : i32
    %c0_i32_0 = arith.constant 0 : i32
    %c0_i32_1 = arith.constant 0 : i32
    %c0_i32_2 = arith.constant 0 : i32
    return %c0_i32, %c0_i32_0, %c0_i32_1 : i32, i32, i32
  }
  func.func @transform_13(%arg0: i32) -> (i32, i32, i32) {
    %c0_i32 = arith.constant 0 : i32
    %c0_i32_0 = arith.constant 0 : i32
    %c0_i32_1 = arith.constant 0 : i32
    %c0_i32_2 = arith.constant 0 : i32
    return %c0_i32, %c0_i32_0, %c0_i32_1 : i32, i32, i32
  }
  func.func @transform_14(%arg0: i32) -> (i32, i32) {
    %c0_i32 = arith.constant 0 : i32
    %c0_i32_0 = arith.constant 0 : i32
    %c0_i32_1 = arith.constant 0 : i32
    return %c0_i32, %c0_i32_0 : i32, i32
  }
  func.func @transform_15(%arg0: i32) -> (i32, i32) {
    %c0_i32 = arith.constant 0 : i32
    %c0_i32_0 = arith.constant 0 : i32
    %c0_i32_1 = arith.constant 0 : i32
    return %c0_i32, %c0_i32_0 : i32, i32
  }
  func.func @transform_16(%arg0: i32) -> (i32, i32) {
    %c0_i32 = arith.constant 0 : i32
    %c0_i32_0 = arith.constant 0 : i32
    %c0_i32_1 = arith.constant 0 : i32
    return %c0_i32, %c0_i32_0 : i32, i32
  }
  func.func @transform_17(%arg0: i32) -> (i32, i32) {
    %c0_i32 = arith.constant 0 : i32
    %c0_i32_0 = arith.constant 0 : i32
    %c0_i32_1 = arith.constant 0 : i32
    return %c0_i32, %c0_i32_0 : i32, i32
  }
  func.func @transform_18(%arg0: i32) -> (i32, i32) {
    %c0_i32 = arith.constant 0 : i32
    %c0_i32_0 = arith.constant 0 : i32
    %c0_i32_1 = arith.constant 0 : i32
    return %c0_i32, %c0_i32_0 : i32, i32
  }
  func.func @transform_19(%arg0: i32) -> (i32, i32) {
    %c0_i32 = arith.constant 0 : i32
    %c0_i32_0 = arith.constant 0 : i32
    %c0_i32_1 = arith.constant 0 : i32
    return %c0_i32, %c0_i32_0 : i32, i32
  }
  func.func @transform_20(%arg0: i32) -> (i32, i32) {
    %c0_i32 = arith.constant 0 : i32
    %c0_i32_0 = arith.constant 0 : i32
    %c0_i32_1 = arith.constant 0 : i32
    return %c0_i32, %c0_i32_0 : i32, i32
  }
  func.func @transform_21(%arg0: i32) -> (i32, i32) {
    %c0_i32 = arith.constant 0 : i32
    %c0_i32_0 = arith.constant 0 : i32
    %c0_i32_1 = arith.constant 0 : i32
    return %c0_i32, %c0_i32_0 : i32, i32
  }
  func.func @transform_22(%arg0: i32) -> (i32, i32) {
    %c0_i32 = arith.constant 0 : i32
    %c0_i32_0 = arith.constant 0 : i32
    %c0_i32_1 = arith.constant 0 : i32
    return %c0_i32, %c0_i32_0 : i32, i32
  }
  func.func @transform_23(%arg0: i32) -> (i32, i32, i32) {
    %c0_i32 = arith.constant 0 : i32
    %c0_i32_0 = arith.constant 0 : i32
    %c0_i32_1 = arith.constant 0 : i32
    %c0_i32_2 = arith.constant 0 : i32
    return %c0_i32, %c0_i32_0, %c0_i32_1 : i32, i32, i32
  }
  func.func @transform_24(%arg0: i32) -> (i32, i32, i32) {
    %c0_i32 = arith.constant 0 : i32
    %c0_i32_0 = arith.constant 0 : i32
    %c0_i32_1 = arith.constant 0 : i32
    %c0_i32_2 = arith.constant 0 : i32
    return %c0_i32, %c0_i32_0, %c0_i32_1 : i32, i32, i32
  }
  func.func @transform_25(%arg0: i32) -> (i32, i32, i32) {
    %c0_i32 = arith.constant 0 : i32
    %c0_i32_0 = arith.constant 0 : i32
    %c0_i32_1 = arith.constant 0 : i32
    %c0_i32_2 = arith.constant 0 : i32
    return %c0_i32, %c0_i32_0, %c0_i32_1 : i32, i32, i32
  }
  func.func @transform_26(%arg0: i32) -> (i32, i32, i32) {
    %c0_i32 = arith.constant 0 : i32
    %c0_i32_0 = arith.constant 0 : i32
    %c0_i32_1 = arith.constant 0 : i32
    %c0_i32_2 = arith.constant 0 : i32
    return %c0_i32, %c0_i32_0, %c0_i32_1 : i32, i32, i32
  }
  func.func @transform_27(%arg0: i32) -> (i32, i32, i32) {
    %c0_i32 = arith.constant 0 : i32
    %c0_i32_0 = arith.constant 0 : i32
    %c0_i32_1 = arith.constant 0 : i32
    %c0_i32_2 = arith.constant 0 : i32
    return %c0_i32, %c0_i32_0, %c0_i32_1 : i32, i32, i32
  }
  func.func @transform_28(%arg0: i32) -> (i32, i32, i32) {
    %c0_i32 = arith.constant 0 : i32
    %c0_i32_0 = arith.constant 0 : i32
    %c0_i32_1 = arith.constant 0 : i32
    %c0_i32_2 = arith.constant 0 : i32
    return %c0_i32, %c0_i32_0, %c0_i32_1 : i32, i32, i32
  }
  func.func @transform_29(%arg0: i32) -> (i32, i32, i32) {
    %c0_i32 = arith.constant 0 : i32
    %c0_i32_0 = arith.constant 0 : i32
    %c0_i32_1 = arith.constant 0 : i32
    %c0_i32_2 = arith.constant 0 : i32
    return %c0_i32, %c0_i32_0, %c0_i32_1 : i32, i32, i32
  }
  func.func @transform_30(%arg0: i32) -> (i32, i32) {
    %c0_i32 = arith.constant 0 : i32
    %c0_i32_0 = arith.constant 0 : i32
    %c0_i32_1 = arith.constant 0 : i32
    return %c0_i32, %c0_i32_0 : i32, i32
  }
  func.func @transform_31(%arg0: i32) -> (i32, i32) {
    %c0_i32 = arith.constant 0 : i32
    %c0_i32_0 = arith.constant 0 : i32
    %c0_i32_1 = arith.constant 0 : i32
    return %c0_i32, %c0_i32_0 : i32, i32
  }
  func.func @transform_32(%arg0: i32) -> (i32, i32) {
    %c0_i32 = arith.constant 0 : i32
    %c0_i32_0 = arith.constant 0 : i32
    %c0_i32_1 = arith.constant 0 : i32
    return %c0_i32, %c0_i32_0 : i32, i32
  }
  func.func @transform_33(%arg0: i32) -> (i32, i32) {
    %c0_i32 = arith.constant 0 : i32
    %c0_i32_0 = arith.constant 0 : i32
    %c0_i32_1 = arith.constant 0 : i32
    return %c0_i32, %c0_i32_0 : i32, i32
  }
  func.func @transform_34(%arg0: i32) -> (i32, i32) {
    %c0_i32 = arith.constant 0 : i32
    %c0_i32_0 = arith.constant 0 : i32
    %c0_i32_1 = arith.constant 0 : i32
    return %c0_i32, %c0_i32_0 : i32, i32
  }
  func.func @transform_35(%arg0: i32) -> (i32, i32) {
    %c0_i32 = arith.constant 0 : i32
    %c0_i32_0 = arith.constant 0 : i32
    %c0_i32_1 = arith.constant 0 : i32
    return %c0_i32, %c0_i32_0 : i32, i32
  }
  func.func @transform_36(%arg0: i32) -> (i32, i32) {
    %c0_i32 = arith.constant 0 : i32
    %c0_i32_0 = arith.constant 0 : i32
    %c0_i32_1 = arith.constant 0 : i32
    return %c0_i32, %c0_i32_0 : i32, i32
  }
  func.func @transform_37(%arg0: i32) -> (i32, i32) {
    %c0_i32 = arith.constant 0 : i32
    %c0_i32_0 = arith.constant 0 : i32
    %c0_i32_1 = arith.constant 0 : i32
    return %c0_i32, %c0_i32_0 : i32, i32
  }
  func.func @transform_38(%arg0: i32) -> (i32, i32) {
    %c0_i32 = arith.constant 0 : i32
    %c0_i32_0 = arith.constant 0 : i32
    %c0_i32_1 = arith.constant 0 : i32
    return %c0_i32, %c0_i32_0 : i32, i32
  }
  func.func @transform_39(%arg0: i32) -> (i32, i32) {
    %c0_i32 = arith.constant 0 : i32
    %c0_i32_0 = arith.constant 0 : i32
    %c0_i32_1 = arith.constant 0 : i32
    return %c0_i32, %c0_i32_0 : i32, i32
  }
  func.func @transform_40(%arg0: i32) -> (i32, i32) {
    %c0_i32 = arith.constant 0 : i32
    %c0_i32_0 = arith.constant 0 : i32
    %c0_i32_1 = arith.constant 0 : i32
    return %c0_i32, %c0_i32_0 : i32, i32
  }
  func.func @transform_41(%arg0: i32) -> (i32, i32, i32) {
    %c0_i32 = arith.constant 0 : i32
    %c0_i32_0 = arith.constant 0 : i32
    %c0_i32_1 = arith.constant 0 : i32
    return %arg0, %c0_i32, %c0_i32_0 : i32, i32, i32
  }
  func.func @transform_42(%arg0: i32) -> (i32, i32, i32) {
    %c0_i32 = arith.constant 0 : i32
    %c0_i32_0 = arith.constant 0 : i32
    %c0_i32_1 = arith.constant 0 : i32
    return %arg0, %c0_i32, %c0_i32_0 : i32, i32, i32
  }
}

module attributes {stable_mosaic.version = 11 : i64} {
  func.func @_tail_kernel(%arg0: i32, %arg1: memref<1x5x32xf32, #tpu.memory_space<vmem>>, %arg2: memref<1x32xf32, #tpu.memory_space<vmem>>, %arg3: memref<1x32xf32, #tpu.memory_space<vmem>>, %arg4: memref<2x32x16xf32, #tpu.memory_space<vmem>>, %arg5: memref<2x32x16xf32, #tpu.memory_space<vmem>>, %arg6: memref<2x32x16xf32, #tpu.memory_space<vmem>>, %arg7: memref<2x1x16xf32, #tpu.memory_space<vmem>>, %arg8: memref<2x1x16xf32, #tpu.memory_space<vmem>>, %arg9: memref<2x1x16xf32, #tpu.memory_space<vmem>>, %arg10: memref<2x16x32xf32, #tpu.memory_space<vmem>>, %arg11: memref<1x32xf32, #tpu.memory_space<vmem>>, %arg12: memref<1x32xf32, #tpu.memory_space<vmem>>, %arg13: memref<1x32xf32, #tpu.memory_space<vmem>>, %arg14: memref<32x128xf32, #tpu.memory_space<vmem>>, %arg15: memref<1x128xf32, #tpu.memory_space<vmem>>, %arg16: memref<128x32xf32, #tpu.memory_space<vmem>>, %arg17: memref<1x32xf32, #tpu.memory_space<vmem>>, %arg18: memref<1x32xf32, #tpu.memory_space<vmem>>, %arg19: memref<1x32xf32, #tpu.memory_space<vmem>>, %arg20: memref<2x32x16xf32, #tpu.memory_space<vmem>>, %arg21: memref<2x32x16xf32, #tpu.memory_space<vmem>>, %arg22: memref<2x32x16xf32, #tpu.memory_space<vmem>>, %arg23: memref<2x1x16xf32, #tpu.memory_space<vmem>>, %arg24: memref<2x1x16xf32, #tpu.memory_space<vmem>>, %arg25: memref<2x1x16xf32, #tpu.memory_space<vmem>>, %arg26: memref<2x16x32xf32, #tpu.memory_space<vmem>>, %arg27: memref<1x32xf32, #tpu.memory_space<vmem>>, %arg28: memref<1x32xf32, #tpu.memory_space<vmem>>, %arg29: memref<1x32xf32, #tpu.memory_space<vmem>>, %arg30: memref<32x128xf32, #tpu.memory_space<vmem>>, %arg31: memref<1x128xf32, #tpu.memory_space<vmem>>, %arg32: memref<128x32xf32, #tpu.memory_space<vmem>>, %arg33: memref<1x32xf32, #tpu.memory_space<vmem>>, %arg34: memref<1x32xf32, #tpu.memory_space<vmem>>, %arg35: memref<1x32xf32, #tpu.memory_space<vmem>>, %arg36: memref<32x10xf32, #tpu.memory_space<vmem>>, %arg37: memref<1x10xf32, #tpu.memory_space<vmem>>, %arg38: memref<1x1x10xf32, #tpu.memory_space<vmem>>) attributes {dimension_semantics = [#tpu.dimension_semantics<parallel>], iteration_bounds = array<i64: 2>, scalar_prefetch = 0 : i64, scratch_operands = 0 : i64, tpu.core_type = #tpu.core_type<tc>, window_params = [{transform_indices = @transform_0, window_bounds = array<i64: 1, 5, 32>}, {pipeline_mode = #tpu.pipeline_mode<synchronous>, transform_indices = @transform_1, window_bounds = array<i64: 1, 32>}, {pipeline_mode = #tpu.pipeline_mode<synchronous>, transform_indices = @transform_2, window_bounds = array<i64: 1, 32>}, {pipeline_mode = #tpu.pipeline_mode<synchronous>, transform_indices = @transform_3, window_bounds = array<i64: 2, 32, 16>}, {pipeline_mode = #tpu.pipeline_mode<synchronous>, transform_indices = @transform_4, window_bounds = array<i64: 2, 32, 16>}, {pipeline_mode = #tpu.pipeline_mode<synchronous>, transform_indices = @transform_5, window_bounds = array<i64: 2, 32, 16>}, {pipeline_mode = #tpu.pipeline_mode<synchronous>, transform_indices = @transform_6, window_bounds = array<i64: 2, 1, 16>}, {pipeline_mode = #tpu.pipeline_mode<synchronous>, transform_indices = @transform_7, window_bounds = array<i64: 2, 1, 16>}, {pipeline_mode = #tpu.pipeline_mode<synchronous>, transform_indices = @transform_8, window_bounds = array<i64: 2, 1, 16>}, {pipeline_mode = #tpu.pipeline_mode<synchronous>, transform_indices = @transform_9, window_bounds = array<i64: 2, 16, 32>}, {pipeline_mode = #tpu.pipeline_mode<synchronous>, transform_indices = @transform_10, window_bounds = array<i64: 1, 32>}, {pipeline_mode = #tpu.pipeline_mode<synchronous>, transform_indices = @transform_11, window_bounds = array<i64: 1, 32>}, {pipeline_mode = #tpu.pipeline_mode<synchronous>, transform_indices = @transform_12, window_bounds = array<i64: 1, 32>}, {pipeline_mode = #tpu.pipeline_mode<synchronous>, transform_indices = @transform_13, window_bounds = array<i64: 32, 128>}, {pipeline_mode = #tpu.pipeline_mode<synchronous>, transform_indices = @transform_14, window_bounds = array<i64: 1, 128>}, {pipeline_mode = #tpu.pipeline_mode<synchronous>, transform_indices = @transform_15, window_bounds = array<i64: 128, 32>}, {pipeline_mode = #tpu.pipeline_mode<synchronous>, transform_indices = @transform_16, window_bounds = array<i64: 1, 32>}, {pipeline_mode = #tpu.pipeline_mode<synchronous>, transform_indices = @transform_17, window_bounds = array<i64: 1, 32>}, {pipeline_mode = #tpu.pipeline_mode<synchronous>, transform_indices = @transform_18, window_bounds = array<i64: 1, 32>}, {pipeline_mode = #tpu.pipeline_mode<synchronous>, transform_indices = @transform_19, window_bounds = array<i64: 2, 32, 16>}, {pipeline_mode = #tpu.pipeline_mode<synchronous>, transform_indices = @transform_20, window_bounds = array<i64: 2, 32, 16>}, {pipeline_mode = #tpu.pipeline_mode<synchronous>, transform_indices = @transform_21, window_bounds = array<i64: 2, 32, 16>}, {pipeline_mode = #tpu.pipeline_mode<synchronous>, transform_indices = @transform_22, window_bounds = array<i64: 2, 1, 16>}, {pipeline_mode = #tpu.pipeline_mode<synchronous>, transform_indices = @transform_23, window_bounds = array<i64: 2, 1, 16>}, {pipeline_mode = #tpu.pipeline_mode<synchronous>, transform_indices = @transform_24, window_bounds = array<i64: 2, 1, 16>}, {pipeline_mode = #tpu.pipeline_mode<synchronous>, transform_indices = @transform_25, window_bounds = array<i64: 2, 16, 32>}, {pipeline_mode = #tpu.pipeline_mode<synchronous>, transform_indices = @transform_26, window_bounds = array<i64: 1, 32>}, {pipeline_mode = #tpu.pipeline_mode<synchronous>, transform_indices = @transform_27, window_bounds = array<i64: 1, 32>}, {pipeline_mode = #tpu.pipeline_mode<synchronous>, transform_indices = @transform_28, window_bounds = array<i64: 1, 32>}, {pipeline_mode = #tpu.pipeline_mode<synchronous>, transform_indices = @transform_29, window_bounds = array<i64: 32, 128>}, {pipeline_mode = #tpu.pipeline_mode<synchronous>, transform_indices = @transform_30, window_bounds = array<i64: 1, 128>}, {pipeline_mode = #tpu.pipeline_mode<synchronous>, transform_indices = @transform_31, window_bounds = array<i64: 128, 32>}, {pipeline_mode = #tpu.pipeline_mode<synchronous>, transform_indices = @transform_32, window_bounds = array<i64: 1, 32>}, {pipeline_mode = #tpu.pipeline_mode<synchronous>, transform_indices = @transform_33, window_bounds = array<i64: 1, 32>}, {pipeline_mode = #tpu.pipeline_mode<synchronous>, transform_indices = @transform_34, window_bounds = array<i64: 1, 32>}, {pipeline_mode = #tpu.pipeline_mode<synchronous>, transform_indices = @transform_35, window_bounds = array<i64: 32, 10>}, {pipeline_mode = #tpu.pipeline_mode<synchronous>, transform_indices = @transform_36, window_bounds = array<i64: 1, 10>}, {transform_indices = @transform_37, window_bounds = array<i64: 1, 1, 10>}]} {
    %c0 = arith.constant 0 : index
    %c0_0 = arith.constant 0 : index
    %0 = vector.load %arg2[%c0, %c0_0] : memref<1x32xf32, #tpu.memory_space<vmem>>, vector<1x32xf32>
    %c0_1 = arith.constant 0 : index
    %c0_2 = arith.constant 0 : index
    %1 = vector.load %arg3[%c0_1, %c0_2] : memref<1x32xf32, #tpu.memory_space<vmem>>, vector<1x32xf32>
    %c0_3 = arith.constant 0 : index
    %c0_4 = arith.constant 0 : index
    %c0_5 = arith.constant 0 : index
    %2 = vector.load %arg4[%c0_3, %c0_4, %c0_5] : memref<2x32x16xf32, #tpu.memory_space<vmem>>, vector<2x32x16xf32>
    %c0_6 = arith.constant 0 : index
    %c0_7 = arith.constant 0 : index
    %c0_8 = arith.constant 0 : index
    %3 = vector.load %arg5[%c0_6, %c0_7, %c0_8] : memref<2x32x16xf32, #tpu.memory_space<vmem>>, vector<2x32x16xf32>
    %c0_9 = arith.constant 0 : index
    %c0_10 = arith.constant 0 : index
    %c0_11 = arith.constant 0 : index
    %4 = vector.load %arg6[%c0_9, %c0_10, %c0_11] : memref<2x32x16xf32, #tpu.memory_space<vmem>>, vector<2x32x16xf32>
    %c0_12 = arith.constant 0 : index
    %c0_13 = arith.constant 0 : index
    %c0_14 = arith.constant 0 : index
    %5 = vector.load %arg7[%c0_12, %c0_13, %c0_14] : memref<2x1x16xf32, #tpu.memory_space<vmem>>, vector<2x1x16xf32>
    %c0_15 = arith.constant 0 : index
    %c0_16 = arith.constant 0 : index
    %c0_17 = arith.constant 0 : index
    %6 = vector.load %arg8[%c0_15, %c0_16, %c0_17] : memref<2x1x16xf32, #tpu.memory_space<vmem>>, vector<2x1x16xf32>
    %c0_18 = arith.constant 0 : index
    %c0_19 = arith.constant 0 : index
    %c0_20 = arith.constant 0 : index
    %7 = vector.load %arg9[%c0_18, %c0_19, %c0_20] : memref<2x1x16xf32, #tpu.memory_space<vmem>>, vector<2x1x16xf32>
    %c0_21 = arith.constant 0 : index
    %c0_22 = arith.constant 0 : index
    %c0_23 = arith.constant 0 : index
    %8 = vector.load %arg10[%c0_21, %c0_22, %c0_23] : memref<2x16x32xf32, #tpu.memory_space<vmem>>, vector<2x16x32xf32>
    %c0_24 = arith.constant 0 : index
    %c0_25 = arith.constant 0 : index
    %9 = vector.load %arg11[%c0_24, %c0_25] : memref<1x32xf32, #tpu.memory_space<vmem>>, vector<1x32xf32>
    %c0_26 = arith.constant 0 : index
    %c0_27 = arith.constant 0 : index
    %10 = vector.load %arg12[%c0_26, %c0_27] : memref<1x32xf32, #tpu.memory_space<vmem>>, vector<1x32xf32>
    %c0_28 = arith.constant 0 : index
    %c0_29 = arith.constant 0 : index
    %11 = vector.load %arg13[%c0_28, %c0_29] : memref<1x32xf32, #tpu.memory_space<vmem>>, vector<1x32xf32>
    %c0_30 = arith.constant 0 : index
    %c0_31 = arith.constant 0 : index
    %12 = vector.load %arg14[%c0_30, %c0_31] : memref<32x128xf32, #tpu.memory_space<vmem>>, vector<32x128xf32>
    %c0_32 = arith.constant 0 : index
    %c0_33 = arith.constant 0 : index
    %13 = vector.load %arg15[%c0_32, %c0_33] : memref<1x128xf32, #tpu.memory_space<vmem>>, vector<1x128xf32>
    %c0_34 = arith.constant 0 : index
    %c0_35 = arith.constant 0 : index
    %14 = vector.load %arg16[%c0_34, %c0_35] : memref<128x32xf32, #tpu.memory_space<vmem>>, vector<128x32xf32>
    %c0_36 = arith.constant 0 : index
    %c0_37 = arith.constant 0 : index
    %15 = vector.load %arg17[%c0_36, %c0_37] : memref<1x32xf32, #tpu.memory_space<vmem>>, vector<1x32xf32>
    %c0_38 = arith.constant 0 : index
    %c0_39 = arith.constant 0 : index
    %16 = vector.load %arg18[%c0_38, %c0_39] : memref<1x32xf32, #tpu.memory_space<vmem>>, vector<1x32xf32>
    %c0_40 = arith.constant 0 : index
    %c0_41 = arith.constant 0 : index
    %17 = vector.load %arg19[%c0_40, %c0_41] : memref<1x32xf32, #tpu.memory_space<vmem>>, vector<1x32xf32>
    %c0_42 = arith.constant 0 : index
    %c0_43 = arith.constant 0 : index
    %c0_44 = arith.constant 0 : index
    %18 = vector.load %arg20[%c0_42, %c0_43, %c0_44] : memref<2x32x16xf32, #tpu.memory_space<vmem>>, vector<2x32x16xf32>
    %c0_45 = arith.constant 0 : index
    %c0_46 = arith.constant 0 : index
    %c0_47 = arith.constant 0 : index
    %19 = vector.load %arg21[%c0_45, %c0_46, %c0_47] : memref<2x32x16xf32, #tpu.memory_space<vmem>>, vector<2x32x16xf32>
    %c0_48 = arith.constant 0 : index
    %c0_49 = arith.constant 0 : index
    %c0_50 = arith.constant 0 : index
    %20 = vector.load %arg22[%c0_48, %c0_49, %c0_50] : memref<2x32x16xf32, #tpu.memory_space<vmem>>, vector<2x32x16xf32>
    %c0_51 = arith.constant 0 : index
    %c0_52 = arith.constant 0 : index
    %c0_53 = arith.constant 0 : index
    %21 = vector.load %arg23[%c0_51, %c0_52, %c0_53] : memref<2x1x16xf32, #tpu.memory_space<vmem>>, vector<2x1x16xf32>
    %c0_54 = arith.constant 0 : index
    %c0_55 = arith.constant 0 : index
    %c0_56 = arith.constant 0 : index
    %22 = vector.load %arg24[%c0_54, %c0_55, %c0_56] : memref<2x1x16xf32, #tpu.memory_space<vmem>>, vector<2x1x16xf32>
    %c0_57 = arith.constant 0 : index
    %c0_58 = arith.constant 0 : index
    %c0_59 = arith.constant 0 : index
    %23 = vector.load %arg25[%c0_57, %c0_58, %c0_59] : memref<2x1x16xf32, #tpu.memory_space<vmem>>, vector<2x1x16xf32>
    %c0_60 = arith.constant 0 : index
    %c0_61 = arith.constant 0 : index
    %c0_62 = arith.constant 0 : index
    %24 = vector.load %arg26[%c0_60, %c0_61, %c0_62] : memref<2x16x32xf32, #tpu.memory_space<vmem>>, vector<2x16x32xf32>
    %c0_63 = arith.constant 0 : index
    %c0_64 = arith.constant 0 : index
    %25 = vector.load %arg27[%c0_63, %c0_64] : memref<1x32xf32, #tpu.memory_space<vmem>>, vector<1x32xf32>
    %c0_65 = arith.constant 0 : index
    %c0_66 = arith.constant 0 : index
    %26 = vector.load %arg28[%c0_65, %c0_66] : memref<1x32xf32, #tpu.memory_space<vmem>>, vector<1x32xf32>
    %c0_67 = arith.constant 0 : index
    %c0_68 = arith.constant 0 : index
    %27 = vector.load %arg29[%c0_67, %c0_68] : memref<1x32xf32, #tpu.memory_space<vmem>>, vector<1x32xf32>
    %c0_69 = arith.constant 0 : index
    %c0_70 = arith.constant 0 : index
    %28 = vector.load %arg30[%c0_69, %c0_70] : memref<32x128xf32, #tpu.memory_space<vmem>>, vector<32x128xf32>
    %c0_71 = arith.constant 0 : index
    %c0_72 = arith.constant 0 : index
    %29 = vector.load %arg31[%c0_71, %c0_72] : memref<1x128xf32, #tpu.memory_space<vmem>>, vector<1x128xf32>
    %c0_73 = arith.constant 0 : index
    %c0_74 = arith.constant 0 : index
    %30 = vector.load %arg32[%c0_73, %c0_74] : memref<128x32xf32, #tpu.memory_space<vmem>>, vector<128x32xf32>
    %c0_75 = arith.constant 0 : index
    %c0_76 = arith.constant 0 : index
    %31 = vector.load %arg33[%c0_75, %c0_76] : memref<1x32xf32, #tpu.memory_space<vmem>>, vector<1x32xf32>
    %c0_77 = arith.constant 0 : index
    %c0_78 = arith.constant 0 : index
    %c0_79 = arith.constant 0 : index
    %32 = vector.load %arg1[%c0_77, %c0_78, %c0_79] : memref<1x5x32xf32, #tpu.memory_space<vmem>>, vector<1x5x32xf32>
    %33 = vector.shape_cast %32 : vector<1x5x32xf32> to vector<5x32xf32>
    %34 = vector.extract_strided_slice %33 {offsets = [0, 0], sizes = [4, 32], strides = [1, 1]} : vector<5x32xf32> to vector<4x32xf32>
    %cst = arith.constant dense<0.000000e+00> : vector<4xf32>
    %35 = vector.multi_reduction <add>, %34, %cst [1] : vector<4x32xf32> to vector<4xf32>
    %36 = vector.shape_cast %35 : vector<4xf32> to vector<4x1xf32>
    %cst_80 = arith.constant 3.200000e+01 : f32
    %37 = vector.broadcast %cst_80 : f32 to vector<4x1xf32>
    %38 = arith.divf %36, %37 : vector<4x1xf32>
    %39 = vector.broadcast %38 : vector<4x1xf32> to vector<4x32xf32>
    %40 = arith.subf %34, %39 : vector<4x32xf32>
    %41 = arith.mulf %40, %40 : vector<4x32xf32>
    %cst_81 = arith.constant dense<0.000000e+00> : vector<4xf32>
    %42 = vector.multi_reduction <add>, %41, %cst_81 [1] : vector<4x32xf32> to vector<4xf32>
    %43 = vector.shape_cast %42 : vector<4xf32> to vector<4x1xf32>
    %cst_82 = arith.constant 3.200000e+01 : f32
    %44 = vector.broadcast %cst_82 : f32 to vector<4x1xf32>
    %45 = arith.divf %43, %44 : vector<4x1xf32>
    %46 = vector.broadcast %38 : vector<4x1xf32> to vector<4x32xf32>
    %47 = arith.subf %34, %46 : vector<4x32xf32>
    %cst_83 = arith.constant 9.99999997E-7 : f32
    %48 = vector.broadcast %cst_83 : f32 to vector<4x1xf32>
    %49 = arith.addf %45, %48 : vector<4x1xf32>
    %50 = math.rsqrt %49 : vector<4x1xf32>
    %51 = vector.broadcast %50 : vector<4x1xf32> to vector<4x32xf32>
    %52 = arith.mulf %47, %51 : vector<4x32xf32>
    %53 = vector.broadcast %0 : vector<1x32xf32> to vector<4x32xf32>
    %54 = arith.mulf %52, %53 : vector<4x32xf32>
    %55 = vector.broadcast %1 : vector<1x32xf32> to vector<4x32xf32>
    %56 = arith.addf %54, %55 : vector<4x32xf32>
    %57 = vector.extract_strided_slice %2 {offsets = [0, 0, 0], sizes = [1, 32, 16], strides = [1, 1, 1]} : vector<2x32x16xf32> to vector<1x32x16xf32>
    %58 = vector.shape_cast %57 : vector<1x32x16xf32> to vector<32x16xf32>
    %cst_84 = arith.constant dense<0.000000e+00> : vector<4x16xf32>
    %59 = tpu.matmul %56, %58, %cst_84 {dimension_numbers = #tpu.dot_dimension_numbers<[1], [0], [0], [1], [0, 0, 1, 1], [], []>} : vector<4x32xf32>, vector<32x16xf32>, vector<4x16xf32> -> vector<4x16xf32>
    %60 = vector.extract_strided_slice %5 {offsets = [0, 0, 0], sizes = [1, 1, 16], strides = [1, 1, 1]} : vector<2x1x16xf32> to vector<1x1x16xf32>
    %61 = vector.shape_cast %60 : vector<1x1x16xf32> to vector<1x16xf32>
    %62 = vector.broadcast %61 : vector<1x16xf32> to vector<4x16xf32>
    %63 = arith.addf %59, %62 : vector<4x16xf32>
    %64 = vector.extract_strided_slice %3 {offsets = [0, 0, 0], sizes = [1, 32, 16], strides = [1, 1, 1]} : vector<2x32x16xf32> to vector<1x32x16xf32>
    %65 = vector.shape_cast %64 : vector<1x32x16xf32> to vector<32x16xf32>
    %cst_85 = arith.constant dense<0.000000e+00> : vector<4x16xf32>
    %66 = tpu.matmul %56, %65, %cst_85 {dimension_numbers = #tpu.dot_dimension_numbers<[1], [0], [0], [1], [0, 0, 1, 1], [], []>} : vector<4x32xf32>, vector<32x16xf32>, vector<4x16xf32> -> vector<4x16xf32>
    %67 = vector.extract_strided_slice %6 {offsets = [0, 0, 0], sizes = [1, 1, 16], strides = [1, 1, 1]} : vector<2x1x16xf32> to vector<1x1x16xf32>
    %68 = vector.shape_cast %67 : vector<1x1x16xf32> to vector<1x16xf32>
    %69 = vector.broadcast %68 : vector<1x16xf32> to vector<4x16xf32>
    %70 = arith.addf %66, %69 : vector<4x16xf32>
    %71 = vector.extract_strided_slice %4 {offsets = [0, 0, 0], sizes = [1, 32, 16], strides = [1, 1, 1]} : vector<2x32x16xf32> to vector<1x32x16xf32>
    %72 = vector.shape_cast %71 : vector<1x32x16xf32> to vector<32x16xf32>
    %cst_86 = arith.constant dense<0.000000e+00> : vector<4x16xf32>
    %73 = tpu.matmul %56, %72, %cst_86 {dimension_numbers = #tpu.dot_dimension_numbers<[1], [0], [0], [1], [0, 0, 1, 1], [], []>} : vector<4x32xf32>, vector<32x16xf32>, vector<4x16xf32> -> vector<4x16xf32>
    %74 = vector.extract_strided_slice %7 {offsets = [0, 0, 0], sizes = [1, 1, 16], strides = [1, 1, 1]} : vector<2x1x16xf32> to vector<1x1x16xf32>
    %75 = vector.shape_cast %74 : vector<1x1x16xf32> to vector<1x16xf32>
    %76 = vector.broadcast %75 : vector<1x16xf32> to vector<4x16xf32>
    %77 = arith.addf %73, %76 : vector<4x16xf32>
    %cst_87 = arith.constant dense<0.000000e+00> : vector<4x4xf32>
    %78 = tpu.matmul %63, %70, %cst_87 {dimension_numbers = #tpu.dot_dimension_numbers<[1], [1], [0], [0], [0, 0, 1, 0], [], []>} : vector<4x16xf32>, vector<4x16xf32>, vector<4x4xf32> -> vector<4x4xf32>
    %cst_88 = arith.constant 2.500000e-01 : f32
    %79 = vector.broadcast %cst_88 : f32 to vector<4x4xf32>
    %80 = arith.mulf %78, %79 : vector<4x4xf32>
    %cst_89 = arith.constant dense<0xFF800000> : vector<4xf32>
    %81 = vector.multi_reduction <maximumf>, %80, %cst_89 [1] : vector<4x4xf32> to vector<4xf32>
    %82 = vector.shape_cast %81 : vector<4xf32> to vector<4x1xf32>
    %83 = vector.broadcast %82 : vector<4x1xf32> to vector<4x4xf32>
    %84 = arith.subf %80, %83 : vector<4x4xf32>
    %85 = math.exp %84 : vector<4x4xf32>
    %cst_90 = arith.constant dense<0.000000e+00> : vector<4xf32>
    %86 = vector.multi_reduction <add>, %85, %cst_90 [1] : vector<4x4xf32> to vector<4xf32>
    %87 = vector.shape_cast %86 : vector<4xf32> to vector<4x1xf32>
    %88 = tpu.reciprocal %87 {approx = true} : vector<4x1xf32> -> vector<4x1xf32>
    %89 = vector.broadcast %88 : vector<4x1xf32> to vector<4x4xf32>
    %90 = arith.mulf %85, %89 : vector<4x4xf32>
    %cst_91 = arith.constant dense<0.000000e+00> : vector<4x16xf32>
    %91 = tpu.matmul %90, %77, %cst_91 {dimension_numbers = #tpu.dot_dimension_numbers<[1], [0], [0], [1], [0, 0, 1, 1], [], []>} : vector<4x4xf32>, vector<4x16xf32>, vector<4x16xf32> -> vector<4x16xf32>
    %92 = vector.extract_strided_slice %8 {offsets = [0, 0, 0], sizes = [1, 16, 32], strides = [1, 1, 1]} : vector<2x16x32xf32> to vector<1x16x32xf32>
    %93 = vector.shape_cast %92 : vector<1x16x32xf32> to vector<16x32xf32>
    %cst_92 = arith.constant dense<0.000000e+00> : vector<4x32xf32>
    %94 = tpu.matmul %91, %93, %cst_92 {dimension_numbers = #tpu.dot_dimension_numbers<[1], [0], [0], [1], [0, 0, 1, 1], [], []>} : vector<4x16xf32>, vector<16x32xf32>, vector<4x32xf32> -> vector<4x32xf32>
    %95 = vector.extract_strided_slice %2 {offsets = [1, 0, 0], sizes = [1, 32, 16], strides = [1, 1, 1]} : vector<2x32x16xf32> to vector<1x32x16xf32>
    %96 = vector.shape_cast %95 : vector<1x32x16xf32> to vector<32x16xf32>
    %cst_93 = arith.constant dense<0.000000e+00> : vector<4x16xf32>
    %97 = tpu.matmul %56, %96, %cst_93 {dimension_numbers = #tpu.dot_dimension_numbers<[1], [0], [0], [1], [0, 0, 1, 1], [], []>} : vector<4x32xf32>, vector<32x16xf32>, vector<4x16xf32> -> vector<4x16xf32>
    %98 = vector.extract_strided_slice %5 {offsets = [1, 0, 0], sizes = [1, 1, 16], strides = [1, 1, 1]} : vector<2x1x16xf32> to vector<1x1x16xf32>
    %99 = vector.shape_cast %98 : vector<1x1x16xf32> to vector<1x16xf32>
    %100 = vector.broadcast %99 : vector<1x16xf32> to vector<4x16xf32>
    %101 = arith.addf %97, %100 : vector<4x16xf32>
    %102 = vector.extract_strided_slice %3 {offsets = [1, 0, 0], sizes = [1, 32, 16], strides = [1, 1, 1]} : vector<2x32x16xf32> to vector<1x32x16xf32>
    %103 = vector.shape_cast %102 : vector<1x32x16xf32> to vector<32x16xf32>
    %cst_94 = arith.constant dense<0.000000e+00> : vector<4x16xf32>
    %104 = tpu.matmul %56, %103, %cst_94 {dimension_numbers = #tpu.dot_dimension_numbers<[1], [0], [0], [1], [0, 0, 1, 1], [], []>} : vector<4x32xf32>, vector<32x16xf32>, vector<4x16xf32> -> vector<4x16xf32>
    %105 = vector.extract_strided_slice %6 {offsets = [1, 0, 0], sizes = [1, 1, 16], strides = [1, 1, 1]} : vector<2x1x16xf32> to vector<1x1x16xf32>
    %106 = vector.shape_cast %105 : vector<1x1x16xf32> to vector<1x16xf32>
    %107 = vector.broadcast %106 : vector<1x16xf32> to vector<4x16xf32>
    %108 = arith.addf %104, %107 : vector<4x16xf32>
    %109 = vector.extract_strided_slice %4 {offsets = [1, 0, 0], sizes = [1, 32, 16], strides = [1, 1, 1]} : vector<2x32x16xf32> to vector<1x32x16xf32>
    %110 = vector.shape_cast %109 : vector<1x32x16xf32> to vector<32x16xf32>
    %cst_95 = arith.constant dense<0.000000e+00> : vector<4x16xf32>
    %111 = tpu.matmul %56, %110, %cst_95 {dimension_numbers = #tpu.dot_dimension_numbers<[1], [0], [0], [1], [0, 0, 1, 1], [], []>} : vector<4x32xf32>, vector<32x16xf32>, vector<4x16xf32> -> vector<4x16xf32>
    %112 = vector.extract_strided_slice %7 {offsets = [1, 0, 0], sizes = [1, 1, 16], strides = [1, 1, 1]} : vector<2x1x16xf32> to vector<1x1x16xf32>
    %113 = vector.shape_cast %112 : vector<1x1x16xf32> to vector<1x16xf32>
    %114 = vector.broadcast %113 : vector<1x16xf32> to vector<4x16xf32>
    %115 = arith.addf %111, %114 : vector<4x16xf32>
    %cst_96 = arith.constant dense<0.000000e+00> : vector<4x4xf32>
    %116 = tpu.matmul %101, %108, %cst_96 {dimension_numbers = #tpu.dot_dimension_numbers<[1], [1], [0], [0], [0, 0, 1, 0], [], []>} : vector<4x16xf32>, vector<4x16xf32>, vector<4x4xf32> -> vector<4x4xf32>
    %cst_97 = arith.constant 2.500000e-01 : f32
    %117 = vector.broadcast %cst_97 : f32 to vector<4x4xf32>
    %118 = arith.mulf %116, %117 : vector<4x4xf32>
    %cst_98 = arith.constant dense<0xFF800000> : vector<4xf32>
    %119 = vector.multi_reduction <maximumf>, %118, %cst_98 [1] : vector<4x4xf32> to vector<4xf32>
    %120 = vector.shape_cast %119 : vector<4xf32> to vector<4x1xf32>
    %121 = vector.broadcast %120 : vector<4x1xf32> to vector<4x4xf32>
    %122 = arith.subf %118, %121 : vector<4x4xf32>
    %123 = math.exp %122 : vector<4x4xf32>
    %cst_99 = arith.constant dense<0.000000e+00> : vector<4xf32>
    %124 = vector.multi_reduction <add>, %123, %cst_99 [1] : vector<4x4xf32> to vector<4xf32>
    %125 = vector.shape_cast %124 : vector<4xf32> to vector<4x1xf32>
    %126 = tpu.reciprocal %125 {approx = true} : vector<4x1xf32> -> vector<4x1xf32>
    %127 = vector.broadcast %126 : vector<4x1xf32> to vector<4x4xf32>
    %128 = arith.mulf %123, %127 : vector<4x4xf32>
    %cst_100 = arith.constant dense<0.000000e+00> : vector<4x16xf32>
    %129 = tpu.matmul %128, %115, %cst_100 {dimension_numbers = #tpu.dot_dimension_numbers<[1], [0], [0], [1], [0, 0, 1, 1], [], []>} : vector<4x4xf32>, vector<4x16xf32>, vector<4x16xf32> -> vector<4x16xf32>
    %130 = vector.extract_strided_slice %8 {offsets = [1, 0, 0], sizes = [1, 16, 32], strides = [1, 1, 1]} : vector<2x16x32xf32> to vector<1x16x32xf32>
    %131 = vector.shape_cast %130 : vector<1x16x32xf32> to vector<16x32xf32>
    %cst_101 = arith.constant dense<0.000000e+00> : vector<4x32xf32>
    %132 = tpu.matmul %129, %131, %cst_101 {dimension_numbers = #tpu.dot_dimension_numbers<[1], [0], [0], [1], [0, 0, 1, 1], [], []>} : vector<4x16xf32>, vector<16x32xf32>, vector<4x32xf32> -> vector<4x32xf32>
    %133 = arith.addf %94, %132 : vector<4x32xf32>
    %134 = arith.addf %34, %133 : vector<4x32xf32>
    %135 = vector.broadcast %9 : vector<1x32xf32> to vector<4x32xf32>
    %136 = arith.addf %134, %135 : vector<4x32xf32>
    %cst_102 = arith.constant dense<0.000000e+00> : vector<4xf32>
    %137 = vector.multi_reduction <add>, %136, %cst_102 [1] : vector<4x32xf32> to vector<4xf32>
    %138 = vector.shape_cast %137 : vector<4xf32> to vector<4x1xf32>
    %cst_103 = arith.constant 3.200000e+01 : f32
    %139 = vector.broadcast %cst_103 : f32 to vector<4x1xf32>
    %140 = arith.divf %138, %139 : vector<4x1xf32>
    %141 = vector.broadcast %140 : vector<4x1xf32> to vector<4x32xf32>
    %142 = arith.subf %136, %141 : vector<4x32xf32>
    %143 = arith.mulf %142, %142 : vector<4x32xf32>
    %cst_104 = arith.constant dense<0.000000e+00> : vector<4xf32>
    %144 = vector.multi_reduction <add>, %143, %cst_104 [1] : vector<4x32xf32> to vector<4xf32>
    %145 = vector.shape_cast %144 : vector<4xf32> to vector<4x1xf32>
    %cst_105 = arith.constant 3.200000e+01 : f32
    %146 = vector.broadcast %cst_105 : f32 to vector<4x1xf32>
    %147 = arith.divf %145, %146 : vector<4x1xf32>
    %148 = vector.broadcast %140 : vector<4x1xf32> to vector<4x32xf32>
    %149 = arith.subf %136, %148 : vector<4x32xf32>
    %cst_106 = arith.constant 9.99999997E-7 : f32
    %150 = vector.broadcast %cst_106 : f32 to vector<4x1xf32>
    %151 = arith.addf %147, %150 : vector<4x1xf32>
    %152 = math.rsqrt %151 : vector<4x1xf32>
    %153 = vector.broadcast %152 : vector<4x1xf32> to vector<4x32xf32>
    %154 = arith.mulf %149, %153 : vector<4x32xf32>
    %155 = vector.broadcast %10 : vector<1x32xf32> to vector<4x32xf32>
    %156 = arith.mulf %154, %155 : vector<4x32xf32>
    %157 = vector.broadcast %11 : vector<1x32xf32> to vector<4x32xf32>
    %158 = arith.addf %156, %157 : vector<4x32xf32>
    %cst_107 = arith.constant dense<0.000000e+00> : vector<4x128xf32>
    %159 = tpu.matmul %158, %12, %cst_107 {dimension_numbers = #tpu.dot_dimension_numbers<[1], [0], [0], [1], [0, 0, 1, 1], [], []>} : vector<4x32xf32>, vector<32x128xf32>, vector<4x128xf32> -> vector<4x128xf32>
    %160 = vector.broadcast %13 : vector<1x128xf32> to vector<4x128xf32>
    %161 = arith.addf %159, %160 : vector<4x128xf32>
    %162 = arith.mulf %161, %161 : vector<4x128xf32>
    %163 = arith.mulf %161, %162 : vector<4x128xf32>
    %cst_108 = arith.constant 4.471500e-02 : f32
    %164 = vector.broadcast %cst_108 : f32 to vector<4x128xf32>
    %165 = arith.mulf %164, %163 : vector<4x128xf32>
    %166 = arith.addf %161, %165 : vector<4x128xf32>
    %cst_109 = arith.constant 0.797884583 : f32
    %167 = vector.broadcast %cst_109 : f32 to vector<4x128xf32>
    %168 = arith.mulf %167, %166 : vector<4x128xf32>
    %169 = math.tanh %168 : vector<4x128xf32>
    %cst_110 = arith.constant 1.000000e+00 : f32
    %170 = vector.broadcast %cst_110 : f32 to vector<4x128xf32>
    %171 = arith.addf %170, %169 : vector<4x128xf32>
    %cst_111 = arith.constant 5.000000e-01 : f32
    %172 = vector.broadcast %cst_111 : f32 to vector<4x128xf32>
    %173 = arith.mulf %172, %171 : vector<4x128xf32>
    %174 = arith.mulf %161, %173 : vector<4x128xf32>
    %cst_112 = arith.constant dense<0.000000e+00> : vector<4x32xf32>
    %175 = tpu.matmul %174, %14, %cst_112 {dimension_numbers = #tpu.dot_dimension_numbers<[1], [0], [0], [1], [0, 0, 1, 1], [], []>} : vector<4x128xf32>, vector<128x32xf32>, vector<4x32xf32> -> vector<4x32xf32>
    %176 = vector.broadcast %15 : vector<1x32xf32> to vector<4x32xf32>
    %177 = arith.addf %175, %176 : vector<4x32xf32>
    %178 = arith.addf %136, %177 : vector<4x32xf32>
    %179 = vector.extract_strided_slice %178 {offsets = [0, 0], sizes = [3, 32], strides = [1, 1]} : vector<4x32xf32> to vector<3x32xf32>
    %cst_113 = arith.constant dense<0.000000e+00> : vector<3xf32>
    %180 = vector.multi_reduction <add>, %179, %cst_113 [1] : vector<3x32xf32> to vector<3xf32>
    %181 = vector.shape_cast %180 : vector<3xf32> to vector<3x1xf32>
    %cst_114 = arith.constant 3.200000e+01 : f32
    %182 = vector.broadcast %cst_114 : f32 to vector<3x1xf32>
    %183 = arith.divf %181, %182 : vector<3x1xf32>
    %184 = vector.broadcast %183 : vector<3x1xf32> to vector<3x32xf32>
    %185 = arith.subf %179, %184 : vector<3x32xf32>
    %186 = arith.mulf %185, %185 : vector<3x32xf32>
    %cst_115 = arith.constant dense<0.000000e+00> : vector<3xf32>
    %187 = vector.multi_reduction <add>, %186, %cst_115 [1] : vector<3x32xf32> to vector<3xf32>
    %188 = vector.shape_cast %187 : vector<3xf32> to vector<3x1xf32>
    %cst_116 = arith.constant 3.200000e+01 : f32
    %189 = vector.broadcast %cst_116 : f32 to vector<3x1xf32>
    %190 = arith.divf %188, %189 : vector<3x1xf32>
    %191 = vector.broadcast %183 : vector<3x1xf32> to vector<3x32xf32>
    %192 = arith.subf %179, %191 : vector<3x32xf32>
    %cst_117 = arith.constant 9.99999997E-7 : f32
    %193 = vector.broadcast %cst_117 : f32 to vector<3x1xf32>
    %194 = arith.addf %190, %193 : vector<3x1xf32>
    %195 = math.rsqrt %194 : vector<3x1xf32>
    %196 = vector.broadcast %195 : vector<3x1xf32> to vector<3x32xf32>
    %197 = arith.mulf %192, %196 : vector<3x32xf32>
    %198 = vector.broadcast %16 : vector<1x32xf32> to vector<3x32xf32>
    %199 = arith.mulf %197, %198 : vector<3x32xf32>
    %200 = vector.broadcast %17 : vector<1x32xf32> to vector<3x32xf32>
    %201 = arith.addf %199, %200 : vector<3x32xf32>
    %202 = vector.extract_strided_slice %18 {offsets = [0, 0, 0], sizes = [1, 32, 16], strides = [1, 1, 1]} : vector<2x32x16xf32> to vector<1x32x16xf32>
    %203 = vector.shape_cast %202 : vector<1x32x16xf32> to vector<32x16xf32>
    %cst_118 = arith.constant dense<0.000000e+00> : vector<3x16xf32>
    %204 = tpu.matmul %201, %203, %cst_118 {dimension_numbers = #tpu.dot_dimension_numbers<[1], [0], [0], [1], [0, 0, 1, 1], [], []>} : vector<3x32xf32>, vector<32x16xf32>, vector<3x16xf32> -> vector<3x16xf32>
    %205 = vector.extract_strided_slice %21 {offsets = [0, 0, 0], sizes = [1, 1, 16], strides = [1, 1, 1]} : vector<2x1x16xf32> to vector<1x1x16xf32>
    %206 = vector.shape_cast %205 : vector<1x1x16xf32> to vector<1x16xf32>
    %207 = vector.broadcast %206 : vector<1x16xf32> to vector<3x16xf32>
    %208 = arith.addf %204, %207 : vector<3x16xf32>
    %209 = vector.extract_strided_slice %19 {offsets = [0, 0, 0], sizes = [1, 32, 16], strides = [1, 1, 1]} : vector<2x32x16xf32> to vector<1x32x16xf32>
    %210 = vector.shape_cast %209 : vector<1x32x16xf32> to vector<32x16xf32>
    %cst_119 = arith.constant dense<0.000000e+00> : vector<3x16xf32>
    %211 = tpu.matmul %201, %210, %cst_119 {dimension_numbers = #tpu.dot_dimension_numbers<[1], [0], [0], [1], [0, 0, 1, 1], [], []>} : vector<3x32xf32>, vector<32x16xf32>, vector<3x16xf32> -> vector<3x16xf32>
    %212 = vector.extract_strided_slice %22 {offsets = [0, 0, 0], sizes = [1, 1, 16], strides = [1, 1, 1]} : vector<2x1x16xf32> to vector<1x1x16xf32>
    %213 = vector.shape_cast %212 : vector<1x1x16xf32> to vector<1x16xf32>
    %214 = vector.broadcast %213 : vector<1x16xf32> to vector<3x16xf32>
    %215 = arith.addf %211, %214 : vector<3x16xf32>
    %216 = vector.extract_strided_slice %20 {offsets = [0, 0, 0], sizes = [1, 32, 16], strides = [1, 1, 1]} : vector<2x32x16xf32> to vector<1x32x16xf32>
    %217 = vector.shape_cast %216 : vector<1x32x16xf32> to vector<32x16xf32>
    %cst_120 = arith.constant dense<0.000000e+00> : vector<3x16xf32>
    %218 = tpu.matmul %201, %217, %cst_120 {dimension_numbers = #tpu.dot_dimension_numbers<[1], [0], [0], [1], [0, 0, 1, 1], [], []>} : vector<3x32xf32>, vector<32x16xf32>, vector<3x16xf32> -> vector<3x16xf32>
    %219 = vector.extract_strided_slice %23 {offsets = [0, 0, 0], sizes = [1, 1, 16], strides = [1, 1, 1]} : vector<2x1x16xf32> to vector<1x1x16xf32>
    %220 = vector.shape_cast %219 : vector<1x1x16xf32> to vector<1x16xf32>
    %221 = vector.broadcast %220 : vector<1x16xf32> to vector<3x16xf32>
    %222 = arith.addf %218, %221 : vector<3x16xf32>
    %cst_121 = arith.constant dense<0.000000e+00> : vector<3x3xf32>
    %223 = tpu.matmul %208, %215, %cst_121 {dimension_numbers = #tpu.dot_dimension_numbers<[1], [1], [0], [0], [0, 0, 1, 0], [], []>} : vector<3x16xf32>, vector<3x16xf32>, vector<3x3xf32> -> vector<3x3xf32>
    %cst_122 = arith.constant 2.500000e-01 : f32
    %224 = vector.broadcast %cst_122 : f32 to vector<3x3xf32>
    %225 = arith.mulf %223, %224 : vector<3x3xf32>
    %cst_123 = arith.constant dense<0xFF800000> : vector<3xf32>
    %226 = vector.multi_reduction <maximumf>, %225, %cst_123 [1] : vector<3x3xf32> to vector<3xf32>
    %227 = vector.shape_cast %226 : vector<3xf32> to vector<3x1xf32>
    %228 = vector.broadcast %227 : vector<3x1xf32> to vector<3x3xf32>
    %229 = arith.subf %225, %228 : vector<3x3xf32>
    %230 = math.exp %229 : vector<3x3xf32>
    %cst_124 = arith.constant dense<0.000000e+00> : vector<3xf32>
    %231 = vector.multi_reduction <add>, %230, %cst_124 [1] : vector<3x3xf32> to vector<3xf32>
    %232 = vector.shape_cast %231 : vector<3xf32> to vector<3x1xf32>
    %233 = tpu.reciprocal %232 {approx = true} : vector<3x1xf32> -> vector<3x1xf32>
    %234 = vector.broadcast %233 : vector<3x1xf32> to vector<3x3xf32>
    %235 = arith.mulf %230, %234 : vector<3x3xf32>
    %cst_125 = arith.constant dense<0.000000e+00> : vector<3x16xf32>
    %236 = tpu.matmul %235, %222, %cst_125 {dimension_numbers = #tpu.dot_dimension_numbers<[1], [0], [0], [1], [0, 0, 1, 1], [], []>} : vector<3x3xf32>, vector<3x16xf32>, vector<3x16xf32> -> vector<3x16xf32>
    %237 = vector.extract_strided_slice %24 {offsets = [0, 0, 0], sizes = [1, 16, 32], strides = [1, 1, 1]} : vector<2x16x32xf32> to vector<1x16x32xf32>
    %238 = vector.shape_cast %237 : vector<1x16x32xf32> to vector<16x32xf32>
    %cst_126 = arith.constant dense<0.000000e+00> : vector<3x32xf32>
    %239 = tpu.matmul %236, %238, %cst_126 {dimension_numbers = #tpu.dot_dimension_numbers<[1], [0], [0], [1], [0, 0, 1, 1], [], []>} : vector<3x16xf32>, vector<16x32xf32>, vector<3x32xf32> -> vector<3x32xf32>
    %240 = vector.extract_strided_slice %18 {offsets = [1, 0, 0], sizes = [1, 32, 16], strides = [1, 1, 1]} : vector<2x32x16xf32> to vector<1x32x16xf32>
    %241 = vector.shape_cast %240 : vector<1x32x16xf32> to vector<32x16xf32>
    %cst_127 = arith.constant dense<0.000000e+00> : vector<3x16xf32>
    %242 = tpu.matmul %201, %241, %cst_127 {dimension_numbers = #tpu.dot_dimension_numbers<[1], [0], [0], [1], [0, 0, 1, 1], [], []>} : vector<3x32xf32>, vector<32x16xf32>, vector<3x16xf32> -> vector<3x16xf32>
    %243 = vector.extract_strided_slice %21 {offsets = [1, 0, 0], sizes = [1, 1, 16], strides = [1, 1, 1]} : vector<2x1x16xf32> to vector<1x1x16xf32>
    %244 = vector.shape_cast %243 : vector<1x1x16xf32> to vector<1x16xf32>
    %245 = vector.broadcast %244 : vector<1x16xf32> to vector<3x16xf32>
    %246 = arith.addf %242, %245 : vector<3x16xf32>
    %247 = vector.extract_strided_slice %19 {offsets = [1, 0, 0], sizes = [1, 32, 16], strides = [1, 1, 1]} : vector<2x32x16xf32> to vector<1x32x16xf32>
    %248 = vector.shape_cast %247 : vector<1x32x16xf32> to vector<32x16xf32>
    %cst_128 = arith.constant dense<0.000000e+00> : vector<3x16xf32>
    %249 = tpu.matmul %201, %248, %cst_128 {dimension_numbers = #tpu.dot_dimension_numbers<[1], [0], [0], [1], [0, 0, 1, 1], [], []>} : vector<3x32xf32>, vector<32x16xf32>, vector<3x16xf32> -> vector<3x16xf32>
    %250 = vector.extract_strided_slice %22 {offsets = [1, 0, 0], sizes = [1, 1, 16], strides = [1, 1, 1]} : vector<2x1x16xf32> to vector<1x1x16xf32>
    %251 = vector.shape_cast %250 : vector<1x1x16xf32> to vector<1x16xf32>
    %252 = vector.broadcast %251 : vector<1x16xf32> to vector<3x16xf32>
    %253 = arith.addf %249, %252 : vector<3x16xf32>
    %254 = vector.extract_strided_slice %20 {offsets = [1, 0, 0], sizes = [1, 32, 16], strides = [1, 1, 1]} : vector<2x32x16xf32> to vector<1x32x16xf32>
    %255 = vector.shape_cast %254 : vector<1x32x16xf32> to vector<32x16xf32>
    %cst_129 = arith.constant dense<0.000000e+00> : vector<3x16xf32>
    %256 = tpu.matmul %201, %255, %cst_129 {dimension_numbers = #tpu.dot_dimension_numbers<[1], [0], [0], [1], [0, 0, 1, 1], [], []>} : vector<3x32xf32>, vector<32x16xf32>, vector<3x16xf32> -> vector<3x16xf32>
    %257 = vector.extract_strided_slice %23 {offsets = [1, 0, 0], sizes = [1, 1, 16], strides = [1, 1, 1]} : vector<2x1x16xf32> to vector<1x1x16xf32>
    %258 = vector.shape_cast %257 : vector<1x1x16xf32> to vector<1x16xf32>
    %259 = vector.broadcast %258 : vector<1x16xf32> to vector<3x16xf32>
    %260 = arith.addf %256, %259 : vector<3x16xf32>
    %cst_130 = arith.constant dense<0.000000e+00> : vector<3x3xf32>
    %261 = tpu.matmul %246, %253, %cst_130 {dimension_numbers = #tpu.dot_dimension_numbers<[1], [1], [0], [0], [0, 0, 1, 0], [], []>} : vector<3x16xf32>, vector<3x16xf32>, vector<3x3xf32> -> vector<3x3xf32>
    %cst_131 = arith.constant 2.500000e-01 : f32
    %262 = vector.broadcast %cst_131 : f32 to vector<3x3xf32>
    %263 = arith.mulf %261, %262 : vector<3x3xf32>
    %cst_132 = arith.constant dense<0xFF800000> : vector<3xf32>
    %264 = vector.multi_reduction <maximumf>, %263, %cst_132 [1] : vector<3x3xf32> to vector<3xf32>
    %265 = vector.shape_cast %264 : vector<3xf32> to vector<3x1xf32>
    %266 = vector.broadcast %265 : vector<3x1xf32> to vector<3x3xf32>
    %267 = arith.subf %263, %266 : vector<3x3xf32>
    %268 = math.exp %267 : vector<3x3xf32>
    %cst_133 = arith.constant dense<0.000000e+00> : vector<3xf32>
    %269 = vector.multi_reduction <add>, %268, %cst_133 [1] : vector<3x3xf32> to vector<3xf32>
    %270 = vector.shape_cast %269 : vector<3xf32> to vector<3x1xf32>
    %271 = tpu.reciprocal %270 {approx = true} : vector<3x1xf32> -> vector<3x1xf32>
    %272 = vector.broadcast %271 : vector<3x1xf32> to vector<3x3xf32>
    %273 = arith.mulf %268, %272 : vector<3x3xf32>
    %cst_134 = arith.constant dense<0.000000e+00> : vector<3x16xf32>
    %274 = tpu.matmul %273, %260, %cst_134 {dimension_numbers = #tpu.dot_dimension_numbers<[1], [0], [0], [1], [0, 0, 1, 1], [], []>} : vector<3x3xf32>, vector<3x16xf32>, vector<3x16xf32> -> vector<3x16xf32>
    %275 = vector.extract_strided_slice %24 {offsets = [1, 0, 0], sizes = [1, 16, 32], strides = [1, 1, 1]} : vector<2x16x32xf32> to vector<1x16x32xf32>
    %276 = vector.shape_cast %275 : vector<1x16x32xf32> to vector<16x32xf32>
    %cst_135 = arith.constant dense<0.000000e+00> : vector<3x32xf32>
    %277 = tpu.matmul %274, %276, %cst_135 {dimension_numbers = #tpu.dot_dimension_numbers<[1], [0], [0], [1], [0, 0, 1, 1], [], []>} : vector<3x16xf32>, vector<16x32xf32>, vector<3x32xf32> -> vector<3x32xf32>
    %278 = arith.addf %239, %277 : vector<3x32xf32>
    %279 = arith.addf %179, %278 : vector<3x32xf32>
    %280 = vector.broadcast %25 : vector<1x32xf32> to vector<3x32xf32>
    %281 = arith.addf %279, %280 : vector<3x32xf32>
    %cst_136 = arith.constant dense<0.000000e+00> : vector<3xf32>
    %282 = vector.multi_reduction <add>, %281, %cst_136 [1] : vector<3x32xf32> to vector<3xf32>
    %283 = vector.shape_cast %282 : vector<3xf32> to vector<3x1xf32>
    %cst_137 = arith.constant 3.200000e+01 : f32
    %284 = vector.broadcast %cst_137 : f32 to vector<3x1xf32>
    %285 = arith.divf %283, %284 : vector<3x1xf32>
    %286 = vector.broadcast %285 : vector<3x1xf32> to vector<3x32xf32>
    %287 = arith.subf %281, %286 : vector<3x32xf32>
    %288 = arith.mulf %287, %287 : vector<3x32xf32>
    %cst_138 = arith.constant dense<0.000000e+00> : vector<3xf32>
    %289 = vector.multi_reduction <add>, %288, %cst_138 [1] : vector<3x32xf32> to vector<3xf32>
    %290 = vector.shape_cast %289 : vector<3xf32> to vector<3x1xf32>
    %cst_139 = arith.constant 3.200000e+01 : f32
    %291 = vector.broadcast %cst_139 : f32 to vector<3x1xf32>
    %292 = arith.divf %290, %291 : vector<3x1xf32>
    %293 = vector.broadcast %285 : vector<3x1xf32> to vector<3x32xf32>
    %294 = arith.subf %281, %293 : vector<3x32xf32>
    %cst_140 = arith.constant 9.99999997E-7 : f32
    %295 = vector.broadcast %cst_140 : f32 to vector<3x1xf32>
    %296 = arith.addf %292, %295 : vector<3x1xf32>
    %297 = math.rsqrt %296 : vector<3x1xf32>
    %298 = vector.broadcast %297 : vector<3x1xf32> to vector<3x32xf32>
    %299 = arith.mulf %294, %298 : vector<3x32xf32>
    %300 = vector.broadcast %26 : vector<1x32xf32> to vector<3x32xf32>
    %301 = arith.mulf %299, %300 : vector<3x32xf32>
    %302 = vector.broadcast %27 : vector<1x32xf32> to vector<3x32xf32>
    %303 = arith.addf %301, %302 : vector<3x32xf32>
    %cst_141 = arith.constant dense<0.000000e+00> : vector<3x128xf32>
    %304 = tpu.matmul %303, %28, %cst_141 {dimension_numbers = #tpu.dot_dimension_numbers<[1], [0], [0], [1], [0, 0, 1, 1], [], []>} : vector<3x32xf32>, vector<32x128xf32>, vector<3x128xf32> -> vector<3x128xf32>
    %305 = vector.broadcast %29 : vector<1x128xf32> to vector<3x128xf32>
    %306 = arith.addf %304, %305 : vector<3x128xf32>
    %307 = arith.mulf %306, %306 : vector<3x128xf32>
    %308 = arith.mulf %306, %307 : vector<3x128xf32>
    %cst_142 = arith.constant 4.471500e-02 : f32
    %309 = vector.broadcast %cst_142 : f32 to vector<3x128xf32>
    %310 = arith.mulf %309, %308 : vector<3x128xf32>
    %311 = arith.addf %306, %310 : vector<3x128xf32>
    %cst_143 = arith.constant 0.797884583 : f32
    %312 = vector.broadcast %cst_143 : f32 to vector<3x128xf32>
    %313 = arith.mulf %312, %311 : vector<3x128xf32>
    %314 = math.tanh %313 : vector<3x128xf32>
    %cst_144 = arith.constant 1.000000e+00 : f32
    %315 = vector.broadcast %cst_144 : f32 to vector<3x128xf32>
    %316 = arith.addf %315, %314 : vector<3x128xf32>
    %cst_145 = arith.constant 5.000000e-01 : f32
    %317 = vector.broadcast %cst_145 : f32 to vector<3x128xf32>
    %318 = arith.mulf %317, %316 : vector<3x128xf32>
    %319 = arith.mulf %306, %318 : vector<3x128xf32>
    %cst_146 = arith.constant dense<0.000000e+00> : vector<3x32xf32>
    %320 = tpu.matmul %319, %30, %cst_146 {dimension_numbers = #tpu.dot_dimension_numbers<[1], [0], [0], [1], [0, 0, 1, 1], [], []>} : vector<3x128xf32>, vector<128x32xf32>, vector<3x32xf32> -> vector<3x32xf32>
    %321 = vector.broadcast %31 : vector<1x32xf32> to vector<3x32xf32>
    %322 = arith.addf %320, %321 : vector<3x32xf32>
    %323 = arith.addf %281, %322 : vector<3x32xf32>
    %324 = vector.extract_strided_slice %323 {offsets = [0, 0], sizes = [1, 32], strides = [1, 1]} : vector<3x32xf32> to vector<1x32xf32>
    %c0_147 = arith.constant 0 : index
    %c0_148 = arith.constant 0 : index
    %325 = vector.load %arg34[%c0_147, %c0_148] : memref<1x32xf32, #tpu.memory_space<vmem>>, vector<1x32xf32>
    %c0_149 = arith.constant 0 : index
    %c0_150 = arith.constant 0 : index
    %326 = vector.load %arg35[%c0_149, %c0_150] : memref<1x32xf32, #tpu.memory_space<vmem>>, vector<1x32xf32>
    %cst_151 = arith.constant dense<0.000000e+00> : vector<1xf32>
    %327 = vector.multi_reduction <add>, %324, %cst_151 [1] : vector<1x32xf32> to vector<1xf32>
    %328 = vector.shape_cast %327 : vector<1xf32> to vector<1x1xf32>
    %cst_152 = arith.constant 3.200000e+01 : f32
    %329 = vector.broadcast %cst_152 : f32 to vector<1x1xf32>
    %330 = arith.divf %328, %329 : vector<1x1xf32>
    %331 = vector.broadcast %330 : vector<1x1xf32> to vector<1x32xf32>
    %332 = arith.subf %324, %331 : vector<1x32xf32>
    %333 = arith.mulf %332, %332 : vector<1x32xf32>
    %cst_153 = arith.constant dense<0.000000e+00> : vector<1xf32>
    %334 = vector.multi_reduction <add>, %333, %cst_153 [1] : vector<1x32xf32> to vector<1xf32>
    %335 = vector.shape_cast %334 : vector<1xf32> to vector<1x1xf32>
    %cst_154 = arith.constant 3.200000e+01 : f32
    %336 = vector.broadcast %cst_154 : f32 to vector<1x1xf32>
    %337 = arith.divf %335, %336 : vector<1x1xf32>
    %338 = vector.broadcast %330 : vector<1x1xf32> to vector<1x32xf32>
    %339 = arith.subf %324, %338 : vector<1x32xf32>
    %cst_155 = arith.constant 9.99999997E-7 : f32
    %340 = vector.broadcast %cst_155 : f32 to vector<1x1xf32>
    %341 = arith.addf %337, %340 : vector<1x1xf32>
    %342 = math.rsqrt %341 : vector<1x1xf32>
    %343 = vector.broadcast %342 : vector<1x1xf32> to vector<1x32xf32>
    %344 = arith.mulf %339, %343 : vector<1x32xf32>
    %345 = arith.mulf %344, %325 : vector<1x32xf32>
    %346 = arith.addf %345, %326 : vector<1x32xf32>
    %c0_156 = arith.constant 0 : index
    %c0_157 = arith.constant 0 : index
    %347 = vector.load %arg36[%c0_156, %c0_157] : memref<32x10xf32, #tpu.memory_space<vmem>>, vector<32x10xf32>
    %cst_158 = arith.constant dense<0.000000e+00> : vector<1x10xf32>
    %348 = tpu.matmul %346, %347, %cst_158 {dimension_numbers = #tpu.dot_dimension_numbers<[1], [0], [0], [1], [0, 0, 1, 1], [], []>} : vector<1x32xf32>, vector<32x10xf32>, vector<1x10xf32> -> vector<1x10xf32>
    %c0_159 = arith.constant 0 : index
    %c0_160 = arith.constant 0 : index
    %349 = vector.load %arg37[%c0_159, %c0_160] : memref<1x10xf32, #tpu.memory_space<vmem>>, vector<1x10xf32>
    %350 = arith.addf %348, %349 : vector<1x10xf32>
    %c0_161 = arith.constant 0 : index
    %c0_162 = arith.constant 0 : index
    %c0_163 = arith.constant 0 : index
    %351 = vector.load %arg38[%c0_161, %c0_162, %c0_163] : memref<1x1x10xf32, #tpu.memory_space<vmem>>, vector<1x1x10xf32>
    %352 = vector.shape_cast %351 : vector<1x1x10xf32> to vector<1x10xf32>
    %353 = vector.shape_cast %350 : vector<1x10xf32> to vector<1x1x10xf32>
    tpu.vector_store %arg38[%c0_161, %c0_162, %c0_163], %353 {strides = array<i32>} : memref<1x1x10xf32, #tpu.memory_space<vmem>>, vector<1x1x10xf32>,
    return
  }
  func.func @transform_0(%arg0: i32) -> (i32, i32, i32) {
    %c0_i32 = arith.constant 0 : i32
    %c0_i32_0 = arith.constant 0 : i32
    %c0_i32_1 = arith.constant 0 : i32
    return %arg0, %c0_i32, %c0_i32_0 : i32, i32, i32
  }
  func.func @transform_1(%arg0: i32) -> (i32, i32) {
    %c0_i32 = arith.constant 0 : i32
    %c0_i32_0 = arith.constant 0 : i32
    %c0_i32_1 = arith.constant 0 : i32
    return %c0_i32, %c0_i32_0 : i32, i32
  }
  func.func @transform_2(%arg0: i32) -> (i32, i32) {
    %c0_i32 = arith.constant 0 : i32
    %c0_i32_0 = arith.constant 0 : i32
    %c0_i32_1 = arith.constant 0 : i32
    return %c0_i32, %c0_i32_0 : i32, i32
  }
  func.func @transform_3(%arg0: i32) -> (i32, i32, i32) {
    %c0_i32 = arith.constant 0 : i32
    %c0_i32_0 = arith.constant 0 : i32
    %c0_i32_1 = arith.constant 0 : i32
    %c0_i32_2 = arith.constant 0 : i32
    return %c0_i32, %c0_i32_0, %c0_i32_1 : i32, i32, i32
  }
  func.func @transform_4(%arg0: i32) -> (i32, i32, i32) {
    %c0_i32 = arith.constant 0 : i32
    %c0_i32_0 = arith.constant 0 : i32
    %c0_i32_1 = arith.constant 0 : i32
    %c0_i32_2 = arith.constant 0 : i32
    return %c0_i32, %c0_i32_0, %c0_i32_1 : i32, i32, i32
  }
  func.func @transform_5(%arg0: i32) -> (i32, i32, i32) {
    %c0_i32 = arith.constant 0 : i32
    %c0_i32_0 = arith.constant 0 : i32
    %c0_i32_1 = arith.constant 0 : i32
    %c0_i32_2 = arith.constant 0 : i32
    return %c0_i32, %c0_i32_0, %c0_i32_1 : i32, i32, i32
  }
  func.func @transform_6(%arg0: i32) -> (i32, i32, i32) {
    %c0_i32 = arith.constant 0 : i32
    %c0_i32_0 = arith.constant 0 : i32
    %c0_i32_1 = arith.constant 0 : i32
    %c0_i32_2 = arith.constant 0 : i32
    return %c0_i32, %c0_i32_0, %c0_i32_1 : i32, i32, i32
  }
  func.func @transform_7(%arg0: i32) -> (i32, i32, i32) {
    %c0_i32 = arith.constant 0 : i32
    %c0_i32_0 = arith.constant 0 : i32
    %c0_i32_1 = arith.constant 0 : i32
    %c0_i32_2 = arith.constant 0 : i32
    return %c0_i32, %c0_i32_0, %c0_i32_1 : i32, i32, i32
  }
  func.func @transform_8(%arg0: i32) -> (i32, i32, i32) {
    %c0_i32 = arith.constant 0 : i32
    %c0_i32_0 = arith.constant 0 : i32
    %c0_i32_1 = arith.constant 0 : i32
    %c0_i32_2 = arith.constant 0 : i32
    return %c0_i32, %c0_i32_0, %c0_i32_1 : i32, i32, i32
  }
  func.func @transform_9(%arg0: i32) -> (i32, i32, i32) {
    %c0_i32 = arith.constant 0 : i32
    %c0_i32_0 = arith.constant 0 : i32
    %c0_i32_1 = arith.constant 0 : i32
    %c0_i32_2 = arith.constant 0 : i32
    return %c0_i32, %c0_i32_0, %c0_i32_1 : i32, i32, i32
  }
  func.func @transform_10(%arg0: i32) -> (i32, i32) {
    %c0_i32 = arith.constant 0 : i32
    %c0_i32_0 = arith.constant 0 : i32
    %c0_i32_1 = arith.constant 0 : i32
    return %c0_i32, %c0_i32_0 : i32, i32
  }
  func.func @transform_11(%arg0: i32) -> (i32, i32) {
    %c0_i32 = arith.constant 0 : i32
    %c0_i32_0 = arith.constant 0 : i32
    %c0_i32_1 = arith.constant 0 : i32
    return %c0_i32, %c0_i32_0 : i32, i32
  }
  func.func @transform_12(%arg0: i32) -> (i32, i32) {
    %c0_i32 = arith.constant 0 : i32
    %c0_i32_0 = arith.constant 0 : i32
    %c0_i32_1 = arith.constant 0 : i32
    return %c0_i32, %c0_i32_0 : i32, i32
  }
  func.func @transform_13(%arg0: i32) -> (i32, i32) {
    %c0_i32 = arith.constant 0 : i32
    %c0_i32_0 = arith.constant 0 : i32
    %c0_i32_1 = arith.constant 0 : i32
    return %c0_i32, %c0_i32_0 : i32, i32
  }
  func.func @transform_14(%arg0: i32) -> (i32, i32) {
    %c0_i32 = arith.constant 0 : i32
    %c0_i32_0 = arith.constant 0 : i32
    %c0_i32_1 = arith.constant 0 : i32
    return %c0_i32, %c0_i32_0 : i32, i32
  }
  func.func @transform_15(%arg0: i32) -> (i32, i32) {
    %c0_i32 = arith.constant 0 : i32
    %c0_i32_0 = arith.constant 0 : i32
    %c0_i32_1 = arith.constant 0 : i32
    return %c0_i32, %c0_i32_0 : i32, i32
  }
  func.func @transform_16(%arg0: i32) -> (i32, i32) {
    %c0_i32 = arith.constant 0 : i32
    %c0_i32_0 = arith.constant 0 : i32
    %c0_i32_1 = arith.constant 0 : i32
    return %c0_i32, %c0_i32_0 : i32, i32
  }
  func.func @transform_17(%arg0: i32) -> (i32, i32) {
    %c0_i32 = arith.constant 0 : i32
    %c0_i32_0 = arith.constant 0 : i32
    %c0_i32_1 = arith.constant 0 : i32
    return %c0_i32, %c0_i32_0 : i32, i32
  }
  func.func @transform_18(%arg0: i32) -> (i32, i32) {
    %c0_i32 = arith.constant 0 : i32
    %c0_i32_0 = arith.constant 0 : i32
    %c0_i32_1 = arith.constant 0 : i32
    return %c0_i32, %c0_i32_0 : i32, i32
  }
  func.func @transform_19(%arg0: i32) -> (i32, i32, i32) {
    %c0_i32 = arith.constant 0 : i32
    %c0_i32_0 = arith.constant 0 : i32
    %c0_i32_1 = arith.constant 0 : i32
    %c0_i32_2 = arith.constant 0 : i32
    return %c0_i32, %c0_i32_0, %c0_i32_1 : i32, i32, i32
  }
  func.func @transform_20(%arg0: i32) -> (i32, i32, i32) {
    %c0_i32 = arith.constant 0 : i32
    %c0_i32_0 = arith.constant 0 : i32
    %c0_i32_1 = arith.constant 0 : i32
    %c0_i32_2 = arith.constant 0 : i32
    return %c0_i32, %c0_i32_0, %c0_i32_1 : i32, i32, i32
  }
  func.func @transform_21(%arg0: i32) -> (i32, i32, i32) {
    %c0_i32 = arith.constant 0 : i32
    %c0_i32_0 = arith.constant 0 : i32
    %c0_i32_1 = arith.constant 0 : i32
    %c0_i32_2 = arith.constant 0 : i32
    return %c0_i32, %c0_i32_0, %c0_i32_1 : i32, i32, i32
  }
  func.func @transform_22(%arg0: i32) -> (i32, i32, i32) {
    %c0_i32 = arith.constant 0 : i32
    %c0_i32_0 = arith.constant 0 : i32
    %c0_i32_1 = arith.constant 0 : i32
    %c0_i32_2 = arith.constant 0 : i32
    return %c0_i32, %c0_i32_0, %c0_i32_1 : i32, i32, i32
  }
  func.func @transform_23(%arg0: i32) -> (i32, i32, i32) {
    %c0_i32 = arith.constant 0 : i32
    %c0_i32_0 = arith.constant 0 : i32
    %c0_i32_1 = arith.constant 0 : i32
    %c0_i32_2 = arith.constant 0 : i32
    return %c0_i32, %c0_i32_0, %c0_i32_1 : i32, i32, i32
  }
  func.func @transform_24(%arg0: i32) -> (i32, i32, i32) {
    %c0_i32 = arith.constant 0 : i32
    %c0_i32_0 = arith.constant 0 : i32
    %c0_i32_1 = arith.constant 0 : i32
    %c0_i32_2 = arith.constant 0 : i32
    return %c0_i32, %c0_i32_0, %c0_i32_1 : i32, i32, i32
  }
  func.func @transform_25(%arg0: i32) -> (i32, i32, i32) {
    %c0_i32 = arith.constant 0 : i32
    %c0_i32_0 = arith.constant 0 : i32
    %c0_i32_1 = arith.constant 0 : i32
    %c0_i32_2 = arith.constant 0 : i32
    return %c0_i32, %c0_i32_0, %c0_i32_1 : i32, i32, i32
  }
  func.func @transform_26(%arg0: i32) -> (i32, i32) {
    %c0_i32 = arith.constant 0 : i32
    %c0_i32_0 = arith.constant 0 : i32
    %c0_i32_1 = arith.constant 0 : i32
    return %c0_i32, %c0_i32_0 : i32, i32
  }
  func.func @transform_27(%arg0: i32) -> (i32, i32) {
    %c0_i32 = arith.constant 0 : i32
    %c0_i32_0 = arith.constant 0 : i32
    %c0_i32_1 = arith.constant 0 : i32
    return %c0_i32, %c0_i32_0 : i32, i32
  }
  func.func @transform_28(%arg0: i32) -> (i32, i32) {
    %c0_i32 = arith.constant 0 : i32
    %c0_i32_0 = arith.constant 0 : i32
    %c0_i32_1 = arith.constant 0 : i32
    return %c0_i32, %c0_i32_0 : i32, i32
  }
  func.func @transform_29(%arg0: i32) -> (i32, i32) {
    %c0_i32 = arith.constant 0 : i32
    %c0_i32_0 = arith.constant 0 : i32
    %c0_i32_1 = arith.constant 0 : i32
    return %c0_i32, %c0_i32_0 : i32, i32
  }
  func.func @transform_30(%arg0: i32) -> (i32, i32) {
    %c0_i32 = arith.constant 0 : i32
    %c0_i32_0 = arith.constant 0 : i32
    %c0_i32_1 = arith.constant 0 : i32
    return %c0_i32, %c0_i32_0 : i32, i32
  }
  func.func @transform_31(%arg0: i32) -> (i32, i32) {
    %c0_i32 = arith.constant 0 : i32
    %c0_i32_0 = arith.constant 0 : i32
    %c0_i32_1 = arith.constant 0 : i32
    return %c0_i32, %c0_i32_0 : i32, i32
  }
  func.func @transform_32(%arg0: i32) -> (i32, i32) {
    %c0_i32 = arith.constant 0 : i32
    %c0_i32_0 = arith.constant 0 : i32
    %c0_i32_1 = arith.constant 0 : i32
    return %c0_i32, %c0_i32_0 : i32, i32
  }
  func.func @transform_33(%arg0: i32) -> (i32, i32) {
    %c0_i32 = arith.constant 0 : i32
    %c0_i32_0 = arith.constant 0 : i32
    %c0_i32_1 = arith.constant 0 : i32
    return %c0_i32, %c0_i32_0 : i32, i32
  }
  func.func @transform_34(%arg0: i32) -> (i32, i32) {
    %c0_i32 = arith.constant 0 : i32
    %c0_i32_0 = arith.constant 0 : i32
    %c0_i32_1 = arith.constant 0 : i32
    return %c0_i32, %c0_i32_0 : i32, i32
  }
  func.func @transform_35(%arg0: i32) -> (i32, i32) {
    %c0_i32 = arith.constant 0 : i32
    %c0_i32_0 = arith.constant 0 : i32
    %c0_i32_1 = arith.constant 0 : i32
    return %c0_i32, %c0_i32_0 : i32, i32
  }
  func.func @transform_36(%arg0: i32) -> (i32, i32) {
    %c0_i32 = arith.constant 0 : i32
    %c0_i32_0 = arith.constant 0 : i32
    %c0_i32_1 = arith.constant 0 : i32
    return %c0_i32, %c0_i32_0 : i32, i32
  }
  func.func @transform_37(%arg0: i32) -> (i32, i32, i32) {
    %c0_i32 = arith.constant 0 : i32
    %c0_i32_0 = arith.constant 0 : i32
    %c0_i32_1 = arith.constant 0 : i32
    return %arg0, %c0_i32, %c0_i32_0 : i32, i32, i32
  }
}

</mosaic_0001>

<bundles_post_ra>
// kernel: neg.1
= control target key start
LH: loop header
LB: loop body
LE: loop exit
PB: predicated region body
PF: predicated region fallthrough
CT: control target
= control target key end

     0   :  { %s24_s0 = inlined_call_operand.vmem [shape: f32[2,5], index: 0, kind: input, shape index: {}]   ;;  %s25_s1 = inlined_call_operand.vmem [shape: f32[2,5], index: 1, kind: output, shape index: {}]  }
   0x1   :  { %v2_v0 = vld [vmem:[%s24_s0] sm:$0x1f] }
   0x2   :  { %v5_v1 = vxor.u32 2147483648, %v2_v0 }
   0x4   :  { %7 = vst [vmem:[%s25_s1] sm:$0xff] %v5_v1 }

// kernel: timm_vit_adapter_forward.2
= control target key start
LH: loop header
LB: loop body
LE: loop exit
PB: predicated region body
PF: predicated region fallthrough
CT: control target
= control target key end

     0   :  { %s4878_s6 = smov 1   ;;  %s4879_s10 = smov 2   ;;  %s5537_s0 = inlined_call_operand.smem [shape: u32[43], index: -1, kind: input, shape index: {}] }
   0x1   :  { %s4932_s5 = sld [smem:[%s5537_s0]]   ;;  %s4880_s14 = smov 3  }
   0x2   :  { %s4937_s9 = sld [smem:[%s5537_s0 + %s4878_s6]]   ;;  %s4881_s18 = smov 4  }
   0x3   :  { %s4942_s13 = sld [smem:[%s5537_s0 + %s4879_s10]]   ;;  %s4882_s22 = smov 5  }
   0x4   :  { %s4947_s17 = sld [smem:[%s5537_s0 + %s4880_s14]]   ;;  %s4883_s26 = smov 6  }
   0x5   :  { %s4952_s21 = sld [smem:[%s5537_s0 + %s4881_s18]]   ;;  %s4884_s30 = smov 7  }
   0x6   :  { %s4957_s25 = sld [smem:[%s5537_s0 + %s4882_s22]]   ;;  %s4885_s4 = smov 8  }
   0x7   :  { %s4962_s29 = sld [smem:[%s5537_s0 + %s4883_s26]]   ;;  %s4886_s10 = smov 9  }
   0x8   :  { %s4967_s3 = sld [smem:[%s5537_s0 + %s4884_s30]]   ;;  %s4887_s15 = smov 10  }
   0x9   :  { %s4972_s8 = sld [smem:[%s5537_s0 + %s4885_s4]]   ;;  %s4888_s20 = smov 11  }
   0xa   :  { %s4977_s14 = sld [smem:[%s5537_s0 + %s4886_s10]]   ;;  %s4889_s26 = smov 12  }
   0xb   :  { %s4982_s19 = sld [smem:[%s5537_s0 + %s4887_s15]]   ;;  %s4890_s1 = smov 13  }
   0xc   :  { %s4987_s24 = sld [smem:[%s5537_s0 + %s4888_s20]]   ;;  %s4891_s7 = smov 14  }
   0xd   :  { %s4992_s30 = sld [smem:[%s5537_s0 + %s4889_s26]]   ;;  %s4892_s15 = smov 15  }
   0xe   :  { %5554 = sst [smem:[#allocation4_spill]] %s4967_s3  ;;  %s4893_s22 = smov 16  }
   0xf   :  { %s4997_s6 = sld [smem:[%s5537_s0 + %s4890_s1]]   ;;  %s4894_s28 = smov 17  }
  0x10   :  { %s5002_s12 = sld [smem:[%s5537_s0 + %s4891_s7]]   ;;  %s4895_s7 = smov 18  }
  0x11   :  { %s5007_s20 = sld [smem:[%s5537_s0 + %s4892_s15]]   ;;  %s4896_s15 = smov 19  }
  0x12   :  { %s5012_s27 = sld [smem:[%s5537_s0 + %s4893_s22]]   ;;  %s4897_s22 = smov 20  }
  0x13   :  { %s5017_s4 = sld [smem:[%s5537_s0 + %s4894_s28]]   ;;  %s4898_s28 = smov 21  }
  0x14   :  { %s4918_s1 = smov 41   ;;  %s4919_s10 = smov 42  }
  0x16   :  { %5555 = sst [smem:[#allocation5_spill]] %s5002_s12 }
  0x17   :  { %5556 = sst [smem:[#allocation6_spill]] %s5007_s20 }
  0x18   :  { %5557 = sst [smem:[#allocation7_spill]] %s5012_s27 }
  0x19   :  { %5558 = sst [smem:[#allocation8_spill]] %s5017_s4 }
  0x1a   :  { %s5022_s12 = sld [smem:[%s5537_s0 + %s4895_s7]]   ;;  %s4899_s7 = smov 22  }
  0x1b   :  { %s5027_s20 = sld [smem:[%s5537_s0 + %s4896_s15]]   ;;  %s4900_s15 = smov 23  }
  0x1c   :  { %s5032_s27 = sld [smem:[%s5537_s0 + %s4897_s22]]   ;;  %s4901_s22 = smov 24  }
  0x1d   :  { %s5037_s4 = sld [smem:[%s5537_s0 + %s4898_s28]]   ;;  %s4902_s28 = smov 25  }
  0x20   :  { %5559 = sst [smem:[#allocation9_spill]] %s5022_s12 }
  0x21   :  { %5560 = sst [smem:[#allocation10_spill]] %s5027_s20 }
  0x22   :  { %5561 = sst [smem:[#allocation11_spill]] %s5032_s27 }
  0x23   :  { %5562 = sst [smem:[#allocation12_spill]] %s5037_s4 }
  0x24   :  { %s5042_s12 = sld [smem:[%s5537_s0 + %s4899_s7]]   ;;  %s4903_s7 = smov 26  }
  0x25   :  { %s5047_s20 = sld [smem:[%s5537_s0 + %s4900_s15]]   ;;  %s4904_s15 = smov 27  }
  0x26   :  { %s5052_s27 = sld [smem:[%s5537_s0 + %s4901_s22]]   ;;  %s4905_s22 = smov 28  }
  0x27   :  { %s5057_s4 = sld [smem:[%s5537_s0 + %s4902_s28]]   ;;  %s4906_s28 = smov 29  }
  0x2a   :  { %5563 = sst [smem:[#allocation13_spill]] %s5042_s12 }
  0x2b   :  { %5564 = sst [smem:[#allocation14_spill]] %s5047_s20 }
  0x2c   :  { %5565 = sst [smem:[#allocation15_spill]] %s5052_s27 }
  0x2d   :  { %5566 = sst [smem:[#allocation16_spill]] %s5057_s4 }
  0x2e   :  { %s5062_s12 = sld [smem:[%s5537_s0 + %s4903_s7]]   ;;  %s4907_s7 = smov 30  }
  0x2f   :  { %s5067_s20 = sld [smem:[%s5537_s0 + %s4904_s15]]   ;;  %s4908_s15 = smov 31  }
  0x30   :  { %s5072_s27 = sld [smem:[%s5537_s0 + %s4905_s22]]   ;;  %s4909_s22 = smov 32  }
  0x31   :  { %s5077_s4 = sld [smem:[%s5537_s0 + %s4906_s28]]   ;;  %s4910_s28 = smov 33  }
  0x34   :  { %5567 = sst [smem:[#allocation17_spill]] %s5062_s12 }
  0x35   :  { %5568 = sst [smem:[#allocation18_spill]] %s5067_s20 }
  0x36   :  { %5569 = sst [smem:[#allocation19_spill]] %s5072_s27 }
  0x37   :  { %5570 = sst [smem:[#allocation20_spill]] %s5077_s4 }
  0x38   :  { %s5082_s12 = sld [smem:[%s5537_s0 + %s4907_s7]]   ;;  %s4911_s7 = smov 34  }
  0x39   :  { %s5087_s20 = sld [smem:[%s5537_s0 + %s4908_s15]]   ;;  %s4912_s15 = smov 35  }
  0x3a   :  { %s5092_s27 = sld [smem:[%s5537_s0 + %s4909_s22]]   ;;  %s4913_s22 = smov 36  }
  0x3b   :  { %s5097_s4 = sld [smem:[%s5537_s0 + %s4910_s28]]   ;;  %s4914_s28 = smov 37  }
  0x3e   :  { %5571 = sst [smem:[#allocation21_spill]] %s5082_s12 }
  0x3f   :  { %5572 = sst [smem:[#allocation22_spill]] %s5087_s20 }
  0x40   :  { %5573 = sst [smem:[#allocation23_spill]] %s5092_s27 }
  0x41   :  { %5574 = sst [smem:[#allocation24_spill]] %s5097_s4 }
  0x42   :  { %s5102_s12 = sld [smem:[%s5537_s0 + %s4911_s7]]   ;;  %s4915_s7 = smov 38  }
  0x43   :  { %s5107_s20 = sld [smem:[%s5537_s0 + %s4912_s15]]   ;;  %s4916_s15 = smov 39  }
  0x44   :  { %s5112_s27 = sld [smem:[%s5537_s0 + %s4913_s22]]   ;;  %s4917_s22 = smov 40  }
  0x45   :  { %s5117_s4 = sld [smem:[%s5537_s0 + %s4914_s28]]  }
  0x48   :  { %5575 = sst [smem:[#allocation25_spill]] %s5102_s12 }
  0x49   :  { %5576 = sst [smem:[#allocation26_spill]] %s5107_s20 }
  0x4a   :  { %5577 = sst [smem:[#allocation27_spill]] %s5112_s27 }
  0x4b   :  { %5578 = sst [smem:[#allocation28_spill]] %s5117_s4 }
  0x4c   :  { %s5122_s12 = sld [smem:[%s5537_s0 + %s4915_s7]]  }
  0x4d   :  { %s5127_s20 = sld [smem:[%s5537_s0 + %s4916_s15]]   ;;  %s5142_s15 = smov 0  }
  0x4e   :  { %s4088_s27 = sld [smem:[%s5537_s0 + %s4917_s22]]  }
  0x4f   :  { %s5135_s4 = sld [smem:[%s5537_s0 + %s4918_s1]]  }
  0x52   :  { %5579 = sst [smem:[#allocation29_spill]] %s5122_s12 }
  0x53   :  { %s5140_s12 = sld [smem:[%s5537_s0 + %s4919_s10]]  }
  0x54   :  { %v91_v0 = vstv %s4088_s27 }
  0x55   :  { %92 = vst [vmem:[#allocation3] sm:$0x1] %v91_v0 }
  0x56 LB: > { %s5580_s3 = sld [smem:[#allocation4_spill]]  ;;  %s4091_s16 = sadd.s32 4294967295, %s4876_s15   ;;  %s4876_s15 = sphi %s5142_s15, %s98_s15  }
  0x57   : > { %p4095_p0 = scmp.ge.s32.totalorder %s4876_s15, 1  ;;  %p1160_p1 = scmp.lt.s32.totalorder %s4876_s15, 3 }
  0x59   : > { %p1161_p2 = pnand %p4095_p0, %p1160_p1 }
  0x5a   : > { %v1399_v1 = vld [vmem:[%s4937_s9] sm:$0xff] (!%p1161_p2)  ;;  %v1400_v2 = vld [vmem:[%s4937_s9 + $0x8] sm:$0xff] (!%p1161_p2)  ;;  %v1401_v3 = vld [vmem:[%s4937_s9 + $0x10] sm:$0xff] (!%p1161_p2)  ;;  %p1264_p3 = scmp.lt.s32.totalorder (!%p1161_p2), %s4091_s16, 1  ;;  %v4920_v4 = vmov (!%p1161_p2), 0.0|0.0   ;;  %vm1432_vm0 = vcmask (!%p1161_p2), 523264  }
  0x5b   : > { %1164 = sbr.rel (%p1161_p2) target bundleno = 6963 (0x1b33), region = 184  ;;  %4600 = vmatprep.subr.bf16.mxu0 (!%p1161_p2), %v4920_v4  ;;  %v4601_v5 = vpack.c.bf16 (!%p1161_p2), %v1400_v2, %v1399_v1  ;;  %v1402_v6 = vld [vmem:[%s4937_s9 + $0x18] sm:$0xff] (!%p1161_p2)  ;;  %4642 = vmatprep.subr.bf16.mxu1 (!%p1161_p2), %v4920_v4  ;;  %v1403_v8 = vld [vmem:[%s4937_s9 + $0x20] sm:$0xff] (!%p1161_p2)  ;;  %v1404_v9 = vld [vmem:[%s4937_s9 + $0x28] sm:$0xff] (!%p1161_p2)  ;;  %vm1508_vm1 = vcmask (!%p1161_p2), 253952   ;;  %vm1514_vm2 = vcmask (!%p1161_p2), 257024  }
  0x5c   : > { %v4604_v7 = vpack.c.bf16 (!%p1161_p2), %v1402_v6, %v1401_v3  ;;  %v4607_v10 = vpack.c.bf16 (!%p1161_p2), %v1404_v9, %v1403_v8  ;;  %v1405_v11 = vld [vmem:[%s4937_s9 + $0x30] sm:$0xff] (!%p1161_p2)  ;;  %v1406_v12 = vld [vmem:[%s4937_s9 + $0x38] sm:$0xff] (!%p1161_p2)  ;;  %v1407_v16 = vld [vmem:[%s4937_s9 + $0x40] sm:$0xff] (!%p1161_p2)  ;;  %vm1517_vm3 = vcmask (!%p1161_p2), 258048   ;;  %vm4921_vm4 = vmmov (!%p1161_p2), 0   ;;  %s5581_s18 = sld [smem:[#allocation5_spill]] (!%p1161_p2) }
  0x5d   : > { %4602 = vmatpush1.bf16.msra.mxu0 (!%p1161_p2), %v4601_v5  ;;  %v4610_v15 = vpack.c.bf16 (!%p1161_p2), %v1406_v12, %v1405_v11  ;;  %v1408_v17 = vld [vmem:[%s4937_s9 + $0x48] sm:$0xff] (!%p1161_p2)  ;;  %v1409_v19 = vld [vmem:[%s4937_s9 + $0x50] sm:$0xff] (!%p1161_p2)  ;;  %v1410_v20 = vld [vmem:[%s4937_s9 + $0x58] sm:$0xff] (!%p1161_p2)  ;;  %v4922_v5 = vmov (!%p1161_p2), 0.0   ;;  %vm1552_vm5 = vcmask (!%p1161_p2), 261120   ;;  %vm1778_vm6 = vcmask (!%p1161_p2), 130048  }
  0x5e   : > { %4603 = vmatprep.subr.bf16.mxu0 (!%p1161_p2), %v4920_v4  ;;  %v4613_v18 = vpack.c.bf16 (!%p1161_p2), %v1408_v17, %v1407_v16  ;;  %v4616_v21 = vpack.c.bf16 (!%p1161_p2), %v1410_v20, %v1409_v19  ;;  %v1411_v22 = vld [vmem:[%s4937_s9 + $0x60] sm:$0xff] (!%p1161_p2)  ;;  %v1412_v23 = vld [vmem:[%s4937_s9 + $0x68] sm:$0xff] (!%p1161_p2)  ;;  %v1413_v25 = vld [vmem:[%s4937_s9 + $0x70] sm:$0xff] (!%p1161_p2)  ;;  %4322 = vmatprep.mubr.msk.f32.mxu1 (!%p1161_p2), %vm4921_vm4, %v4922_v5  ;;  %vm1872_vm7 = vcmask (!%p1161_p2), 1044480   ;;  %vm1856_vm8 = vcmask (!%p1161_p2), 36864   ;;  %s5582_s22 = sld [smem:[#allocation8_spill]] (!%p1161_p2) }
  0x5f   : > { %v4619_v24 = vpack.c.bf16 (!%p1161_p2), %v1412_v23, %v1411_v22  ;;  %v1414_v26 = vld [vmem:[%s4937_s9 + $0x78] sm:$0xff] (!%p1161_p2)  ;;  %v1415_v28 = vld [vmem:[%s4937_s9 + $0x80] sm:$0xff] (!%p1161_p2)  ;;  %v1416_v29 = vld [vmem:[%s4937_s9 + $0x88] sm:$0xff] (!%p1161_p2)  ;;  %vm1868_vm9 = vcmask (!%p1161_p2), 39936   ;;  %s5583_s23 = sld [smem:[#allocation10_spill]] (!%p1161_p2)  ;;  %s5584_s26 = sld [smem:[#allocation6_spill]] (!%p1161_p2) }
  0x60   : > { %v4622_v27 = vpack.c.bf16 (!%p1161_p2), %v1414_v26, %v1413_v25  ;;  %v4625_v30 = vpack.c.bf16 (!%p1161_p2), %v1416_v29, %v1415_v28  ;;  %v1417_v31 = vld [vmem:[%s4937_s9 + $0x90] sm:$0xff] (!%p1161_p2)  ;;  %v1418_v32 = vld [vmem:[%s4937_s9 + $0x98] sm:$0xff] (!%p1161_p2)  ;;  %v1419_v34 = vld [vmem:[%s4937_s9 + $0xa0] sm:$0xff] (!%p1161_p2)  ;;  %s5585_s1 = sld [smem:[#allocation7_spill]] (!%p1161_p2)  ;;  %s5586_s28 = sld [smem:[#allocation9_spill]] (!%p1161_p2)  ;;  %vm3969_vm10 = vcmask (!%p1161_p2), 32768  }
  0x61   : > { %4605 = vmatpush1.bf16.msra.mxu0 (!%p1161_p2), %v4604_v7  ;;  %v4628_v33 = vpack.c.bf16 (!%p1161_p2), %v1418_v32, %v1417_v31  ;;  %v1420_v35 = vld [vmem:[%s4937_s9 + $0xa8] sm:$0xff] (!%p1161_p2)  ;;  %v1421_v37 = vld [vmem:[%s4937_s9 + $0xb0] sm:$0xff] (!%p1161_p2)  ;;  %v1422_v38 = vld [vmem:[%s4937_s9 + $0xb8] sm:$0xff] (!%p1161_p2)  ;;  %s5587_s2 = sld [smem:[#allocation11_spill]] (!%p1161_p2)  ;;  %s5588_s10 = sld [smem:[#allocation14_spill]] (!%p1161_p2) }
  0x62   : > { %s5608_s16 = smov (!%p1264_p3, %s4091_s16), 1  ;;  %4606 = vmatprep.subr.bf16.mxu0 %v4920_v4  ;;  %v4631_v36 = vpack.c.bf16 %v1420_v35, %v1419_v34  ;;  %v4634_v39 = vpack.c.bf16 %v1422_v38, %v1421_v37  ;;  %v1505_v40 = vld [vmem:[%s4952_s21] sm:$0x1f]  ;;  %v1279_v57 = vld [vmem:[%s5580_s3 + $0x8] sm:$0xff]  ;;  %v1280_v62 = vld [vmem:[%s5580_s3 + $0x10] sm:$0xff]  ;;  %s5589_s7 = sld [smem:[#allocation12_spill]] }
  0x63   : > { %s5549_s0 = sshll.u32 %s5608_s16, 3  ;;  %v1506_v41 = vld [vmem:[%s4947_s17] sm:$0x1]  ;;  %v1511_v44 = vrot.slane %v1505_v40, 1  ;;  %v1287_v60 = vld [vmem:[%s4972_s8 + $0x8] sm:$0xff]  ;;  %v1281_v63 = vld [vmem:[%s5580_s3 + $0x18] sm:$0xff] }
  0x64   : > { %s1268_s27 = scalar_lea.vmem %s4932_s5, %s5549_s0  ;;  %v1507_v42 = vadd.f32 %v1506_v41, %v1505_v40  ;;  %v4099_v43 = vld [vmem:[%s4942_s13] ss:$0 sm:$0xff]  ;;  %v1288_v0 = vld [vmem:[%s4972_s8 + $0x10] sm:$0xff]  ;;  %v4640_v1 = vpack.c.bf16 %v1281_v63, %v1280_v62  ;;  %v1289_v2 = vld [vmem:[%s4972_s8 + $0x18] sm:$0xff]  ;;  %s5590_s11 = sld [smem:[#allocation15_spill]] }
  0x65   : > { %v1398_v13 = vld [vmem:[%s1268_s27] sm:$0xff]  ;;  %4608 = vmatpush1.bf16.msra.mxu0 %v4607_v10  ;;  %v4646_v3 = vpack.c.bf16 %v1289_v2, %v1288_v0  ;;  %v1296_v20 = vld [vmem:[%s4977_s14 + $0x10] sm:$0xff]  ;;  %v1297_v22 = vld [vmem:[%s4977_s14 + $0x18] sm:$0xff]  ;;  %s5591_s27 = sld [smem:[#allocation13_spill]]  ;;  %s5599_s0 = sld [smem:[#allocation26_spill]] }
  0x66   : > { %v1431_v14 = vcombine.high %v1398_v13, %v1398_v13  ;;  %4609 = vmatprep.subr.bf16.mxu0 %v4920_v4  ;;  %1509 = vst.msk [vmem:[#allocation2] sm:$0x1] %vm1508_vm1, %v1507_v42  ;;  %v1278_v56 = vld [vmem:[%s5580_s3] sm:$0xff]  ;;  %v1300_v23 = vld [vmem:[%s4977_s14 + $0x30] sm:$0xff]  ;;  %v4652_v25 = vpack.c.bf16 %v1297_v22, %v1296_v20  ;;  %v1293_v0 = vld [vmem:[%s4972_s8 + $0x38] sm:$0xff] }
  0x67   : > { %v1286_v58 = vld [vmem:[%s4972_s8] sm:$0xff]  ;;  %v4637_v59 = vpack.c.bf16 %v1279_v57, %v1278_v56  ;;  %v1284_v57 = vld [vmem:[%s5580_s3 + $0x30] sm:$0xff] }
  0x68   : > { %4100 = vmatprep.mubr.msk.f32.mxu0 %vm1432_vm0, %v1431_v14  ;;  %v4643_v61 = vpack.c.bf16 %v1287_v60, %v1286_v58  ;;  %v4101_v10 = vld [vmem:[%s4957_s25] ss:$0 sm:$0xff]  ;;  %v1285_v58 = vld [vmem:[%s5580_s3 + $0x38] sm:$0xff]  ;;  %v1292_v63 = vld [vmem:[%s4972_s8 + $0x30] sm:$0xff] }
  0x69   : > { %4611 = vmatpush1.bf16.msra.mxu0 %v4610_v15  ;;  %v1294_v11 = vld [vmem:[%s4977_s14] sm:$0xff]  ;;  %v1299_v15 = vld [vmem:[%s4977_s14 + $0x28] sm:$0xff] }
  0x6a   : > { %4612 = vmatprep.subr.bf16.mxu0 %v4920_v4  ;;  %4644 = vmatpush3.bf16.msra.mxu1 %v4643_v61  ;;  %v1298_v14 = vld [vmem:[%s4977_s14 + $0x20] sm:$0xff]  ;;  %v1291_v61 = vld [vmem:[%s4972_s8 + $0x28] sm:$0xff] }
  0x6b   : > { %4645 = vmatprep.subr.bf16.mxu1 %v4920_v4  ;;  %v4102_v16 = vld [vmem:[%s4962_s29] ss:$0 sm:$0xff]  ;;  %v4667_v19 = vpack.c.bf16 %v1299_v15, %v1298_v14 }
  0x6c   : > { %v4107_v35 = vld [vmem:[%s4992_s30] ss:$0 sm:$0xff] }
  0x6d   : > { %4614 = vmatpush1.bf16.msra.mxu0 %v4613_v18  ;;  %v1290_v60 = vld [vmem:[%s4972_s8 + $0x20] sm:$0xff] }
  0x6e   : > { %4615 = vmatprep.subr.bf16.mxu0 %v4920_v4  ;;  %4647 = vmatpush3.bf16.msra.mxu1 %v4646_v3  ;;  %v4661_v62 = vpack.c.bf16 %v1291_v61, %v1290_v60 }
  0x6f   : > { %4648 = vmatprep.subr.bf16.mxu1 %v4920_v4 }
  0x71   : > { %4617 = vmatpush1.bf16.msra.mxu0 %v4616_v21 }
  0x72   : > { %4618 = vmatprep.subr.bf16.mxu0 %v4920_v4 }
  0x75   : > { %4620 = vmatpush1.bf16.msra.mxu0 %v4619_v24  ;;  %v1301_v24 = vld [vmem:[%s4977_s14 + $0x38] sm:$0xff] }
  0x76   : > { %4621 = vmatprep.subr.bf16.mxu0 %v4920_v4  ;;  %v4670_v26 = vpack.c.bf16 %v1301_v24, %v1300_v23 }
  0x79   : > { %4623 = vmatpush1.bf16.msra.mxu0 %v4622_v27  ;;  %v4105_v27 = vld [vmem:[%s4987_s24] ss:$0 sm:$0xff] }
  0x7a   : > { %4624 = vmatprep.subr.bf16.mxu0 %v4920_v4 }
  0x7d   : > { %4626 = vmatpush1.bf16.msra.mxu0 %v4625_v30  ;;  %v4103_v30 = vld [vmem:[%s4982_s19] ss:$0 sm:$0xff] }
  0x7e   : > { %4627 = vmatprep.subr.bf16.mxu0 %v4920_v4 }
  0x81   : > { %4629 = vmatpush1.bf16.msra.mxu0 %v4628_v33 }
  0x82   : > { %4630 = vmatprep.subr.bf16.mxu0 %v4920_v4 }
  0x85   : > { %4632 = vmatpush1.bf16.msra.mxu0 %v4631_v36 }
  0x86   : > { %4633 = vmatprep.subr.bf16.mxu0 %v4920_v4 }
  0x89   : > { %4635 = vmatpush1.bf16.msra.mxu0 %v4634_v39 }
  0x8a   : > { %4636 = vmatprep.subr.bf16.mxu0 %v4920_v4 }
  0x8c   : > { %1500 = vmatmul.mubr.f32.vlgmr.msra.gmra.mrb[0].mxu0 %v1398_v13  ;;  %v1295_v13 = vld [vmem:[%s4977_s14 + $0x8] sm:$0xff] }
  0x8d   : > { %4638 = vmatpush3.bf16.msra.mxu0 %v4637_v59  ;;  %4311 = vmatprep.mubr.msk.f32.mxu0 %vm4921_vm4, %v4922_v5  ;;  %v4649_v18 = vpack.c.bf16 %v1295_v13, %v1294_v11  ;;  %v4658_v59 = vpack.c.bf16 %v1285_v58, %v1284_v57  ;;  %v4117_v13 = vld [vmem:[%s4992_s30 + $0x1] ss:$0 sm:$0xff]  ;;  %v1321_v57 = vld [vmem:[%s5583_s23 + $0x8] sm:$0xff] }
  0x8e   : > { %4639 = vmatprep.subr.bf16.mxu0 %v4920_v4 }
  0x91   : > { %4641 = vmatpush3.bf16.msra.mxu0 %v4640_v1  ;;  %v4664_v1 = vpack.c.bf16 %v1293_v0, %v1292_v63  ;;  %v4126_v63 = vld [vmem:[%s5584_s26] ss:$0 sm:$0xff]  ;;  %s5593_s26 = sld [smem:[#allocation18_spill]] }
  0x92   : > { %4666 = vmatprep.subr.bf16.mxu0 %v4920_v4 }
 0x15f   : > { %v1501_v45 = vpop.f32.mrb[0].mxu0 }
 0x160   : > { %v1502_v46 = vadd.f32 %v4099_v43, %v1501_v45  ;;  %v1503_v47 = vpop.f32.mrb[1].mxu0 }
 0x162   : > { %v1513_v48 = vadd.f32 %v1511_v44, %v1502_v46 }
 0x164   : > { %1515 = vst.msk [vmem:[#allocation2 + $0x1] sm:$0xf] %vm1514_vm2, %v1513_v48 }
 0x16b   : > { %v5197_v49 = vld [vmem:[#allocation2] sm:$0x1f] }
 0x16c   : > { %v1518_v50 = vsel %vm1517_vm3, %v5197_v49, 0.0 }
 0x16d   : > { %1519 = vadd.xlane.f32.xlu0 %v1518_v50 }
 0x1fa   : > { %v1520_v51 = vpop.xlane.xlu0 %1519 }
 0x1fb   : > { %v1522_v52 = vmul.f32 0.03125, %v1520_v51 }
 0x1fd   : > { %v1523_v53 = vsub.f32 %v5197_v49, %v1522_v52  ;;  %v1282_v52 = vld [vmem:[%s5580_s3 + $0x20] sm:$0xff] }
 0x1ff   : > { %v1524_v54 = vmul.f32 %v1523_v53, %v1523_v53 }
 0x201   : > { %v1525_v55 = vsel %vm1517_vm3, %v1524_v54, 0.0 }
 0x202   : > { %1526 = vadd.xlane.f32.xlu0 %v1525_v55 }
 0x28f   : > { %v1527_v6 = vpop.xlane.xlu0 %1526 }
 0x290   : > { %v1528_v7 = vmul.f32 0.03125, %v1527_v6 }
 0x292   : > { %v1529_v8 = vadd.f32 1e-06, %v1528_v7 }
 0x294   : > { %4836 = vrsqrt.f32 %v1529_v8  ;;  %v4115_v8 = vld [vmem:[%s4987_s24 + $0x1] ss:$0 sm:$0xff] }
 0x29e   : > { %v4837_v9 = vpop.eup %4836 }
 0x29f   : > { %v1531_v12 = vmul.f32 %v4837_v9, %v1523_v53  ;;  %v1283_v53 = vld [vmem:[%s5580_s3 + $0x28] sm:$0xff]  ;;  %s5606_s3 = sld [smem:[#allocation29_spill]] }
 0x2a0   : > { %v4655_v55 = vpack.c.bf16 %v1283_v53, %v1282_v52  ;;  %v1316_v52 = vld [vmem:[%s5582_s22 + $0x8] sm:$0xff]  ;;  %v1317_v53 = vld [vmem:[%s5582_s22 + $0x10] sm:$0xff] }
 0x2a1   : > { %v1538_v17 = vmul.f32 %v4101_v10, %v1531_v12  ;;  %v4113_v10 = vld [vmem:[%s4982_s19 + $0x1] ss:$0 sm:$0xff] }
 0x2a3   : > { %v5226_v21 = vadd.f32 %v4102_v16, %v1538_v17 }
 0x2a5   : > { %4312 = vmatmul.mubr.msk.f32.vlgmr.msra.gmra.mrb[2].mxu0 %vm1552_vm5, %v5226_v21  ;;  %4323 = vmatmul.mubr.msk.f32.vlgmr.msra.gmra.mrb[0].mxu1 %vm1552_vm5, %v5226_v21 }
 0x2a6   : > { %4650 = vmatpush3.bf16.msra.mxu1 %v4649_v18  ;;  %4668 = vmatpush3.bf16.msra.mxu0 %v4667_v19 }
 0x2a7   : > { %4651 = vmatprep.subr.bf16.mxu1 %v4920_v4  ;;  %4669 = vmatprep.subr.bf16.mxu0 %v4920_v4 }
 0x2a8   : > { %4333 = vmatprep.mubr.msk.f32.mxu1 %vm4921_vm4, %v4922_v5  ;;  %4376 = vmatprep.mubr.msk.f32.mxu0 %vm4921_vm4, %v4922_v5 }
 0x2aa   : > { %4653 = vmatpush3.bf16.msra.mxu1 %v4652_v25  ;;  %4671 = vmatpush3.bf16.msra.mxu0 %v4670_v26  ;;  %v1310_v25 = vld [vmem:[%s4997_s6 + $0x10] sm:$0xff]  ;;  %v1311_v26 = vld [vmem:[%s4997_s6 + $0x18] sm:$0xff] }
 0x2ab   : > { %4336 = vmatprep.subr.mxu1 %v4922_v5  ;;  %4672 = vmatprep.subr.bf16.mxu0 %v4920_v4 }
 0x2ad   : > { %4334 = vmatmul.mubr.msk.f32.vlgmr.msra.gmra.mrb[2].mxu1 %vm1552_vm5, %v5226_v21  ;;  %4377 = vmatmul.mubr.msk.f32.vlgmr.msra.gmra.mrb[4].mxu0 %vm1552_vm5, %v5226_v21 }
 0x2ae   : > { %4338 = vmatprep.mubr.msk.f32.mxu1 %vm4921_vm4, %v4922_v5  ;;  %4393 = vmatprep.mubr.msk.f32.mxu0 %vm4921_vm4, %v4922_v5 }
 0x378   : > { %v1622_v28 = vpop.f32.mrb[2].mxu0  ;;  %v1698_v29 = vpop.f32.mrb[0].mxu1 }
 0x379   : > { %v1699_v31 = vadd.f32 %v4105_v27, %v1698_v29  ;;  %v4313_v32 = vpop.f32.mrb[3].mxu0  ;;  %v4324_v33 = vpop.f32.mrb[1].mxu1  ;;  %v1623_v34 = vadd.f32 %v4103_v30, %v1622_v28  ;;  %v4673_v27 = vpack.c.bf16 %v1311_v26, %v1310_v25  ;;  %v1308_v29 = vld [vmem:[%s4997_s6] sm:$0xff]  ;;  %v1309_v30 = vld [vmem:[%s4997_s6 + $0x8] sm:$0xff]  ;;  %v1335_v25 = vld [vmem:[%s5583_s23 + $0x78] sm:$0xff] }
 0x37a   : > { %v4676_v32 = vpack.c.bf16 %v1309_v30, %v1308_v29 }
 0x37b   : > { %4337 = vmatpush3.xpose.msk.msra.mxu1 %vm1778_vm6, %v1699_v31  ;;  %4674 = vmatpush3.bf16.msra.mxu0 %v4673_v27  ;;  %v4128_v27 = vld [vmem:[%s5586_s28] ss:$0 sm:$0xff]  ;;  %s5595_s28 = sld [smem:[#allocation19_spill]] }
 0x37c   : > { %4341 = vmatprep.subr.mxu1 %v4922_v5  ;;  %4678 = vmatprep.subr.bf16.mxu0 %v4920_v4 }
 0x37e   : > { %4339 = vmatmul.mubr.msk.f32.vlgmr.msra.gmra.mrb[4].mxu1 %vm1778_vm6, %v1623_v34 }
 0x37f   : > { %4343 = vmatprep.mubr.msk.f32.mxu1 %vm4921_vm4, %v4922_v5 }
 0x380   : > { %v1774_v36 = vpop.f32.mrb[2].mxu1  ;;  %v5259_v37 = vpop.f32.mrb[4].mxu0 }
 0x381   : > { %v1775_v38 = vadd.f32 %v4107_v35, %v1774_v36  ;;  %v4335_v39 = vpop.f32.mrb[3].mxu1  ;;  %v4378_v40 = vpop.f32.mrb[5].mxu0  ;;  %v2171_v15 = vadd.f32 %v4117_v13, %v5259_v37  ;;  %v1327_v13 = vld [vmem:[%s5583_s23 + $0x38] sm:$0xff] }
 0x383   : > { %4342 = vmatpush3.msk.msra.mxu1 %vm1872_vm7, %v1775_v38 }
 0x384   : > { %4654 = vmatprep.subr.bf16.mxu1 %v4920_v4 }
 0x451   : > { %v1851_v41 = vpop.f32.mrb[4].mxu1 }
 0x452   : > { %v1855_v42 = vmul.f32 0.25, %v1851_v41  ;;  %v4340_v43 = vpop.f32.mrb[5].mxu1  ;;  %v4125_v41 = vld [vmem:[%s5581_s18] ss:$0 sm:$0xff]  ;;  %s5592_s18 = sld [smem:[#allocation16_spill]] }
 0x454   : > { %v1857_v44 = vsel %vm1856_vm8, %v1855_v42, -inf }
 0x455   : > { %1858 = vmax.xlane.f32.xlu1 %v1857_v44 }
 0x4e2   : > { %v1859_v45 = vpop.xlane.xlu1 %1858 }
 0x4e3   : > { %v1860_v46 = vsub.f32 %v1855_v42, %v1859_v45 }
 0x4e5   : > { %v1861_v47 = vmul.f32 1.442695, %v1860_v46 }
 0x4e7   : > { %4838 = vpow2.f32 %v1861_v47 }
 0x4f1   : > { %v4839_v48 = vpop.eup %4838 }
 0x4f2   : > { %v1863_v50 = vsel %vm1856_vm8, %v4839_v48, 0.0 }
 0x4f3   : > { %1864 = vadd.xlane.f32.xlu1 %v1863_v50 }
 0x580   : > { %v1865_v51 = vpop.xlane.xlu1 %1864 }
 0x581   : > { %4840 = vrcp.f32 %v1865_v51  ;;  %v1315_v51 = vld [vmem:[%s5582_s22] sm:$0xff] }
 0x58b   : > { %v4841_v54 = vpop.eup %4840 }
 0x58c   : > { %v1867_v56 = vmul.f32 %v4841_v54, %v4839_v48  ;;  %v1318_v54 = vld [vmem:[%s5582_s22 + $0x18] sm:$0xff] }
 0x58e   : > { %4344 = vmatmul.mubr.msk.f32.vlgmr.msra.gmra.mrb[6].mxu1 %vm1868_vm9, %v1867_v56  ;;  %v1320_v56 = vld [vmem:[%s5583_s23] sm:$0xff] }
 0x58f   : > { %4656 = vmatpush3.bf16.msra.mxu1 %v4655_v55  ;;  %4354 = vmatprep.mubr.msk.f32.mxu1 %vm4921_vm4, %v4922_v5  ;;  %v4682_v55 = vpack.c.bf16 %v1318_v54, %v1317_v53  ;;  %v4685_v58 = vpack.c.bf16 %v1321_v57, %v1320_v56  ;;  %v1340_v53 = vld [vmem:[%s5588_s10 + $0x8] sm:$0xff] }
 0x590   : > { %4657 = vmatprep.subr.bf16.mxu1 %v4920_v4 }
 0x593   : > { %4659 = vmatpush3.bf16.msra.mxu1 %v4658_v59 }
 0x594   : > { %4660 = vmatprep.subr.bf16.mxu1 %v4920_v4 }
 0x596   : > { %4355 = vmatmul.mubr.msk.f32.vlgmr.msra.gmra.mrb[8].mxu1 %vm1552_vm5, %v5226_v21 }
 0x597   : > { %4662 = vmatpush3.bf16.msra.mxu1 %v4661_v62  ;;  %4365 = vmatprep.mubr.msk.f32.mxu1 %vm4921_vm4, %v4922_v5 }
 0x598   : > { %4663 = vmatprep.subr.bf16.mxu1 %v4920_v4 }
 0x59b   : > { %4665 = vmatpush3.bf16.msra.mxu1 %v4664_v1  ;;  %v4127_v1 = vld [vmem:[%s5585_s1] ss:$0 sm:$0xff]  ;;  %s5594_s1 = sld [smem:[#allocation17_spill]] }
 0x59c   : > { %4379 = vmatprep.subr.mxu1 %v4922_v5 }
 0x59e   : > { %4366 = vmatmul.mubr.msk.f32.vlgmr.msra.gmra.mrb[10].mxu1 %vm1552_vm5, %v5226_v21 }
 0x59f   : > { %4381 = vmatprep.mubr.msk.f32.mxu1 %vm4921_vm4, %v4922_v5 }
 0x661   : > { %v1942_v2 = vpop.f32.mrb[6].mxu1 }
 0x662   : > { %v4345_v3 = vpop.f32.mrb[7].mxu1 }
 0x669   : > { %v2018_v6 = vpop.f32.mrb[8].mxu1 }
 0x66a   : > { %v4356_v7 = vpop.f32.mrb[9].mxu1  ;;  %v2019_v14 = vadd.f32 %v4113_v10, %v2018_v6  ;;  %v1322_v6 = vld [vmem:[%s5583_s23 + $0x10] sm:$0xff]  ;;  %v1325_v10 = vld [vmem:[%s5583_s23 + $0x28] sm:$0xff] }
 0x66b   : > { %v1323_v7 = vld [vmem:[%s5583_s23 + $0x18] sm:$0xff] }
 0x671   : > { %v2094_v9 = vpop.f32.mrb[10].mxu1 }
 0x672   : > { %v2095_v11 = vadd.f32 %v4115_v8, %v2094_v9  ;;  %v4367_v12 = vpop.f32.mrb[11].mxu1  ;;  %v4688_v8 = vpack.c.bf16 %v1323_v7, %v1322_v6  ;;  %v1324_v9 = vld [vmem:[%s5583_s23 + $0x20] sm:$0xff]  ;;  %v1349_v7 = vld [vmem:[%s5590_s11 + $0x10] sm:$0xff] }
 0x673   : > { %v1326_v12 = vld [vmem:[%s5583_s23 + $0x30] sm:$0xff] }
 0x674   : > { %4380 = vmatpush3.xpose.msk.msra.mxu1 %vm1778_vm6, %v2095_v11  ;;  %v4691_v11 = vpack.c.bf16 %v1325_v10, %v1324_v9  ;;  %v1355_v10 = vld [vmem:[%s5592_s18] sm:$0xff] }
 0x675   : > { %4384 = vmatprep.subr.mxu1 %v4922_v5 }
 0x677   : > { %4382 = vmatmul.mubr.msk.f32.vlgmr.msra.gmra.mrb[12].mxu1 %vm1778_vm6, %v2019_v14  ;;  %v4694_v14 = vpack.c.bf16 %v1327_v13, %v1326_v12  ;;  %v1357_v13 = vld [vmem:[%s5592_s18 + $0x10] sm:$0xff] }
 0x678   : > { %4385 = vmatpush3.msk.msra.mxu1 %vm1872_vm7, %v2171_v15  ;;  %4386 = vmatprep.mubr.msk.f32.mxu1 %vm4921_vm4, %v4922_v5  ;;  %v1328_v15 = vld [vmem:[%s5583_s23 + $0x40] sm:$0xff] }
 0x679   : > { %4675 = vmatprep.subr.bf16.mxu1 %v4920_v4 }
 0x74a   : > { %v2246_v16 = vpop.f32.mrb[12].mxu1 }
 0x74b   : > { %v2250_v17 = vmul.f32 0.25, %v2246_v16  ;;  %v4383_v18 = vpop.f32.mrb[13].mxu1  ;;  %v1329_v16 = vld [vmem:[%s5583_s23 + $0x48] sm:$0xff] }
 0x74c   : > { %v1330_v18 = vld [vmem:[%s5583_s23 + $0x50] sm:$0xff] }
 0x74d   : > { %v2251_v19 = vsel %vm1856_vm8, %v2250_v17, -inf }
 0x74e   : > { %2252 = vmax.xlane.f32.xlu0 %v2251_v19  ;;  %v1331_v19 = vld [vmem:[%s5583_s23 + $0x58] sm:$0xff] }
 0x7db   : > { %v2253_v20 = vpop.xlane.xlu0 %2252 }
 0x7dc   : > { %v2254_v21 = vsub.f32 %v2250_v17, %v2253_v20  ;;  %v4697_v17 = vpack.c.bf16 %v1329_v16, %v1328_v15  ;;  %v4700_v20 = vpack.c.bf16 %v1331_v19, %v1330_v18  ;;  %v4135_v18 = vld [vmem:[%s5593_s26] ss:$0 sm:$0xff] }
 0x7de   : > { %v2255_v22 = vmul.f32 1.442695, %v2254_v21  ;;  %v1332_v21 = vld [vmem:[%s5583_s23 + $0x60] sm:$0xff] }
 0x7e0   : > { %4842 = vpow2.f32 %v2255_v22  ;;  %v1333_v22 = vld [vmem:[%s5583_s23 + $0x68] sm:$0xff] }
 0x7ea   : > { %v4843_v23 = vpop.eup %4842 }
 0x7eb   : > { %v2257_v24 = vsel %vm1856_vm8, %v4843_v23, 0.0 }
 0x7ec   : > { %2258 = vadd.xlane.f32.xlu1 %v2257_v24  ;;  %v1334_v24 = vld [vmem:[%s5583_s23 + $0x70] sm:$0xff] }
 0x7ed   : > { %v4706_v26 = vpack.c.bf16 %v1335_v25, %v1334_v24 }
 0x879   : > { %v2259_v28 = vpop.xlane.xlu1 %2258 }
 0x87a   : > { %4844 = vrcp.f32 %v2259_v28 }
 0x884   : > { %v4845_v31 = vpop.eup %4844 }
 0x885   : > { %v2261_v33 = vmul.f32 %v4845_v31, %v4843_v23  ;;  %v4703_v23 = vpack.c.bf16 %v1333_v22, %v1332_v21  ;;  %v1344_v21 = vld [vmem:[%s5588_s10 + $0x28] sm:$0xff]  ;;  %v4133_v22 = vld [vmem:[%s5594_s1] ss:$0 sm:$0xff] }
 0x887   : > { %4387 = vmatmul.mubr.msk.f32.vlgmr.msra.gmra.mrb[14].mxu1 %vm1868_vm9, %v2261_v33 }
 0x888   : > { %4677 = vmatpush3.bf16.msra.mxu1 %v4676_v32  ;;  %4400 = vmatprep.mubr.msk.f32.mxu1 %vm4921_vm4, %v4922_v5 }
 0x889   : > { %4684 = vmatprep.subr.bf16.mxu1 %v4920_v4 }
 0x88b   : > { %4401 = vmatmul.mubr.msk.f32.vlgmr.msra.gmra.mrb[16].mxu1 %vm1778_vm6, %v1942_v2 }
 0x88c   : > { %4446 = vmatprep.mubr.msk.f32.mxu1 %vm4921_vm4, %v4922_v5  ;;  %4686 = vmatpush3.bf16.msra.mxu1 %v4685_v58 }
 0x88d   : > { %4687 = vmatprep.subr.bf16.mxu1 %v4920_v4 }
 0x890   : > { %4689 = vmatpush3.bf16.msra.mxu1 %v4688_v8  ;;  %v1350_v8 = vld [vmem:[%s5590_s11 + $0x18] sm:$0xff] }
 0x891   : > { %4690 = vmatprep.subr.bf16.mxu1 %v4920_v4  ;;  %v4718_v9 = vpack.c.bf16 %v1350_v8, %v1349_v7 }
 0x894   : > { %4692 = vmatpush3.bf16.msra.mxu1 %v4691_v11  ;;  %v1356_v11 = vld [vmem:[%s5592_s18 + $0x8] sm:$0xff] }
 0x895   : > { %4693 = vmatprep.subr.bf16.mxu1 %v4920_v4  ;;  %v4721_v12 = vpack.c.bf16 %v1356_v11, %v1355_v10 }
 0x898   : > { %4695 = vmatpush3.bf16.msra.mxu1 %v4694_v14  ;;  %v1358_v14 = vld [vmem:[%s5592_s18 + $0x18] sm:$0xff] }
 0x899   : > { %4696 = vmatprep.subr.bf16.mxu1 %v4920_v4  ;;  %v4724_v15 = vpack.c.bf16 %v1358_v14, %v1357_v13 }
 0x89c   : > { %4698 = vmatpush3.bf16.msra.mxu1 %v4697_v17 }
 0x89d   : > { %4699 = vmatprep.subr.bf16.mxu1 %v4920_v4 }
 0x8a0   : > { %4701 = vmatpush3.bf16.msra.mxu1 %v4700_v20  ;;  %v1343_v20 = vld [vmem:[%s5588_s10 + $0x20] sm:$0xff] }
 0x8a1   : > { %4702 = vmatprep.subr.bf16.mxu1 %v4920_v4  ;;  %v4727_v25 = vpack.c.bf16 %v1344_v21, %v1343_v20 }
 0x8a4   : > { %4704 = vmatpush3.bf16.msra.mxu1 %v4703_v23 }
 0x8a5   : > { %4705 = vmatprep.subr.bf16.mxu1 %v4920_v4 }
 0x8a8   : > { %4707 = vmatpush3.bf16.msra.mxu1 %v4706_v26 }
 0x8a9   : > { %4487 = vmatprep.subr.mxu1 %v4922_v5 }
 0x95a   : > { %v2334_v34 = vpop.f32.mrb[14].mxu1 }
 0x95b   : > { %v4388_v35 = vpop.f32.mrb[15].mxu1  ;;  %4394 = vmatmul.mubr.msk.f32.vlgmr.msra.gmra.mrb[6].mxu0 %vm1778_vm6, %v2334_v34 }
 0x95c   : > { %4411 = vmatprep.mubr.msk.f32.mxu0 %vm4921_vm4, %v4922_v5 }
 0x95e   : > { %v2480_v36 = vpop.f32.mrb[16].mxu1 }
 0x95f   : > { %v4402_v37 = vpop.f32.mrb[17].mxu1 }
 0xa2e   : > { %v2407_v38 = vpop.f32.mrb[6].mxu0 }
 0xa2f   : > { %v2481_v39 = vadd.f32 %v2480_v36, %v2407_v38  ;;  %v4395_v40 = vpop.f32.mrb[7].mxu0 }
 0xa30   : > { %v4130_v40 = vld [vmem:[%s5587_s2] ss:$0 sm:$0xff]  ;;  %s5596_s2 = sld [smem:[#allocation20_spill]] }
 0xa31   : > { %v2484_v42 = vadd.f32 %v2481_v39, %v5197_v49  ;;  %v4679_v49 = vpack.c.bf16 %v1316_v52, %v1315_v51 }
 0xa33   : > { %v5318_v43 = vadd.f32 %v4125_v41, %v2484_v42  ;;  %4680 = vmatpush3.bf16.msra.mxu0 %v4679_v49  ;;  %v1339_v49 = vld [vmem:[%s5588_s10] sm:$0xff] }
 0xa34   : > { %4681 = vmatprep.subr.bf16.mxu0 %v4920_v4  ;;  %v4709_v54 = vpack.c.bf16 %v1340_v53, %v1339_v49 }
 0xa35   : > { %v2492_v44 = vsel %vm1517_vm3, %v5318_v43, 0.0 }
 0xa36   : > { %2493 = vadd.xlane.f32.xlu0 %v2492_v44  ;;  %v1371_v20 = vld [vmem:[%s5596_s2 + $0x10] sm:$0xff]  ;;  %v1372_v21 = vld [vmem:[%s5596_s2 + $0x18] sm:$0xff] }
 0xa37   : > { %4683 = vmatpush3.bf16.msra.mxu0 %v4682_v55  ;;  %v1342_v55 = vld [vmem:[%s5588_s10 + $0x18] sm:$0xff] }
 0xa38   : > { %4708 = vmatprep.subr.bf16.mxu0 %v4920_v4 }
 0xac3   : > { %v2494_v45 = vpop.xlane.xlu0 %2493 }
 0xac4   : > { %v2495_v46 = vmul.f32 0.03125, %v2494_v45 }
 0xac6   : > { %v2496_v47 = vsub.f32 %v5318_v43, %v2495_v46 }
 0xac8   : > { %v2497_v48 = vmul.f32 %v2496_v47, %v2496_v47 }
 0xaca   : > { %v2498_v50 = vsel %vm1517_vm3, %v2497_v48, 0.0 }
 0xacb   : > { %2499 = vadd.xlane.f32.xlu1 %v2498_v50 }
 0xb58   : > { %v2500_v59 = vpop.xlane.xlu1 %2499 }
 0xb59   : > { %v2501_v60 = vmul.f32 0.03125, %v2500_v59 }
 0xb5b   : > { %v2502_v61 = vadd.f32 1e-06, %v2501_v60 }
 0xb5d   : > { %4846 = vrsqrt.f32 %v2502_v61  ;;  %v4131_v61 = vld [vmem:[%s5589_s7] ss:$0 sm:$0xff]  ;;  %s5597_s7 = sld [smem:[#allocation21_spill]] }
 0xb67   : > { %v4847_v62 = vpop.eup %4846 }
 0xb68   : > { %v2504_v0 = vmul.f32 %v4847_v62, %v2496_v47 }
 0xb6a   : > { %v2511_v2 = vmul.f32 %v4126_v63, %v2504_v0  ;;  %v1347_v63 = vld [vmem:[%s5590_s11] sm:$0xff]  ;;  %v1348_v0 = vld [vmem:[%s5590_s11 + $0x8] sm:$0xff] }
 0xb6c   : > { %v2518_v3 = vadd.f32 %v4127_v1, %v2511_v2  ;;  %v4132_v1 = vld [vmem:[%s5591_s27] ss:$0 sm:$0xff]  ;;  %s5598_s27 = sld [smem:[#allocation24_spill]] }
 0xb6e   : > { %4412 = vmatmul.mubr.msk.f32.vlgmr.msra.gmra.mrb[8].mxu0 %vm1552_vm5, %v2518_v3  ;;  %v4715_v3 = vpack.c.bf16 %v1348_v0, %v1347_v63 }
 0xb6f   : > { %4457 = vmatprep.mubr.msk.f32.mxu0 %vm4921_vm4, %v4922_v5  ;;  %4710 = vmatpush3.bf16.msra.mxu0 %v4709_v54 }
 0xb70   : > { %4711 = vmatprep.subr.bf16.mxu0 %v4920_v4 }
 0xc41   : > { %v2594_v28 = vpop.f32.mrb[8].mxu0 }
 0xc42   : > { %v2595_v29 = vadd.f32 %v4128_v27, %v2594_v28  ;;  %v4413_v30 = vpop.f32.mrb[9].mxu0  ;;  %v1345_v27 = vld [vmem:[%s5588_s10 + $0x30] sm:$0xff]  ;;  %v1346_v28 = vld [vmem:[%s5588_s10 + $0x38] sm:$0xff] }
 0xc43   : > { %v4730_v30 = vpack.c.bf16 %v1346_v28, %v1345_v27 }
 0xc44   : > { %v2598_v31 = vmul.f32 %v2595_v29, %v2595_v29 }
 0xc46   : > { %v2599_v32 = vmul.f32 %v2598_v31, %v2595_v29 }
 0xc48   : > { %v2600_v33 = vmul.f32 0.044715, %v2599_v32  ;;  %v1359_v32 = vld [vmem:[%s5592_s18 + $0x20] sm:$0xff] }
 0xc4a   : > { %v2601_v34 = vadd.f32 %v2600_v33, %v2595_v29  ;;  %v1360_v33 = vld [vmem:[%s5592_s18 + $0x28] sm:$0xff] }
 0xc4c   : > { %v2602_v35 = vmul.f32 0.7978846, %v2601_v34 }
 0xc4e   : > { %4848 = vtanh.f32 %v2602_v35 }
 0xc58   : > { %v4849_v36 = vpop.eup %4848 }
 0xc59   : > { %v2604_v37 = vadd.f32 1.0, %v4849_v36  ;;  %v4739_v36 = vpack.c.bf16 %v1360_v33, %v1359_v32 }
 0xc5b   : > { %v2605_v38 = vmul.f32 0.5, %v2604_v37  ;;  %v1361_v37 = vld [vmem:[%s5592_s18 + $0x30] sm:$0xff] }
 0xc5d   : > { %v2606_v39 = vmul.f32 %v2605_v38, %v2595_v29  ;;  %v4137_v29 = vld [vmem:[%s5595_s28] ss:$0 sm:$0xff]  ;;  %v1362_v38 = vld [vmem:[%s5592_s18 + $0x38] sm:$0xff] }
 0xc5f   : > { %4447 = vmatmul.mubr.f32.vlgmr.msra.gmra.mrb[18].mxu1 %v2606_v39  ;;  %v4742_v39 = vpack.c.bf16 %v1362_v38, %v1361_v37 }
 0xc60   : > { %4489 = vmatprep.mubr.msk.f32.mxu1 %vm4921_vm4, %v4922_v5 }
 0xd32   : > { %v2679_v41 = vpop.f32.mrb[18].mxu1 }
 0xd33   : > { %v2680_v42 = vadd.f32 %v4130_v40, %v2679_v41  ;;  %v4448_v44 = vpop.f32.mrb[19].mxu1 }
 0xd35   : > { %v5364_v45 = vadd.f32 %v2680_v42, %v5318_v43  ;;  %v1341_v43 = vld [vmem:[%s5588_s10 + $0x10] sm:$0xff] }
 0xd36   : > { %v4712_v56 = vpack.c.bf16 %v1342_v55, %v1341_v43  ;;  %v1351_v55 = vld [vmem:[%s5590_s11 + $0x20] sm:$0xff] }
 0xd37   : > { %v2684_v46 = vsel %vm1517_vm3, %v5364_v45, 0.0 }
 0xd38   : > { %2685 = vadd.xlane.f32.xlu0 %v2684_v46  ;;  %4713 = vmatpush3.bf16.msra.mxu0 %v4712_v56  ;;  %v1352_v56 = vld [vmem:[%s5590_s11 + $0x28] sm:$0xff] }
 0xd39   : > { %4714 = vmatprep.subr.bf16.mxu0 %v4920_v4 }
 0xdc5   : > { %v2686_v47 = vpop.xlane.xlu0 %2685 }
 0xdc6   : > { %v2687_v48 = vmul.f32 0.03125, %v2686_v47 }
 0xdc8   : > { %v2688_v50 = vsub.f32 %v5364_v45, %v2687_v48 }
 0xdca   : > { %v2689_v51 = vmul.f32 %v2688_v50, %v2688_v50 }
 0xdcc   : > { %v2690_v52 = vsel %vm1517_vm3, %v2689_v51, 0.0 }
 0xdcd   : > { %2691 = vadd.xlane.f32.xlu1 %v2690_v52 }
 0xe5a   : > { %v2692_v57 = vpop.xlane.xlu1 %2691 }
 0xe5b   : > { %v2693_v58 = vmul.f32 0.03125, %v2692_v57 }
 0xe5d   : > { %v2694_v59 = vadd.f32 1e-06, %v2693_v58  ;;  %v4733_v58 = vpack.c.bf16 %v1352_v56, %v1351_v55 }
 0xe5f   : > { %4850 = vrsqrt.f32 %v2694_v59 }
 0xe69   : > { %v4851_v60 = vpop.eup %4850 }
 0xe6a   : > { %v2696_v62 = vmul.f32 %v4851_v60, %v2688_v50  ;;  %v1353_v60 = vld [vmem:[%s5590_s11 + $0x30] sm:$0xff] }
 0xe6c   : > { %v2703_v2 = vmul.f32 %v4131_v61, %v2696_v62  ;;  %v1354_v61 = vld [vmem:[%s5590_s11 + $0x38] sm:$0xff] }
 0xe6d   : > { %v4736_v62 = vpack.c.bf16 %v1354_v61, %v1353_v60 }
 0xe6e   : > { %v5380_v6 = vadd.f32 %v4132_v1, %v2703_v2  ;;  %v4145_v1 = vld [vmem:[%s5593_s26 + $0x1] ss:$0 sm:$0xff] }
 0xe70   : > { %4458 = vmatmul.mubr.msk.f32.vlgmr.msra.gmra.mrb[10].mxu0 %vm1552_vm5, %v5380_v6 }
 0xe71   : > { %4716 = vmatpush3.bf16.msra.mxu0 %v4715_v3  ;;  %4468 = vmatprep.mubr.msk.f32.mxu0 %vm4921_vm4, %v4922_v5  ;;  %v4143_v3 = vld [vmem:[%s5594_s1 + $0x1] ss:$0 sm:$0xff]  ;;  %s5601_s1 = sld [smem:[#allocation23_spill]] }
 0xe72   : > { %4717 = vmatprep.subr.bf16.mxu0 %v4920_v4 }
 0xe75   : > { %4719 = vmatpush3.bf16.msra.mxu0 %v4718_v9  ;;  %v4147_v9 = vld [vmem:[%s5595_s28 + $0x1] ss:$0 sm:$0xff] }
 0xe76   : > { %4720 = vmatprep.subr.bf16.mxu0 %v4920_v4 }
 0xe77   : > { %v4157_v60 = vld [vmem:[%s5601_s1] ss:$0 sm:$0xff]  ;;  %s5602_s1 = sld [smem:[#allocation25_spill]] }
 0xe78   : > { %4469 = vmatmul.mubr.msk.f32.vlgmr.msra.gmra.mrb[12].mxu0 %vm1552_vm5, %v5380_v6 }
 0xe79   : > { %4722 = vmatpush3.bf16.msra.mxu0 %v4721_v12  ;;  %4479 = vmatprep.mubr.msk.f32.mxu0 %vm4921_vm4, %v4922_v5 }
 0xe7a   : > { %4723 = vmatprep.subr.bf16.mxu0 %v4920_v4 }
 0xe7d   : > { %4725 = vmatpush3.bf16.msra.mxu0 %v4724_v15 }
 0xe7e   : > { %4482 = vmatprep.subr.mxu0 %v4922_v5 }
 0xe80   : > { %4480 = vmatmul.mubr.msk.f32.vlgmr.msra.gmra.mrb[14].mxu0 %vm1552_vm5, %v5380_v6 }
 0xe81   : > { %4484 = vmatprep.mubr.msk.f32.mxu0 %vm4921_vm4, %v4922_v5 }
 0xf43   : > { %v2786_v16 = vpop.f32.mrb[10].mxu0 }
 0xf44   : > { %v4459_v17 = vpop.f32.mrb[11].mxu0  ;;  %v2787_v26 = vadd.f32 %v4133_v22, %v2786_v16  ;;  %v4745_v22 = vpack.c.bf16 %v1372_v21, %v1371_v20  ;;  %v4158_v21 = vld [vmem:[%s5602_s1] ss:$0 sm:$0xff]  ;;  %s5604_s1 = sshll.u32 %s5608_s16, 3 }
 0xf4b   : > { %v2862_v19 = vpop.f32.mrb[12].mxu0 }
 0xf4c   : > { %v2863_v23 = vadd.f32 %v4135_v18, %v2862_v19  ;;  %v4470_v24 = vpop.f32.mrb[13].mxu0 }
 0xf4d   : > { %v1369_v24 = vld [vmem:[%s5596_s2] sm:$0xff] }
 0xf4e   : > { %4483 = vmatpush3.xpose.msk.msra.mxu0 %vm1778_vm6, %v2863_v23 }
 0xf4f   : > { %4726 = vmatprep.subr.bf16.mxu0 %v4920_v4 }
 0xf51   : > { %4485 = vmatmul.mubr.msk.f32.vlgmr.msra.gmra.mrb[16].mxu0 %vm1778_vm6, %v2787_v26 }
 0xf52   : > { %4728 = vmatpush3.bf16.msra.mxu0 %v4727_v25  ;;  %4500 = vmatprep.mubr.msk.f32.mxu0 %vm4921_vm4, %v4922_v5  ;;  %v1370_v25 = vld [vmem:[%s5596_s2 + $0x8] sm:$0xff]  ;;  %s5605_s2 = sld [smem:[#allocation28_spill]] }
 0xf53   : > { %v2938_v31 = vpop.f32.mrb[14].mxu0  ;;  %4729 = vmatprep.subr.bf16.mxu0 %v4920_v4  ;;  %v4748_v27 = vpack.c.bf16 %v1370_v25, %v1369_v24 }
 0xf54   : > { %v2939_v34 = vadd.f32 %v4137_v29, %v2938_v31  ;;  %v4481_v35 = vpop.f32.mrb[15].mxu0 }
 0xf56   : > { %4488 = vmatpush3.msk.msra.mxu1 %vm1872_vm7, %v2939_v34  ;;  %4731 = vmatpush3.bf16.msra.mxu0 %v4730_v30 }
 0xf57   : > { %4738 = vmatprep.subr.bf16.mxu0 %v4920_v4  ;;  %4732 = vmatprep.subr.bf16.mxu1 %v4920_v4 }
 0xf59   : > { %4501 = vmatmul.mubr.msk.f32.vlgmr.msra.gmra.mrb[18].mxu0 %vm1552_vm5, %v5380_v6 }
 0xf5a   : > { %4740 = vmatpush3.bf16.msra.mxu0 %v4739_v36  ;;  %4522 = vmatprep.mubr.msk.f32.mxu0 %vm4921_vm4, %v4922_v5  ;;  %v4155_v36 = vld [vmem:[%s5597_s7] ss:$0 sm:$0xff]  ;;  %s5600_s7 = sld [smem:[#allocation22_spill]] }
 0xf5b   : > { %4741 = vmatprep.subr.bf16.mxu0 %v4920_v4 }
 0xf5e   : > { %4743 = vmatpush3.bf16.msra.mxu0 %v4742_v39 }
 0xf5f   : > { %4744 = vmatprep.subr.bf16.mxu0 %v4920_v4 }
 0xf61   : > { %4523 = vmatmul.mubr.msk.f32.vlgmr.msra.gmra.mrb[20].mxu0 %vm1552_vm5, %v5380_v6 }
 0xf62   : > { %4539 = vmatprep.mubr.msk.f32.mxu0 %vm4921_vm4, %v4922_v5  ;;  %4746 = vmatpush3.bf16.msra.mxu0 %v4745_v22 }
 0xf63   : > { %4750 = vmatprep.subr.bf16.mxu0 %v4920_v4 }
0x1024   : > { %v3014_v40 = vpop.f32.mrb[16].mxu0 }
0x1025   : > { %v3018_v41 = vmul.f32 0.25, %v3014_v40  ;;  %v4486_v42 = vpop.f32.mrb[17].mxu0 }
0x1027   : > { %v3019_v44 = vsel %vm1856_vm8, %v3018_v41, -inf }
0x1028   : > { %3020 = vmax.xlane.f32.xlu0 %v3019_v44 }
0x102c   : > { %v3178_v46 = vpop.f32.mrb[18].mxu0 }
0x102d   : > { %v4502_v47 = vpop.f32.mrb[19].mxu0  ;;  %v3179_v10 = vadd.f32 %v4143_v3, %v3178_v46  ;;  %v1386_v3 = vld [vmem:[%s5599_s0 + $0x28] sm:$0xff] }
0x102e   : > { %v1376_v47 = vld [vmem:[%s5598_s27] sm:$0xff] }
0x1034   : > { %v3330_v48 = vpop.f32.mrb[20].mxu0 }
0x1035   : > { %v4524_v50 = vpop.f32.mrb[21].mxu0  ;;  %v3331_v11 = vadd.f32 %v4147_v9, %v3330_v48  ;;  %v1377_v48 = vld [vmem:[%s5598_s27 + $0x8] sm:$0xff] }
0x1036   : > { %v1378_v50 = vld [vmem:[%s5598_s27 + $0x10] sm:$0xff] }
0x10b5   : > { %v3021_v51 = vpop.xlane.xlu0 %3020 }
0x10b6   : > { %v3022_v52 = vsub.f32 %v3018_v41, %v3021_v51  ;;  %v1379_v51 = vld [vmem:[%s5598_s27 + $0x18] sm:$0xff] }
0x10b8   : > { %v3023_v49 = vmul.f32 1.442695, %v3022_v52  ;;  %v4754_v52 = vpack.c.bf16 %v1379_v51, %v1378_v50 }
0x10ba   : > { %4852 = vpow2.f32 %v3023_v49  ;;  %v1381_v49 = vld [vmem:[%s5599_s0] sm:$0xff] }
0x10c4   : > { %v4853_v53 = vpop.eup %4852 }
0x10c5   : > { %v3025_v54 = vsel %vm1856_vm8, %v4853_v53, 0.0 }
0x10c6   : > { %3026 = vadd.xlane.f32.xlu1 %v3025_v54 }
0x1153   : > { %v3027_v43 = vpop.xlane.xlu1 %3026 }
0x1154   : > { %4854 = vrcp.f32 %v3027_v43 }
0x115e   : > { %v4855_v57 = vpop.eup %4854 }
0x115f   : > { %v3029_v59 = vmul.f32 %v4855_v57, %v4853_v53  ;;  %v1382_v53 = vld [vmem:[%s5599_s0 + $0x8] sm:$0xff] }
0x1160   : > { %v4757_v54 = vpack.c.bf16 %v1382_v53, %v1381_v49  ;;  %v4162_v53 = vld [vmem:[%s5606_s3] ss:$0 sm:$0xff]  ;;  %s1275_s3 = scalar_lea.vmem %s5140_s12, %s5608_s16 }
0x1161   : > { %4490 = vmatmul.mubr.msk.f32.vlgmr.msra.gmra.mrb[20].mxu1 %vm1868_vm9, %v3029_v59 }
0x1162   : > { %4734 = vmatpush3.bf16.msra.mxu1 %v4733_v58  ;;  %4511 = vmatprep.mubr.msk.f32.mxu1 %vm4921_vm4, %v4922_v5  ;;  %v4156_v58 = vld [vmem:[%s5600_s7] ss:$0 sm:$0xff]  ;;  %s5603_s7 = sld [smem:[#allocation27_spill]] }
0x1163   : > { %4735 = vmatprep.subr.bf16.mxu1 %v4920_v4 }
0x1166   : > { %4737 = vmatpush3.bf16.msra.mxu1 %v4736_v62 }
0x1167   : > { %4525 = vmatprep.subr.mxu1 %v4922_v5 }
0x1169   : > { %4512 = vmatmul.mubr.msk.f32.vlgmr.msra.gmra.mrb[22].mxu1 %vm1552_vm5, %v5380_v6 }
0x116a   : > { %4527 = vmatprep.mubr.msk.f32.mxu1 %vm4921_vm4, %v4922_v5 }
0x1234   : > { %v3102_v63 = vpop.f32.mrb[20].mxu1 }
0x1235   : > { %v4491_v0 = vpop.f32.mrb[21].mxu1 }
0x1236   : > { %v1384_v0 = vld [vmem:[%s5599_s0 + $0x18] sm:$0xff] }
0x123c   : > { %v3254_v2 = vpop.f32.mrb[22].mxu1 }
0x123d   : > { %v3255_v7 = vadd.f32 %v4145_v1, %v3254_v2  ;;  %v4513_v8 = vpop.f32.mrb[23].mxu1  ;;  %v1385_v2 = vld [vmem:[%s5599_s0 + $0x20] sm:$0xff] }
0x123e   : > { %v1387_v8 = vld [vmem:[%s5599_s0 + $0x30] sm:$0xff] }
0x123f   : > { %4526 = vmatpush3.xpose.msk.msra.mxu1 %vm1778_vm6, %v3255_v7  ;;  %v4763_v7 = vpack.c.bf16 %v1386_v3, %v1385_v2 }
0x1240   : > { %4530 = vmatprep.subr.mxu1 %v4922_v5 }
0x1242   : > { %4528 = vmatmul.mubr.msk.f32.vlgmr.msra.gmra.mrb[24].mxu1 %vm1778_vm6, %v3179_v10  ;;  %v1389_v10 = vld [vmem:[%s5599_s0 + $0x40] sm:$0xff] }
0x1243   : > { %4531 = vmatpush3.msk.msra.mxu1 %vm1872_vm7, %v3331_v11  ;;  %4532 = vmatprep.mubr.msk.f32.mxu1 %vm4921_vm4, %v4922_v5  ;;  %v1390_v11 = vld [vmem:[%s5599_s0 + $0x48] sm:$0xff] }
0x1244   : > { %4747 = vmatprep.subr.bf16.mxu1 %v4920_v4 }
0x1315   : > { %v3406_v6 = vpop.f32.mrb[24].mxu1 }
0x1316   : > { %v3410_v12 = vmul.f32 0.25, %v3406_v6  ;;  %v4529_v13 = vpop.f32.mrb[25].mxu1  ;;  %v4769_v6 = vpack.c.bf16 %v1390_v11, %v1389_v10 }
0x1317   : > { %v1392_v13 = vld [vmem:[%s5599_s0 + $0x58] sm:$0xff] }
0x1318   : > { %v3411_v14 = vsel %vm1856_vm8, %v3410_v12, -inf }
0x1319   : > { %3412 = vmax.xlane.f32.xlu0 %v3411_v14 }
0x13a6   : > { %v3413_v15 = vpop.xlane.xlu0 %3412 }
0x13a7   : > { %v3414_v16 = vsub.f32 %v3410_v12, %v3413_v15  ;;  %v1391_v12 = vld [vmem:[%s5599_s0 + $0x50] sm:$0xff]  ;;  %v1393_v15 = vld [vmem:[%s5599_s0 + $0x60] sm:$0xff] }
0x13a8   : > { %v4772_v14 = vpack.c.bf16 %v1392_v13, %v1391_v12 }
0x13a9   : > { %v3415_v17 = vmul.f32 1.442695, %v3414_v16  ;;  %v1394_v16 = vld [vmem:[%s5599_s0 + $0x68] sm:$0xff] }
0x13ab   : > { %4856 = vpow2.f32 %v3415_v17  ;;  %v4775_v17 = vpack.c.bf16 %v1394_v16, %v1393_v15 }
0x13b5   : > { %v4857_v18 = vpop.eup %4856 }
0x13b6   : > { %v3417_v19 = vsel %vm1856_vm8, %v4857_v18, 0.0 }
0x13b7   : > { %3418 = vadd.xlane.f32.xlu1 %v3417_v19  ;;  %v1396_v19 = vld [vmem:[%s5599_s0 + $0x78] sm:$0xff] }
0x1444   : > { %v3419_v23 = vpop.xlane.xlu1 %3418 }
0x1445   : > { %4858 = vrcp.f32 %v3419_v23 }
0x144f   : > { %v4859_v26 = vpop.eup %4858 }
0x1450   : > { %v3421_v28 = vmul.f32 %v4859_v26, %v4857_v18  ;;  %v1395_v18 = vld [vmem:[%s5599_s0 + $0x70] sm:$0xff] }
0x1451   : > { %v4778_v20 = vpack.c.bf16 %v1396_v19, %v1395_v18 }
0x1452   : > { %4533 = vmatmul.mubr.msk.f32.vlgmr.msra.gmra.mrb[26].mxu1 %vm1868_vm9, %v3421_v28 }
0x1453   : > { %4749 = vmatpush3.bf16.msra.mxu1 %v4748_v27  ;;  %4546 = vmatprep.mubr.msk.f32.mxu1 %vm4921_vm4, %v4922_v5 }
0x1454   : > { %4756 = vmatprep.subr.bf16.mxu1 %v4920_v4 }
0x1456   : > { %4547 = vmatmul.mubr.msk.f32.vlgmr.msra.gmra.mrb[28].mxu1 %vm1778_vm6, %v3102_v63  ;;  %v1383_v63 = vld [vmem:[%s5599_s0 + $0x10] sm:$0xff] }
0x1457   : > { %4592 = vmatprep.mubr.msk.f32.mxu1 %vm4921_vm4, %v4922_v5  ;;  %4758 = vmatpush3.bf16.msra.mxu1 %v4757_v54  ;;  %v4760_v1 = vpack.c.bf16 %v1384_v0, %v1383_v63 }
0x1458   : > { %4759 = vmatprep.subr.bf16.mxu1 %v4920_v4 }
0x145b   : > { %4761 = vmatpush3.bf16.msra.mxu1 %v4760_v1 }
0x145c   : > { %4762 = vmatprep.subr.bf16.mxu1 %v4920_v4 }
0x145f   : > { %4764 = vmatpush3.bf16.msra.mxu1 %v4763_v7 }
0x1460   : > { %4765 = vmatprep.subr.bf16.mxu1 %v4920_v4 }
0x1525   : > { %v3494_v29 = vpop.f32.mrb[26].mxu1 }
0x1526   : > { %v4534_v30 = vpop.f32.mrb[27].mxu1  ;;  %4540 = vmatmul.mubr.msk.f32.vlgmr.msra.gmra.mrb[22].mxu0 %vm1778_vm6, %v3494_v29 }
0x1527   : > { %4557 = vmatprep.mubr.msk.f32.mxu0 %vm4921_vm4, %v4922_v5 }
0x1529   : > { %v3640_v31 = vpop.f32.mrb[28].mxu1 }
0x152a   : > { %v4548_v32 = vpop.f32.mrb[29].mxu1 }
0x15f9   : > { %v3567_v33 = vpop.f32.mrb[22].mxu0 }
0x15fa   : > { %v3641_v34 = vadd.f32 %v3640_v31, %v3567_v33  ;;  %v4541_v35 = vpop.f32.mrb[23].mxu0 }
0x15fc   : > { %v3644_v37 = vadd.f32 %v3641_v34, %v5364_v45  ;;  %v4751_v45 = vpack.c.bf16 %v1377_v48, %v1376_v47  ;;  %v3875_v47 = vld [vmem:[#allocation3] sm:$0x1]  ;;  %v4923_v48 = vmov 0  }
0x15fd   : > { %4834 = vset.pattern.permute.xlu0 %v4923_v48 }
0x15fe   : > { %v5478_v38 = vadd.f32 %v4155_v36, %v3644_v37  ;;  %4752 = vmatpush3.bf16.msra.mxu0 %v4751_v45 }
0x15ff   : > { %4753 = vmatprep.subr.bf16.mxu0 %v4920_v4 }
0x1600   : > { %v3652_v39 = vsel %vm1517_vm3, %v5478_v38, 0.0 }
0x1601   : > { %3653 = vadd.xlane.f32.xlu0 %v3652_v39 }
0x1602   : > { %4755 = vmatpush3.bf16.msra.mxu0 %v4754_v52  ;;  %v4161_v52 = vld [vmem:[%s5605_s2] ss:$0 sm:$0xff] }
0x1603   : > { %4595 = vmatprep.subr.mxu0 %v4922_v5 }
0x168e   : > { %v3654_v40 = vpop.xlane.xlu0 %3653 }
0x168f   : > { %v3655_v41 = vmul.f32 0.03125, %v3654_v40 }
0x1691   : > { %v3656_v42 = vsub.f32 %v5478_v38, %v3655_v41 }
0x1693   : > { %v3657_v44 = vmul.f32 %v3656_v42, %v3656_v42 }
0x1695   : > { %v3658_v46 = vsel %vm1517_vm3, %v3657_v44, 0.0 }
0x1696   : > { %3659 = vadd.xlane.f32.xlu1 %v3658_v46 }
0x1723   : > { %v3660_v43 = vpop.xlane.xlu1 %3659 }
0x1724   : > { %v3661_v55 = vmul.f32 0.03125, %v3660_v43 }
0x1726   : > { %v3662_v56 = vadd.f32 1e-06, %v3661_v55  ;;  %v3874_v55 = vld [vmem:[%s5127_s20] sm:$0x1] }
0x1728   : > { %4860 = vrsqrt.f32 %v3662_v56  ;;  %v3881_v56 = vlaneseq }
0x1732   : > { %v4861_v57 = vpop.eup %4860 }
0x1733   : > { %v3664_v59 = vmul.f32 %v4861_v57, %v3656_v42  ;;  %v3882_v57 = vshrl.u32 %v3881_v56, 7 }
0x1735   : > { %v3671_v61 = vmul.f32 %v4156_v58, %v3664_v59  ;;  %v3883_v58 = vsub.s32 0, %v3882_v57 }
0x1737   : > { %v3678_v62 = vadd.f32 %v4157_v60, %v3671_v61 }
0x1739   : > { %4558 = vmatmul.mubr.msk.f32.vlgmr.msra.gmra.mrb[24].mxu0 %vm1552_vm5, %v3678_v62 }
0x173a   : > { %4597 = vmatprep.mubr.msk.f32.mxu0 %vm4921_vm4, %v4922_v5  ;;  %v1388_v5 = vld [vmem:[%s5599_s0 + $0x38] sm:$0xff]  ;;  %s1272_s0 = scalar_lea.vmem %s5135_s4, %s5604_s1 }
0x173b   : > { %v4766_v9 = vpack.c.bf16 %v1388_v5, %v1387_v8 }
0x173d   : > { %4767 = vmatpush3.bf16.msra.mxu1 %v4766_v9 }
0x173e   : > { %4768 = vmatprep.subr.bf16.mxu1 %v4920_v4 }
0x1741   : > { %4770 = vmatpush3.bf16.msra.mxu1 %v4769_v6 }
0x1742   : > { %4771 = vmatprep.subr.bf16.mxu1 %v4920_v4 }
0x1745   : > { %4773 = vmatpush3.bf16.msra.mxu1 %v4772_v14 }
0x1746   : > { %4774 = vmatprep.subr.bf16.mxu1 %v4920_v4 }
0x1749   : > { %4776 = vmatpush3.bf16.msra.mxu1 %v4775_v17 }
0x174a   : > { %4777 = vmatprep.subr.bf16.mxu1 %v4920_v4  ;;  %v4160_v4 = vld [vmem:[%s5603_s7] ss:$0 sm:$0xff] }
0x174d   : > { %4779 = vmatpush3.bf16.msra.mxu1 %v4778_v20 }
0x180c   : > { %v3754_v22 = vpop.f32.mrb[24].mxu0 }
0x180d   : > { %v3755_v23 = vadd.f32 %v4158_v21, %v3754_v22  ;;  %v4559_v24 = vpop.f32.mrb[25].mxu0 }
0x180f   : > { %v3758_v25 = vmul.f32 %v3755_v23, %v3755_v23 }
0x1811   : > { %v3759_v26 = vmul.f32 %v3758_v25, %v3755_v23 }
0x1813   : > { %v3760_v27 = vmul.f32 0.044715, %v3759_v26 }
0x1815   : > { %v3761_v28 = vadd.f32 %v3760_v27, %v3755_v23 }
0x1817   : > { %v3762_v29 = vmul.f32 0.7978846, %v3761_v28 }
0x1819   : > { %4862 = vtanh.f32 %v3762_v29 }
0x1823   : > { %v4863_v30 = vpop.eup %4862 }
0x1824   : > { %v3764_v31 = vadd.f32 1.0, %v4863_v30 }
0x1826   : > { %v3765_v32 = vmul.f32 0.5, %v3764_v31 }
0x1828   : > { %v3766_v33 = vmul.f32 %v3765_v32, %v3755_v23 }
0x182a   : > { %4593 = vmatmul.mubr.f32.vlgmr.msra.gmra.mrb[30].mxu1 %v3766_v33 }
0x18fd   : > { %v3839_v34 = vpop.f32.mrb[30].mxu1 }
0x18fe   : > { %v3840_v35 = vadd.f32 %v4160_v4, %v3839_v34  ;;  %v4594_v36 = vpop.f32.mrb[31].mxu1 }
0x1900   : > { %v3843_v37 = vadd.f32 %v3840_v35, %v5478_v38 }
0x1902   : > { %3844 = vst.msk [vmem:[%s1272_s0] sm:$0x1f] %vm1517_vm3, %v3843_v37  ;;  %v3847_v39 = vsel %vm1517_vm3, %v3843_v37, 0.0 }
0x1903   : > { %3848 = vadd.xlane.f32.xlu0 %v3847_v39 }
0x1919   : > { %3878 = vperm.xlu0 %4834, %v3875_v47  }
0x1990   : > { %v3849_v40 = vpop.xlane.xlu0 %3848 }
0x1991   : > { %v3850_v41 = vmul.f32 0.03125, %v3849_v40 }
0x1993   : > { %v3851_v42 = vsub.f32 %v3843_v37, %v3850_v41 }
0x1995   : > { %v3852_v44 = vmul.f32 %v3851_v42, %v3851_v42 }
0x1997   : > { %v3853_v46 = vsel %vm1517_vm3, %v3852_v44, 0.0 }
0x1998   : > { %3854 = vadd.xlane.f32.xlu1 %v3853_v46  ;;  %v3879_v59 = vpop.permute.xlu0 %3878 }
0x1999   : > { %v3884_v60 = vrot.slane %v3879_v59, %v3883_v58 }
0x1a25   : > { %v3855_v38 = vpop.xlane.xlu1 %3854 }
0x1a26   : > { %v3856_v45 = vmul.f32 0.03125, %v3855_v38 }
0x1a28   : > { %v3857_v50 = vadd.f32 1e-05, %v3856_v45 }
0x1a2a   : > { %4864 = vrsqrt.f32 %v3857_v50 }
0x1a34   : > { %v4865_v51 = vpop.eup %4864 }
0x1a35   : > { %v3859_v49 = vmul.f32 %v4865_v51, %v3851_v42 }
0x1a37   : > { %v3866_v54 = vmul.f32 %v4161_v52, %v3859_v49 }
0x1a39   : > { %v3873_v43 = vadd.f32 %v4162_v53, %v3866_v54 }
0x1a3b   : > { %4596 = vmatpush3.xpose.msk.msra.mxu0 %vm1552_vm5, %v3873_v43 }
0x1a3e   : > { %4598 = vmatmul.mubr.msk.f32.vlgmr.msra.gmra.mrb[26].mxu0 %vm1552_vm5, %v3874_v55 }
0x1b11   : > { %v3957_v61 = vpop.f32.mrb[26].mxu0 }
0x1b12   : > { %v3958_v62 = vadd.f32 %v3957_v61, %v3884_v60  ;;  %v4599_v63 = vpop.f32.mrb[27].mxu0 }
0x1b14   : > { %v3961_v0 = vmul.f32 0.25, %v3958_v62 }
0x1b16   : > { %v3962_v1 = vadd.f32 0.875, %v3961_v0 }
0x1b18   : > { %v4165_v2 = vmul.f32 -1.442695, %v3962_v1 }
0x1b1a   : > { %4866 = vpow2.f32 %v4165_v2 }
0x1b24   : > { %v4867_v3 = vpop.eup %4866 }
0x1b25   : > { %v3966_v7 = vadd.f32 1.0, %v4867_v3 }
0x1b27   : > { %4868 = vrcp.f32 %v3966_v7 }
0x1b31   : > { %v4869_v8 = vpop.eup %4868 }
0x1b32   : > { %3970 = vst.msk [vmem:[%s1275_s3] sm:$0x1] %vm3969_vm10, %v4869_v8 }
0x1b33 PF: > { %s98_s15 = sadd.s32 1, %s4876_s15  }
0x1b34   : > { %p95_p4 = scmp.ge.s32.totalorder %s98_s15, 4  }
0x1b36   :  { %97 = sbr.rel (!%p95_p4) target bundleno = 86 (0x56), region = 268 }

// kernel: timm_vit_adapter_forward.3
= control target key start
LH: loop header
LB: loop body
LE: loop exit
PB: predicated region body
PF: predicated region fallthrough
CT: control target
= control target key end

     0   :  { %s4610_s6 = smov 1   ;;  %s4611_s10 = smov 2   ;;  %s5270_s0 = inlined_call_operand.smem [shape: u32[38], index: -1, kind: input, shape index: {}] }
   0x1   :  { %s4659_s5 = sld [smem:[%s5270_s0]]   ;;  %s4612_s14 = smov 3  }
   0x2   :  { %s4664_s9 = sld [smem:[%s5270_s0 + %s4610_s6]]   ;;  %s4613_s18 = smov 4  }
   0x3   :  { %s4669_s13 = sld [smem:[%s5270_s0 + %s4611_s10]]   ;;  %s4614_s22 = smov 5  }
   0x4   :  { %s4674_s17 = sld [smem:[%s5270_s0 + %s4612_s14]]   ;;  %s4615_s26 = smov 6  }
   0x5   :  { %s4679_s21 = sld [smem:[%s5270_s0 + %s4613_s18]]   ;;  %s4616_s30 = smov 7  }
   0x6   :  { %s4684_s25 = sld [smem:[%s5270_s0 + %s4614_s22]]   ;;  %s4617_s4 = smov 8  }
   0x7   :  { %5290 = sst [smem:[#allocation5_spill]] %s4659_s5  ;;  %s4618_s10 = smov 9  }
   0x8   :  { %5291 = sst [smem:[#allocation6_spill]] %s4664_s9  ;;  %s4619_s15 = smov 10  }
   0x9   :  { %5292 = sst [smem:[#allocation7_spill]] %s4669_s13  ;;  %s4620_s20 = smov 11  }
   0xa   :  { %s4689_s29 = sld [smem:[%s5270_s0 + %s4615_s26]]   ;;  %s4621_s26 = smov 12  }
   0xb   :  { %s4694_s3 = sld [smem:[%s5270_s0 + %s4616_s30]]   ;;  %s4622_s1 = smov 13  }
   0xc   :  { %s4699_s8 = sld [smem:[%s5270_s0 + %s4617_s4]]   ;;  %s4623_s7 = smov 14  }
   0xd   :  { %s4704_s14 = sld [smem:[%s5270_s0 + %s4618_s10]]   ;;  %s4625_s22 = smov 16  }
   0xe   :  { %s4709_s19 = sld [smem:[%s5270_s0 + %s4619_s15]]   ;;  %s4624_s15 = smov 15  }
   0xf   :  { %s4714_s24 = sld [smem:[%s5270_s0 + %s4620_s20]]   ;;  %s4626_s28 = smov 17  }
  0x10   :  { %s4719_s30 = sld [smem:[%s5270_s0 + %s4621_s26]]  }
  0x11   :  { %5293 = sst [smem:[#allocation8_spill]] %s4694_s3 }
  0x12   :  { %5294 = sst [smem:[#allocation9_spill]] %s4699_s8 }
  0x13   :  { %5295 = sst [smem:[#allocation10_spill]] %s4704_s14 }
  0x14   :  { %s4724_s6 = sld [smem:[%s5270_s0 + %s4622_s1]]  }
  0x15   :  { %s4729_s12 = sld [smem:[%s5270_s0 + %s4623_s7]]   ;;  %s4627_s7 = smov 18  }
  0x16   :  { %5296 = sst [smem:[#allocation11_spill]] %s4719_s30 }
  0x17   :  { %s4734_s20 = sld [smem:[%s5270_s0 + %s4624_s15]]   ;;  %s4628_s15 = smov 19  }
  0x18   :  { %s4739_s27 = sld [smem:[%s5270_s0 + %s4625_s22]]   ;;  %s4629_s22 = smov 20  }
  0x19   :  { %s4744_s4 = sld [smem:[%s5270_s0 + %s4626_s28]]   ;;  %s4630_s28 = smov 21  }
  0x1a   :  { %5297 = sst [smem:[#allocation12_spill]] %s4724_s6 }
  0x1b   :  { %5298 = sst [smem:[#allocation13_spill]] %s4729_s12 }
  0x1c   :  { %s4749_s12 = sld [smem:[%s5270_s0 + %s4627_s7]]   ;;  %s4631_s7 = smov 22  }
  0x1d   :  { %s4754_s30 = sld [smem:[%s5270_s0 + %s4628_s15]]   ;;  %s4632_s15 = smov 23  }
  0x1e   :  { %5299 = sst [smem:[#allocation14_spill]] %s4739_s27 }
  0x1f   :  { %5300 = sst [smem:[#allocation15_spill]] %s4744_s4 }
  0x20   :  { %s4759_s27 = sld [smem:[%s5270_s0 + %s4629_s22]]   ;;  %s4633_s22 = smov 24  }
  0x21   :  { %s4764_s4 = sld [smem:[%s5270_s0 + %s4630_s28]]   ;;  %s4634_s28 = smov 25  }
  0x22   :  { %5301 = sst [smem:[#allocation16_spill]] %s4749_s12 }
  0x23   :  { %5302 = sst [smem:[#allocation17_spill]] %s4754_s30 }
  0x24   :  { %s4769_s12 = sld [smem:[%s5270_s0 + %s4631_s7]]   ;;  %s4635_s7 = smov 26  }
  0x25   :  { %s4774_s30 = sld [smem:[%s5270_s0 + %s4632_s15]]   ;;  %s4636_s15 = smov 27  }
  0x26   :  { %5303 = sst [smem:[#allocation18_spill]] %s4759_s27 }
  0x27   :  { %5304 = sst [smem:[#allocation19_spill]] %s4764_s4 }
  0x28   :  { %s4779_s27 = sld [smem:[%s5270_s0 + %s4633_s22]]   ;;  %s4637_s22 = smov 28  }
  0x29   :  { %s4784_s4 = sld [smem:[%s5270_s0 + %s4634_s28]]   ;;  %s4638_s28 = smov 29  }
  0x2a   :  { %5305 = sst [smem:[#allocation20_spill]] %s4769_s12 }
  0x2b   :  { %5306 = sst [smem:[#allocation21_spill]] %s4774_s30 }
  0x2c   :  { %s4789_s12 = sld [smem:[%s5270_s0 + %s4635_s7]]   ;;  %s4639_s7 = smov 30  }
  0x2d   :  { %s4794_s30 = sld [smem:[%s5270_s0 + %s4636_s15]]   ;;  %s4640_s15 = smov 31  }
  0x2e   :  { %5307 = sst [smem:[#allocation22_spill]] %s4779_s27 }
  0x2f   :  { %5308 = sst [smem:[#allocation23_spill]] %s4784_s4 }
  0x30   :  { %s4799_s27 = sld [smem:[%s5270_s0 + %s4637_s22]]   ;;  %s4641_s22 = smov 32  }
  0x31   :  { %s4804_s4 = sld [smem:[%s5270_s0 + %s4638_s28]]   ;;  %s4642_s28 = smov 33  }
  0x32   :  { %5309 = sst [smem:[#allocation24_spill]] %s4789_s12 }
  0x33   :  { %5310 = sst [smem:[#allocation25_spill]] %s4794_s30 }
  0x34   :  { %s4809_s12 = sld [smem:[%s5270_s0 + %s4639_s7]]   ;;  %s4643_s7 = smov 34  }
  0x35   :  { %s4814_s30 = sld [smem:[%s5270_s0 + %s4640_s15]]   ;;  %s4644_s15 = smov 35  }
  0x36   :  { %5311 = sst [smem:[#allocation26_spill]] %s4799_s27 }
  0x37   :  { %5312 = sst [smem:[#allocation27_spill]] %s4804_s4 }
  0x38   :  { %s4819_s27 = sld [smem:[%s5270_s0 + %s4641_s22]]   ;;  %s4645_s22 = smov 36  }
  0x39   :  { %s4824_s4 = sld [smem:[%s5270_s0 + %s4642_s28]]   ;;  %s4646_s28 = smov 37  }
  0x3a   :  { %5313 = sst [smem:[#allocation28_spill]] %s4809_s12 }
  0x3b   :  { %5314 = sst [smem:[#allocation29_spill]] %s4814_s30 }
  0x3c   :  { %s4829_s12 = sld [smem:[%s5270_s0 + %s4643_s7]]  }
  0x3d   :  { %s4834_s30 = sld [smem:[%s5270_s0 + %s4644_s15]]  }
  0x3e   :  { %5315 = sst [smem:[#allocation30_spill]] %s4819_s27 }
  0x3f   :  { %5316 = sst [smem:[#allocation31_spill]] %s4824_s4 }
  0x40   :  { %s4839_s27 = sld [smem:[%s5270_s0 + %s4645_s22]]  }
  0x41   :  { %s4844_s4 = sld [smem:[%s5270_s0 + %s4646_s28]]  }
  0x42   :  { %5317 = sst [smem:[#allocation32_spill]] %s4829_s12 }
  0x43   :  { %80 = vsyncpa [#allocation3], 0 }
  0x44   :  { %82 = vsyncpa [#allocation3 + $0x1], 0  ;;  %s4846_s7 = smov 0   ;;  %s4848_s10 = smov 0  }
  0x45   :  { %s4850_s11 = smov 0   ;;  %s4852_s15 = smov 0  }
  0x46 LB: > { %s5318_s14 = sld [smem:[#allocation10_spill]]  ;;  %s5319_s8 = sld [smem:[#allocation9_spill]]  ;;  %s4608_s15 = sphi %s4852_s15, %s5351_s15   ;;  %s4604_s11 = sphi %s4850_s11, %s5350_s11   ;;  %s4600_s10 = sphi %s4848_s10, %s5349_s10   ;;  %s4596_s7 = sphi %s4846_s7, %s5348_s7  }
  0x47   : > { %s5320_s6 = sld [smem:[#allocation12_spill]]  ;;  %s5321_s3 = sld [smem:[#allocation8_spill]] }
  0x48   : > { %s4867_s0 = sadd.s32 4294967295, %s4608_s15   ;;  %s3778_s16 = sadd.s32 4294967294, %s4608_s15  }
  0x49   : > { %s4871_s18 = sadd.s32 1, %s4608_s15   ;;  %s877_s22 = sadd.s32 1, %s4604_s11 }
  0x4a   : > { %s874_s23 = ssub.s32 %s4608_s15, %s4871_s18  ;;  %p887_p0 = scmp.ne.s32.totalorder %s4604_s11, %s4600_s10 }
  0x4b   : > { %p875_p1 = scmp.eq.s32.totalorder %s874_s23, 0  ;;  %p888_p2 = scmp.eq.s32.totalorder %s4867_s0, 1 }
  0x4c   : > { %p893_p3 = scmp.ne.s32.totalorder %s4600_s10, %s4596_s7  ;;  %p894_p4 = scmp.eq.s32.totalorder %s3778_s16, 1 }
  0x4d   : > { %s4882_s26 = scalar_select %p875_p1, %s4604_s11, %s877_s22  }
  0x4e   : > { %p4884_p5 = por %p888_p2, %p887_p0  ;;  %p4888_p6 = por %p894_p4, %p893_p3 }
  0x4f   : > { %p3781_p7 = scmp.ge.s32.totalorder %s4608_s15, 1  ;;  %p1027_p8 = scmp.lt.s32.totalorder %s4608_s15, 3 }
  0x51   : > { %p1028_p9 = pnand %p3781_p7, %p1027_p8 }
  0x52   : > { %s5324_s5 = sld [smem:[#allocation5_spill]] (!%p1028_p9)  ;;  %p1117_p10 = scmp.lt.s32.totalorder (!%p1028_p9), %s4867_s0, 1  ;;  %vm1244_vm0 = vcmask (!%p1028_p9), 257024   ;;  %v1123_v7 = vld [vmem:[%s4674_s17] sm:$0xff] (!%p1028_p9)  ;;  %v1124_v8 = vld [vmem:[%s4674_s17 + $0x8] sm:$0xff] (!%p1028_p9)  ;;  %v4647_v10 = vmov (!%p1028_p9), 0.0|0.0  }
  0x53   : > { %1031 = sbr.rel (%p1028_p9) target bundleno = 6674 (0x1a12), region = 168  ;;  %v4288_v9 = vpack.c.bf16 (!%p1028_p9), %v1124_v8, %v1123_v7  ;;  %4287 = vmatprep.subr.bf16.mxu0 (!%p1028_p9), %v4647_v10  ;;  %s5325_s9 = sld [smem:[#allocation6_spill]] (!%p1028_p9)  ;;  %v1125_v11 = vld [vmem:[%s4674_s17 + $0x10] sm:$0xff] (!%p1028_p9)  ;;  %v1126_v12 = vld [vmem:[%s4674_s17 + $0x18] sm:$0xff] (!%p1028_p9)  ;;  %vm4648_vm1 = vmmov (!%p1028_p9), 0   ;;  %v4649_v14 = vmov (!%p1028_p9), 0.0  }
  0x54   : > { %v4291_v13 = vpack.c.bf16 (!%p1028_p9), %v1126_v12, %v1125_v11  ;;  %s5326_s13 = sld [smem:[#allocation7_spill]] (!%p1028_p9)  ;;  %3992 = vmatprep.mubr.msk.f32.mxu0 (!%p1028_p9), %vm4648_vm1, %v4649_v14  ;;  %4017 = vmatprep.subr.mxu1 (!%p1028_p9), %v4649_v14  ;;  %v1131_v21 = vld [vmem:[%s4679_s21] sm:$0xff] (!%p1028_p9)  ;;  %v1132_v22 = vld [vmem:[%s4679_s21 + $0x8] sm:$0xff] (!%p1028_p9)  ;;  %vm1279_vm2 = vcmask (!%p1028_p9), 261120   ;;  %v1133_v27 = vld [vmem:[%s4679_s21 + $0x10] sm:$0xff] (!%p1028_p9)  ;;  %vm1505_vm3 = vcmask (!%p1028_p9), 130048  }
  0x55   : > { %4289 = vmatpush3.bf16.msra.mxu0 (!%p1028_p9), %v4288_v9  ;;  %4019 = vmatprep.mubr.msk.f32.mxu1 (!%p1028_p9), %vm4648_vm1, %v4649_v14  ;;  %v4294_v25 = vpack.c.bf16 (!%p1028_p9), %v1132_v22, %v1131_v21  ;;  %v1134_v28 = vld [vmem:[%s4679_s21 + $0x18] sm:$0xff] (!%p1028_p9)  ;;  %v1139_v30 = vld [vmem:[%s4684_s25] sm:$0xff] (!%p1028_p9)  ;;  %v1140_v31 = vld [vmem:[%s4684_s25 + $0x8] sm:$0xff] (!%p1028_p9)  ;;  %vm1599_vm4 = vcmask (!%p1028_p9), 1043456   ;;  %vm1583_vm5 = vcmask (!%p1028_p9), 27648   ;;  %vm1595_vm6 = vcmask (!%p1028_p9), 31744  }
  0x56   : > { %4290 = vmatprep.subr.bf16.mxu0 (!%p1028_p9), %v4647_v10  ;;  %v4297_v29 = vpack.c.bf16 (!%p1028_p9), %v1134_v28, %v1133_v27  ;;  %v4300_v32 = vpack.c.bf16 (!%p1028_p9), %v1140_v31, %v1139_v30  ;;  %v1141_v33 = vld [vmem:[%s4684_s25 + $0x10] sm:$0xff] (!%p1028_p9)  ;;  %v1142_v34 = vld [vmem:[%s4684_s25 + $0x18] sm:$0xff] (!%p1028_p9)  ;;  %v1127_v36 = vld [vmem:[%s4674_s17 + $0x20] sm:$0xff] (!%p1028_p9)  ;;  %s5327_s23 = sld [smem:[#allocation11_spill]] (!%p1028_p9)  ;;  %vm2411_vm7 = vcmask (!%p1028_p9), 256000   ;;  %vm2763_vm8 = vcmask (!%p1028_p9), 1042432  }
  0x57   : > { %v4303_v35 = vpack.c.bf16 (!%p1028_p9), %v1142_v34, %v1141_v33  ;;  %v1128_v37 = vld [vmem:[%s4674_s17 + $0x28] sm:$0xff] (!%p1028_p9)  ;;  %v1129_v39 = vld [vmem:[%s4674_s17 + $0x30] sm:$0xff] (!%p1028_p9)  ;;  %v1130_v40 = vld [vmem:[%s4674_s17 + $0x38] sm:$0xff] (!%p1028_p9)  ;;  %vm2747_vm9 = vcmask (!%p1028_p9), 18432   ;;  %vm2759_vm10 = vcmask (!%p1028_p9), 23552   ;;  %vm3577_vm11 = vcmask (!%p1028_p9), 253952  }
  0x58   : > { %v4306_v38 = vpack.c.bf16 (!%p1028_p9), %v1128_v37, %v1127_v36  ;;  %v4309_v41 = vpack.c.bf16 (!%p1028_p9), %v1130_v40, %v1129_v39  ;;  %v1143_v42 = vld [vmem:[%s4684_s25 + $0x20] sm:$0xff] (!%p1028_p9)  ;;  %v1144_v43 = vld [vmem:[%s4684_s25 + $0x28] sm:$0xff] (!%p1028_p9)  ;;  %v1145_v45 = vld [vmem:[%s4684_s25 + $0x30] sm:$0xff] (!%p1028_p9)  ;;  %s5347_s12 = sld [smem:[#allocation32_spill]] (!%p1028_p9)  ;;  %vm3671_vm12 = vcmask (!%p1028_p9), 73728  }
  0x59   : > { %4292 = vmatpush3.bf16.msra.mxu0 (!%p1028_p9), %v4291_v13  ;;  %v3783_v19 = vld [vmem:[%s5325_s9] ss:$0 sm:$0xff] (!%p1028_p9)  ;;  %v4318_v44 = vpack.c.bf16 (!%p1028_p9), %v1144_v43, %v1143_v42  ;;  %v1146_v46 = vld [vmem:[%s4684_s25 + $0x38] sm:$0xff] (!%p1028_p9)  ;;  %v1136_v13 = vld [vmem:[%s4679_s21 + $0x28] sm:$0xff] (!%p1028_p9) }
  0x5a   : > { %s1118_s2 = scalar_select %p1117_p10, %s4867_s0, 1  ;;  %4293 = vmatprep.subr.bf16.mxu0 %v4647_v10  ;;  %v3784_v23 = vld [vmem:[%s5326_s13] ss:$0 sm:$0xff]  ;;  %v4321_v47 = vpack.c.bf16 %v1146_v46, %v1145_v45  ;;  %v1155_v40 = vld [vmem:[%s5318_s14 + $0x10] sm:$0xff]  ;;  %v1154_v45 = vld [vmem:[%s5318_s14 + $0x8] sm:$0xff] }
  0x5b   : > { %v3787_v50 = vld [vmem:[%s5321_s3] ss:$0 sm:$0xff] }
  0x5c   : > { %s3782_s16 = sshll.u32 %s1118_s2, 3  ;;  %v3785_v52 = vld [vmem:[%s4689_s29] ss:$0 sm:$0xff]  ;;  %s5328_s2 = sld [smem:[#allocation13_spill]] }
  0x5d   : > { %s1120_s22 = scalar_lea.vmem %s5324_s5, %s3782_s16  ;;  %v3789_v56 = vld [vmem:[%s5319_s8] ss:$0 sm:$0xff]  ;;  %s5329_s16 = sld [smem:[#allocation14_spill]] }
  0x5e   : > { %v4897_v0 = vld [vmem:[%s1120_s22] sm:$0x1f]  ;;  %s5330_s22 = sld [smem:[#allocation17_spill]]  ;;  %s5337_s5 = sld [smem:[#allocation22_spill]] }
  0x5f   : > { %v1245_v1 = vsel %vm1244_vm0, %v4897_v0, 0.0  ;;  %v1135_v12 = vld [vmem:[%s4679_s21 + $0x20] sm:$0xff] }
  0x60   : > { %1246 = vadd.xlane.f32.xlu0 %v1245_v1 }
  0xed   : > { %v1247_v2 = vpop.xlane.xlu0 %1246 }
  0xee   : > { %v1249_v3 = vmul.f32 0.03125, %v1247_v2 }
  0xf0   : > { %v1250_v4 = vsub.f32 %v4897_v0, %v1249_v3 }
  0xf2   : > { %v1251_v5 = vmul.f32 %v1250_v4, %v1250_v4 }
  0xf4   : > { %v1252_v6 = vsel %vm1244_vm0, %v1251_v5, 0.0 }
  0xf5   : > { %1253 = vadd.xlane.f32.xlu0 %v1252_v6 }
 0x182   : > { %v1254_v15 = vpop.xlane.xlu0 %1253 }
 0x183   : > { %v1255_v16 = vmul.f32 0.03125, %v1254_v15 }
 0x185   : > { %v1256_v17 = vadd.f32 1e-06, %v1255_v16  ;;  %v4312_v16 = vpack.c.bf16 %v1136_v13, %v1135_v12 }
 0x187   : > { %4516 = vrsqrt.f32 %v1256_v17 }
 0x191   : > { %v4517_v18 = vpop.eup %4516 }
 0x192   : > { %v1258_v20 = vmul.f32 %v4517_v18, %v1250_v4  ;;  %v1137_v18 = vld [vmem:[%s4679_s21 + $0x30] sm:$0xff] }
 0x194   : > { %v1265_v24 = vmul.f32 %v3783_v19, %v1258_v20  ;;  %v1138_v19 = vld [vmem:[%s4679_s21 + $0x38] sm:$0xff] }
 0x195   : > { %v4315_v20 = vpack.c.bf16 %v1138_v19, %v1137_v18  ;;  %v3809_v18 = vld [vmem:[%s5327_s23] ss:$0 sm:$0xff]  ;;  %s5331_s23 = sld [smem:[#allocation15_spill]] }
 0x196   : > { %v4919_v26 = vadd.f32 %v3784_v23, %v1265_v24  ;;  %v3797_v23 = vld [vmem:[%s5321_s3 + $0x1] ss:$0 sm:$0xff]  ;;  %s5334_s3 = sld [smem:[#allocation19_spill]] }
 0x198   : > { %3993 = vmatmul.mubr.msk.f32.vlgmr.msra.gmra.mrb[0].mxu0 %vm1279_vm2, %v4919_v26 }
 0x199   : > { %4295 = vmatpush3.bf16.msra.mxu0 %v4294_v25  ;;  %4003 = vmatprep.mubr.msk.f32.mxu0 %vm4648_vm1, %v4649_v14  ;;  %v3795_v25 = vld [vmem:[%s4689_s29 + $0x1] ss:$0 sm:$0xff] }
 0x19a   : > { %4296 = vmatprep.subr.bf16.mxu0 %v4647_v10 }
 0x19d   : > { %4298 = vmatpush3.bf16.msra.mxu0 %v4297_v29  ;;  %v3799_v29 = vld [vmem:[%s5319_s8 + $0x1] ss:$0 sm:$0xff] }
 0x19e   : > { %4299 = vmatprep.subr.bf16.mxu0 %v4647_v10 }
 0x1a0   : > { %4004 = vmatmul.mubr.msk.f32.vlgmr.msra.gmra.mrb[2].mxu0 %vm1279_vm2, %v4919_v26 }
 0x1a1   : > { %4301 = vmatpush3.bf16.msra.mxu0 %v4300_v32  ;;  %4014 = vmatprep.mubr.msk.f32.mxu0 %vm4648_vm1, %v4649_v14 }
 0x1a2   : > { %4302 = vmatprep.subr.bf16.mxu0 %v4647_v10 }
 0x1a5   : > { %4304 = vmatpush3.bf16.msra.mxu0 %v4303_v35 }
 0x1a6   : > { %4305 = vmatprep.subr.bf16.mxu0 %v4647_v10 }
 0x1a8   : > { %4015 = vmatmul.mubr.msk.f32.vlgmr.msra.gmra.mrb[4].mxu0 %vm1279_vm2, %v4919_v26 }
 0x1a9   : > { %4307 = vmatpush3.bf16.msra.mxu0 %v4306_v38  ;;  %4035 = vmatprep.mubr.msk.f32.mxu0 %vm4648_vm1, %v4649_v14 }
 0x1aa   : > { %4308 = vmatprep.subr.bf16.mxu0 %v4647_v10 }
 0x1ad   : > { %4310 = vmatpush3.bf16.msra.mxu0 %v4309_v41  ;;  %v1156_v41 = vld [vmem:[%s5318_s14 + $0x18] sm:$0xff] }
 0x1ae   : > { %4317 = vmatprep.subr.bf16.mxu0 %v4647_v10  ;;  %v4324_v42 = vpack.c.bf16 %v1156_v41, %v1155_v40  ;;  %v1180_v40 = vld [vmem:[%s4734_s20 + $0x78] sm:$0xff] }
 0x1b0   : > { %4036 = vmatmul.mubr.msk.f32.vlgmr.msra.gmra.mrb[6].mxu0 %vm1279_vm2, %v4919_v26 }
 0x1b1   : > { %4319 = vmatpush3.bf16.msra.mxu0 %v4318_v44  ;;  %4057 = vmatprep.mubr.msk.f32.mxu0 %vm4648_vm1, %v4649_v14  ;;  %v1153_v44 = vld [vmem:[%s5318_s14] sm:$0xff] }
 0x1b2   : > { %4320 = vmatprep.subr.bf16.mxu0 %v4647_v10 }
 0x1b5   : > { %4322 = vmatpush3.bf16.msra.mxu0 %v4321_v47  ;;  %v4327_v47 = vpack.c.bf16 %v1154_v45, %v1153_v44 }
 0x1b6   : > { %4323 = vmatprep.subr.bf16.mxu0 %v4647_v10 }
 0x1b8   : > { %4058 = vmatmul.mubr.msk.f32.vlgmr.msra.gmra.mrb[8].mxu0 %vm1279_vm2, %v4919_v26 }
 0x1b9   : > { %4074 = vmatprep.mubr.msk.f32.mxu0 %vm4648_vm1, %v4649_v14  ;;  %4325 = vmatpush3.bf16.msra.mxu0 %v4324_v42  ;;  %v3810_v42 = vld [vmem:[%s5328_s2] ss:$0 sm:$0xff]  ;;  %s5332_s2 = sld [smem:[#allocation18_spill]] }
 0x1ba   : > { %4329 = vmatprep.subr.bf16.mxu0 %v4647_v10 }
 0x26b   : > { %v1349_v48 = vpop.f32.mrb[0].mxu0 }
 0x26c   : > { %v3994_v49 = vpop.f32.mrb[1].mxu0  ;;  %v1350_v55 = vadd.f32 %v3785_v52, %v1349_v48 }
 0x273   : > { %v1425_v51 = vpop.f32.mrb[2].mxu0 }
 0x274   : > { %v1426_v53 = vadd.f32 %v3787_v50, %v1425_v51  ;;  %v4005_v54 = vpop.f32.mrb[3].mxu0 }
 0x276   : > { %4018 = vmatpush3.xpose.msk.msra.mxu1 %vm1505_vm3, %v1426_v53 }
 0x277   : > { %4022 = vmatprep.subr.mxu1 %v4649_v14 }
 0x279   : > { %4020 = vmatmul.mubr.msk.f32.vlgmr.msra.gmra.mrb[0].mxu1 %vm1505_vm3, %v1350_v55 }
 0x27a   : > { %4024 = vmatprep.mubr.msk.f32.mxu1 %vm4648_vm1, %v4649_v14 }
 0x27b   : > { %v1501_v57 = vpop.f32.mrb[4].mxu0 }
 0x27c   : > { %v1502_v58 = vadd.f32 %v3789_v56, %v1501_v57  ;;  %v4016_v59 = vpop.f32.mrb[5].mxu0  ;;  %v3807_v56 = vld [vmem:[%s4709_s19] ss:$0 sm:$0xff] }
 0x27e   : > { %4023 = vmatpush3.msk.msra.mxu1 %vm1599_vm4, %v1502_v58 }
 0x27f   : > { %4311 = vmatprep.subr.bf16.mxu1 %v4647_v10 }
 0x283   : > { %v1745_v60 = vpop.f32.mrb[6].mxu0 }
 0x284   : > { %v4037_v61 = vpop.f32.mrb[7].mxu0  ;;  %v1746_v30 = vadd.f32 %v3795_v25, %v1745_v60  ;;  %v1170_v25 = vld [vmem:[%s4734_s20 + $0x28] sm:$0xff] }
 0x28b   : > { %v1897_v62 = vpop.f32.mrb[8].mxu0 }
 0x28c   : > { %v4059_v63 = vpop.f32.mrb[9].mxu0  ;;  %v1898_v31 = vadd.f32 %v3799_v29, %v1897_v62  ;;  %v1172_v29 = vld [vmem:[%s4734_s20 + $0x38] sm:$0xff] }
 0x34c   : > { %v1578_v1 = vpop.f32.mrb[0].mxu1 }
 0x34d   : > { %v1582_v2 = vmul.f32 0.25, %v1578_v1  ;;  %v4021_v3 = vpop.f32.mrb[1].mxu1 }
 0x34e   : > { %v1161_v3 = vld [vmem:[%s5320_s6 + $0x8] sm:$0xff] }
 0x34f   : > { %v1584_v4 = vsel %vm1583_vm5, %v1582_v2, -inf }
 0x350   : > { %1585 = vmax.xlane.f32.xlu1 %v1584_v4  ;;  %v1162_v4 = vld [vmem:[%s5320_s6 + $0x10] sm:$0xff] }
 0x3dd   : > { %v1586_v5 = vpop.xlane.xlu1 %1585 }
 0x3de   : > { %v1587_v6 = vsub.f32 %v1582_v2, %v1586_v5  ;;  %v1160_v2 = vld [vmem:[%s5320_s6] sm:$0xff]  ;;  %v1163_v5 = vld [vmem:[%s5320_s6 + $0x18] sm:$0xff]  ;;  %s5343_s6 = sld [smem:[#allocation26_spill]] }
 0x3e0   : > { %v1588_v7 = vmul.f32 1.442695, %v1587_v6  ;;  %v4333_v6 = vpack.c.bf16 %v1163_v5, %v1162_v4  ;;  %v1185_v4 = vld [vmem:[%s5330_s22 + $0x8] sm:$0xff] }
 0x3e2   : > { %4518 = vpow2.f32 %v1588_v7  ;;  %v1165_v7 = vld [vmem:[%s4734_s20] sm:$0xff] }
 0x3ec   : > { %v4519_v8 = vpop.eup %4518 }
 0x3ed   : > { %v1590_v9 = vsel %vm1583_vm5, %v4519_v8, 0.0 }
 0x3ee   : > { %1591 = vadd.xlane.f32.xlu1 %v1590_v9 }
 0x47b   : > { %v1592_v11 = vpop.xlane.xlu1 %1591 }
 0x47c   : > { %4520 = vrcp.f32 %v1592_v11 }
 0x486   : > { %v4521_v15 = vpop.eup %4520 }
 0x487   : > { %v1594_v17 = vmul.f32 %v4521_v15, %v4519_v8  ;;  %v1166_v8 = vld [vmem:[%s4734_s20 + $0x8] sm:$0xff] }
 0x488   : > { %v4336_v9 = vpack.c.bf16 %v1166_v8, %v1165_v7 }
 0x489   : > { %4025 = vmatmul.mubr.msk.f32.vlgmr.msra.gmra.mrb[2].mxu1 %vm1595_vm6, %v1594_v17 }
 0x48a   : > { %4313 = vmatpush3.bf16.msra.mxu1 %v4312_v16  ;;  %4046 = vmatprep.mubr.msk.f32.mxu1 %vm4648_vm1, %v4649_v14  ;;  %v3808_v16 = vld [vmem:[%s4714_s24] ss:$0 sm:$0xff] }
 0x48b   : > { %4314 = vmatprep.subr.bf16.mxu1 %v4647_v10 }
 0x48e   : > { %4316 = vmatpush3.bf16.msra.mxu1 %v4315_v20 }
 0x48f   : > { %4060 = vmatprep.subr.mxu1 %v4649_v14 }
 0x491   : > { %4047 = vmatmul.mubr.msk.f32.vlgmr.msra.gmra.mrb[4].mxu1 %vm1279_vm2, %v4919_v26 }
 0x492   : > { %4062 = vmatprep.mubr.msk.f32.mxu1 %vm4648_vm1, %v4649_v14 }
 0x55c   : > { %v1669_v21 = vpop.f32.mrb[2].mxu1 }
 0x55d   : > { %v4026_v22 = vpop.f32.mrb[3].mxu1 }
 0x55e   : > { %v1168_v22 = vld [vmem:[%s4734_s20 + $0x18] sm:$0xff] }
 0x564   : > { %v1821_v24 = vpop.f32.mrb[4].mxu1 }
 0x565   : > { %v1822_v27 = vadd.f32 %v3797_v23, %v1821_v24  ;;  %v4048_v28 = vpop.f32.mrb[5].mxu1  ;;  %v1169_v24 = vld [vmem:[%s4734_s20 + $0x20] sm:$0xff] }
 0x566   : > { %v1171_v28 = vld [vmem:[%s4734_s20 + $0x30] sm:$0xff] }
 0x567   : > { %4061 = vmatpush3.xpose.msk.msra.mxu1 %vm1505_vm3, %v1822_v27  ;;  %v4342_v27 = vpack.c.bf16 %v1170_v25, %v1169_v24  ;;  %v1200_v25 = vld [vmem:[%s5334_s3] sm:$0xff] }
 0x568   : > { %4065 = vmatprep.subr.mxu1 %v4649_v14 }
 0x56a   : > { %4063 = vmatmul.mubr.msk.f32.vlgmr.msra.gmra.mrb[6].mxu1 %vm1505_vm3, %v1746_v30  ;;  %v4345_v30 = vpack.c.bf16 %v1172_v29, %v1171_v28  ;;  %v1202_v29 = vld [vmem:[%s5334_s3 + $0x10] sm:$0xff] }
 0x56b   : > { %4066 = vmatpush3.msk.msra.mxu1 %vm1599_vm4, %v1898_v31  ;;  %4067 = vmatprep.mubr.msk.f32.mxu1 %vm4648_vm1, %v4649_v14  ;;  %v1173_v31 = vld [vmem:[%s4734_s20 + $0x40] sm:$0xff] }
 0x56c   : > { %4326 = vmatprep.subr.bf16.mxu1 %v4647_v10 }
 0x63d   : > { %v1973_v26 = vpop.f32.mrb[6].mxu1 }
 0x63e   : > { %v1977_v32 = vmul.f32 0.25, %v1973_v26  ;;  %v4064_v33 = vpop.f32.mrb[7].mxu1  ;;  %v1174_v26 = vld [vmem:[%s4734_s20 + $0x48] sm:$0xff] }
 0x63f   : > { %v1175_v33 = vld [vmem:[%s4734_s20 + $0x50] sm:$0xff] }
 0x640   : > { %v1978_v34 = vsel %vm1583_vm5, %v1977_v32, -inf }
 0x641   : > { %1979 = vmax.xlane.f32.xlu0 %v1978_v34  ;;  %v1176_v34 = vld [vmem:[%s4734_s20 + $0x58] sm:$0xff] }
 0x6ce   : > { %v1980_v35 = vpop.xlane.xlu0 %1979 }
 0x6cf   : > { %v1981_v36 = vsub.f32 %v1977_v32, %v1980_v35  ;;  %v4348_v32 = vpack.c.bf16 %v1174_v26, %v1173_v31  ;;  %v4351_v35 = vpack.c.bf16 %v1176_v34, %v1175_v33 }
 0x6d1   : > { %v1982_v37 = vmul.f32 1.442695, %v1981_v36  ;;  %v1177_v36 = vld [vmem:[%s4734_s20 + $0x60] sm:$0xff] }
 0x6d3   : > { %4522 = vpow2.f32 %v1982_v37  ;;  %v1178_v37 = vld [vmem:[%s4734_s20 + $0x68] sm:$0xff] }
 0x6dd   : > { %v4523_v38 = vpop.eup %4522 }
 0x6de   : > { %v1984_v39 = vsel %vm1583_vm5, %v4523_v38, 0.0 }
 0x6df   : > { %1985 = vadd.xlane.f32.xlu1 %v1984_v39  ;;  %v1179_v39 = vld [vmem:[%s4734_s20 + $0x70] sm:$0xff] }
 0x6e0   : > { %v4357_v41 = vpack.c.bf16 %v1180_v40, %v1179_v39 }
 0x76c   : > { %v1986_v43 = vpop.xlane.xlu1 %1985 }
 0x76d   : > { %4524 = vrcp.f32 %v1986_v43 }
 0x777   : > { %v4525_v46 = vpop.eup %4524 }
 0x778   : > { %v1988_v48 = vmul.f32 %v4525_v46, %v4523_v38  ;;  %v4354_v38 = vpack.c.bf16 %v1178_v37, %v1177_v36  ;;  %v1189_v36 = vld [vmem:[%s5330_s22 + $0x28] sm:$0xff] }
 0x77a   : > { %4068 = vmatmul.mubr.msk.f32.vlgmr.msra.gmra.mrb[8].mxu1 %vm1595_vm6, %v1988_v48 }
 0x77b   : > { %4328 = vmatpush3.bf16.msra.mxu1 %v4327_v47  ;;  %4081 = vmatprep.mubr.msk.f32.mxu1 %vm4648_vm1, %v4649_v14 }
 0x77c   : > { %4335 = vmatprep.subr.bf16.mxu1 %v4647_v10 }
 0x77e   : > { %4082 = vmatmul.mubr.msk.f32.vlgmr.msra.gmra.mrb[10].mxu1 %vm1505_vm3, %v1669_v21  ;;  %v1167_v21 = vld [vmem:[%s4734_s20 + $0x10] sm:$0xff] }
 0x77f   : > { %4127 = vmatprep.mubr.msk.f32.mxu1 %vm4648_vm1, %v4649_v14  ;;  %4337 = vmatpush3.bf16.msra.mxu1 %v4336_v9  ;;  %v4339_v23 = vpack.c.bf16 %v1168_v22, %v1167_v21  ;;  %v1194_v22 = vld [vmem:[%s5332_s2 + $0x10] sm:$0xff] }
 0x780   : > { %4338 = vmatprep.subr.bf16.mxu1 %v4647_v10 }
 0x783   : > { %4340 = vmatpush3.bf16.msra.mxu1 %v4339_v23  ;;  %v1195_v23 = vld [vmem:[%s5332_s2 + $0x18] sm:$0xff] }
 0x784   : > { %4341 = vmatprep.subr.bf16.mxu1 %v4647_v10  ;;  %v4369_v24 = vpack.c.bf16 %v1195_v23, %v1194_v22 }
 0x787   : > { %4343 = vmatpush3.bf16.msra.mxu1 %v4342_v27  ;;  %v1201_v27 = vld [vmem:[%s5334_s3 + $0x8] sm:$0xff] }
 0x788   : > { %4344 = vmatprep.subr.bf16.mxu1 %v4647_v10  ;;  %v4372_v28 = vpack.c.bf16 %v1201_v27, %v1200_v25 }
 0x78b   : > { %4346 = vmatpush3.bf16.msra.mxu1 %v4345_v30  ;;  %v1203_v30 = vld [vmem:[%s5334_s3 + $0x18] sm:$0xff] }
 0x78c   : > { %4347 = vmatprep.subr.bf16.mxu1 %v4647_v10  ;;  %v4375_v31 = vpack.c.bf16 %v1203_v30, %v1202_v29 }
 0x78f   : > { %4349 = vmatpush3.bf16.msra.mxu1 %v4348_v32 }
 0x790   : > { %4350 = vmatprep.subr.bf16.mxu1 %v4647_v10 }
 0x793   : > { %4352 = vmatpush3.bf16.msra.mxu1 %v4351_v35  ;;  %v1188_v35 = vld [vmem:[%s5330_s22 + $0x20] sm:$0xff] }
 0x794   : > { %4353 = vmatprep.subr.bf16.mxu1 %v4647_v10  ;;  %v4378_v40 = vpack.c.bf16 %v1189_v36, %v1188_v35 }
 0x797   : > { %4355 = vmatpush3.bf16.msra.mxu1 %v4354_v38 }
 0x798   : > { %4356 = vmatprep.subr.bf16.mxu1 %v4647_v10 }
 0x79b   : > { %4358 = vmatpush3.bf16.msra.mxu1 %v4357_v41 }
 0x79c   : > { %4168 = vmatprep.subr.mxu1 %v4649_v14 }
 0x84d   : > { %v2061_v49 = vpop.f32.mrb[8].mxu1 }
 0x84e   : > { %v4069_v50 = vpop.f32.mrb[9].mxu1  ;;  %4075 = vmatmul.mubr.msk.f32.vlgmr.msra.gmra.mrb[10].mxu0 %vm1505_vm3, %v2061_v49 }
 0x84f   : > { %4092 = vmatprep.mubr.msk.f32.mxu0 %vm4648_vm1, %v4649_v14 }
 0x851   : > { %v2207_v51 = vpop.f32.mrb[10].mxu1 }
 0x852   : > { %v4083_v52 = vpop.f32.mrb[11].mxu1 }
 0x921   : > { %v2134_v53 = vpop.f32.mrb[10].mxu0 }
 0x922   : > { %v2208_v54 = vadd.f32 %v2207_v51, %v2134_v53  ;;  %v4076_v55 = vpop.f32.mrb[11].mxu0 }
 0x923   : > { %v3812_v55 = vld [vmem:[%s5329_s16] ss:$0 sm:$0xff]  ;;  %s5333_s16 = sld [smem:[#allocation16_spill]] }
 0x924   : > { %v2211_v57 = vadd.f32 %v2208_v54, %v4897_v0  ;;  %v4330_v0 = vpack.c.bf16 %v1161_v3, %v1160_v2 }
 0x926   : > { %v5017_v58 = vadd.f32 %v3807_v56, %v2211_v57  ;;  %4331 = vmatpush3.bf16.msra.mxu0 %v4330_v0  ;;  %v1184_v0 = vld [vmem:[%s5330_s22] sm:$0xff] }
 0x927   : > { %4332 = vmatprep.subr.bf16.mxu0 %v4647_v10  ;;  %v4360_v5 = vpack.c.bf16 %v1185_v4, %v1184_v0 }
 0x928   : > { %v2219_v59 = vsel %vm1244_vm0, %v5017_v58, 0.0 }
 0x929   : > { %2220 = vadd.xlane.f32.xlu0 %v2219_v59 }
 0x92a   : > { %4334 = vmatpush3.bf16.msra.mxu0 %v4333_v6  ;;  %v1187_v6 = vld [vmem:[%s5330_s22 + $0x18] sm:$0xff] }
 0x92b   : > { %4359 = vmatprep.subr.bf16.mxu0 %v4647_v10 }
 0x9b6   : > { %v2221_v60 = vpop.xlane.xlu0 %2220 }
 0x9b7   : > { %v2222_v61 = vmul.f32 0.03125, %v2221_v60 }
 0x9b9   : > { %v2223_v62 = vsub.f32 %v5017_v58, %v2222_v61 }
 0x9bb   : > { %v2224_v63 = vmul.f32 %v2223_v62, %v2223_v62 }
 0x9bd   : > { %v2225_v1 = vsel %vm1244_vm0, %v2224_v63, 0.0 }
 0x9be   : > { %2226 = vadd.xlane.f32.xlu1 %v2225_v1 }
 0xa4b   : > { %v2227_v11 = vpop.xlane.xlu1 %2226 }
 0xa4c   : > { %v2228_v12 = vmul.f32 0.03125, %v2227_v11 }
 0xa4e   : > { %v2229_v13 = vadd.f32 1e-06, %v2228_v12 }
 0xa50   : > { %4526 = vrsqrt.f32 %v2229_v13  ;;  %v3813_v13 = vld [vmem:[%s5331_s23] ss:$0 sm:$0xff]  ;;  %s5335_s23 = sld [smem:[#allocation21_spill]] }
 0xa56   : > { %v3817_v33 = vld [vmem:[%s5335_s23] ss:$0 sm:$0xff] }
 0xa5a   : > { %v4527_v15 = vpop.eup %4526 }
 0xa5b   : > { %v2231_v17 = vmul.f32 %v4527_v15, %v2223_v62 }
 0xa5d   : > { %v2238_v19 = vmul.f32 %v3808_v16, %v2231_v17  ;;  %v1192_v16 = vld [vmem:[%s5332_s2] sm:$0xff]  ;;  %v1193_v17 = vld [vmem:[%s5332_s2 + $0x8] sm:$0xff] }
 0xa5f   : > { %v2245_v20 = vadd.f32 %v3809_v18, %v2238_v19  ;;  %v3814_v18 = vld [vmem:[%s5333_s16] ss:$0 sm:$0xff]  ;;  %s5336_s16 = sld [smem:[#allocation20_spill]] }
 0xa61   : > { %4093 = vmatmul.mubr.msk.f32.vlgmr.msra.gmra.mrb[12].mxu0 %vm1279_vm2, %v2245_v20  ;;  %v4366_v20 = vpack.c.bf16 %v1193_v17, %v1192_v16 }
 0xa62   : > { %4138 = vmatprep.mubr.msk.f32.mxu0 %vm4648_vm1, %v4649_v14  ;;  %4361 = vmatpush3.bf16.msra.mxu0 %v4360_v5 }
 0xa63   : > { %4362 = vmatprep.subr.bf16.mxu0 %v4647_v10 }
 0xa65   : > { %v3815_v37 = vld [vmem:[%s5336_s16] ss:$0 sm:$0xff] }
 0xb34   : > { %v2321_v43 = vpop.f32.mrb[12].mxu0 }
 0xb35   : > { %v2322_v44 = vadd.f32 %v3810_v42, %v2321_v43  ;;  %v4094_v45 = vpop.f32.mrb[13].mxu0  ;;  %v1190_v42 = vld [vmem:[%s5330_s22 + $0x30] sm:$0xff]  ;;  %v1191_v43 = vld [vmem:[%s5330_s22 + $0x38] sm:$0xff] }
 0xb36   : > { %v4381_v45 = vpack.c.bf16 %v1191_v43, %v1190_v42 }
 0xb37   : > { %v2325_v46 = vmul.f32 %v2322_v44, %v2322_v44 }
 0xb39   : > { %v2326_v47 = vmul.f32 %v2325_v46, %v2322_v44 }
 0xb3b   : > { %v2327_v48 = vmul.f32 0.044715, %v2326_v47  ;;  %v1204_v47 = vld [vmem:[%s5334_s3 + $0x20] sm:$0xff] }
 0xb3d   : > { %v2328_v49 = vadd.f32 %v2327_v48, %v2322_v44  ;;  %v1205_v48 = vld [vmem:[%s5334_s3 + $0x28] sm:$0xff] }
 0xb3f   : > { %v2329_v50 = vmul.f32 0.7978846, %v2328_v49 }
 0xb41   : > { %4528 = vtanh.f32 %v2329_v50 }
 0xb4b   : > { %v4529_v51 = vpop.eup %4528 }
 0xb4c   : > { %v2331_v52 = vadd.f32 1.0, %v4529_v51  ;;  %v4390_v51 = vpack.c.bf16 %v1205_v48, %v1204_v47 }
 0xb4e   : > { %v2332_v53 = vmul.f32 0.5, %v2331_v52  ;;  %v1206_v52 = vld [vmem:[%s5334_s3 + $0x30] sm:$0xff] }
 0xb50   : > { %v2333_v54 = vmul.f32 %v2332_v53, %v2322_v44  ;;  %v3819_v44 = vld [vmem:[%s5337_s5] ss:$0 sm:$0xff]  ;;  %v1207_v53 = vld [vmem:[%s5334_s3 + $0x38] sm:$0xff]  ;;  %s5339_s3 = sld [smem:[#allocation24_spill]] }
 0xb52   : > { %4128 = vmatmul.mubr.f32.vlgmr.msra.gmra.mrb[12].mxu1 %v2333_v54  ;;  %v4393_v54 = vpack.c.bf16 %v1207_v53, %v1206_v52 }
 0xb53   : > { %4170 = vmatprep.mubr.msk.f32.mxu1 %vm4648_vm1, %v4649_v14 }
 0xc25   : > { %v2406_v56 = vpop.f32.mrb[12].mxu1 }
 0xc26   : > { %v2407_v57 = vadd.f32 %v3812_v55, %v2406_v56  ;;  %v4129_v59 = vpop.f32.mrb[13].mxu1 }
 0xc28   : > { %v5063_v60 = vadd.f32 %v2407_v57, %v5017_v58  ;;  %v1186_v58 = vld [vmem:[%s5330_s22 + $0x10] sm:$0xff] }
 0xc29   : > { %v4363_v7 = vpack.c.bf16 %v1187_v6, %v1186_v58  ;;  %v1196_v6 = vld [vmem:[%s5332_s2 + $0x20] sm:$0xff] }
 0xc2a   : > { %v2412_v61 = vsel %vm2411_vm7, %v5063_v60, 0.0 }
 0xc2b   : > { %2413 = vadd.xlane.f32.xlu0 %v2412_v61  ;;  %4364 = vmatpush3.bf16.msra.mxu0 %v4363_v7  ;;  %v1197_v7 = vld [vmem:[%s5332_s2 + $0x28] sm:$0xff] }
 0xc2c   : > { %4365 = vmatprep.subr.bf16.mxu0 %v4647_v10 }
 0xcb8   : > { %v2414_v62 = vpop.xlane.xlu0 %2413 }
 0xcb9   : > { %v2415_v63 = vmul.f32 0.03125, %v2414_v62 }
 0xcbb   : > { %v2416_v1 = vsub.f32 %v5063_v60, %v2415_v63 }
 0xcbd   : > { %v2417_v2 = vmul.f32 %v2416_v1, %v2416_v1 }
 0xcbf   : > { %v2418_v3 = vsel %vm2411_vm7, %v2417_v2, 0.0 }
 0xcc0   : > { %2419 = vadd.xlane.f32.xlu1 %v2418_v3 }
 0xd4d   : > { %v2420_v8 = vpop.xlane.xlu1 %2419 }
 0xd4e   : > { %v2421_v9 = vmul.f32 0.03125, %v2420_v8 }
 0xd50   : > { %v2422_v11 = vadd.f32 1e-06, %v2421_v9  ;;  %v4384_v9 = vpack.c.bf16 %v1197_v7, %v1196_v6 }
 0xd52   : > { %4530 = vrsqrt.f32 %v2422_v11 }
 0xd5c   : > { %v4531_v12 = vpop.eup %4530 }
 0xd5d   : > { %v2424_v15 = vmul.f32 %v4531_v12, %v2416_v1  ;;  %v1198_v12 = vld [vmem:[%s5332_s2 + $0x30] sm:$0xff] }
 0xd5f   : > { %v2431_v19 = vmul.f32 %v3813_v13, %v2424_v15  ;;  %v1199_v13 = vld [vmem:[%s5332_s2 + $0x38] sm:$0xff]  ;;  %s5338_s2 = sld [smem:[#allocation23_spill]] }
 0xd60   : > { %v4387_v15 = vpack.c.bf16 %v1199_v13, %v1198_v12  ;;  %v3839_v12 = vld [vmem:[%s5343_s6] ss:$0 sm:$0xff]  ;;  %s5344_s6 = sld [smem:[#allocation28_spill]] }
 0xd61   : > { %v5079_v21 = vadd.f32 %v3814_v18, %v2431_v19  ;;  %v3827_v18 = vld [vmem:[%s5335_s23 + $0x1] ss:$0 sm:$0xff] }
 0xd63   : > { %4139 = vmatmul.mubr.msk.f32.vlgmr.msra.gmra.mrb[14].mxu0 %vm1279_vm2, %v5079_v21 }
 0xd64   : > { %4367 = vmatpush3.bf16.msra.mxu0 %v4366_v20  ;;  %4149 = vmatprep.mubr.msk.f32.mxu0 %vm4648_vm1, %v4649_v14  ;;  %v3825_v20 = vld [vmem:[%s5336_s16 + $0x1] ss:$0 sm:$0xff] }
 0xd65   : > { %4368 = vmatprep.subr.bf16.mxu0 %v4647_v10  ;;  %v1216_v35 = vld [vmem:[%s5338_s2 + $0x10] sm:$0xff]  ;;  %v1217_v36 = vld [vmem:[%s5338_s2 + $0x18] sm:$0xff] }
 0xd68   : > { %4370 = vmatpush3.bf16.msra.mxu0 %v4369_v24  ;;  %v3829_v24 = vld [vmem:[%s5337_s5 + $0x1] ss:$0 sm:$0xff]  ;;  %s5341_s5 = sld [smem:[#allocation29_spill]] }
 0xd69   : > { %4371 = vmatprep.subr.bf16.mxu0 %v4647_v10 }
 0xd6b   : > { %4150 = vmatmul.mubr.msk.f32.vlgmr.msra.gmra.mrb[16].mxu0 %vm1279_vm2, %v5079_v21 }
 0xd6c   : > { %4373 = vmatpush3.bf16.msra.mxu0 %v4372_v28  ;;  %4160 = vmatprep.mubr.msk.f32.mxu0 %vm4648_vm1, %v4649_v14 }
 0xd6d   : > { %4374 = vmatprep.subr.bf16.mxu0 %v4647_v10 }
 0xd70   : > { %4376 = vmatpush3.bf16.msra.mxu0 %v4375_v31 }
 0xd71   : > { %4163 = vmatprep.subr.mxu0 %v4649_v14 }
 0xd73   : > { %4161 = vmatmul.mubr.msk.f32.vlgmr.msra.gmra.mrb[18].mxu0 %vm1279_vm2, %v5079_v21 }
 0xd74   : > { %4165 = vmatprep.mubr.msk.f32.mxu0 %vm4648_vm1, %v4649_v14 }
 0xe36   : > { %v2514_v26 = vpop.f32.mrb[14].mxu0 }
 0xe37   : > { %v4140_v32 = vpop.f32.mrb[15].mxu0  ;;  %v2515_v41 = vadd.f32 %v3815_v37, %v2514_v26  ;;  %v4396_v37 = vpack.c.bf16 %v1217_v36, %v1216_v35  ;;  %v3840_v36 = vld [vmem:[%s5344_s6] ss:$0 sm:$0xff]  ;;  %s5346_s6 = sld [smem:[#allocation31_spill]] }
 0xe3e   : > { %v2590_v34 = vpop.f32.mrb[16].mxu0 }
 0xe3f   : > { %v2591_v38 = vadd.f32 %v3817_v33, %v2590_v34  ;;  %v4151_v39 = vpop.f32.mrb[17].mxu0 }
 0xe40   : > { %v1214_v39 = vld [vmem:[%s5338_s2] sm:$0xff] }
 0xe41   : > { %4164 = vmatpush3.xpose.msk.msra.mxu0 %vm1505_vm3, %v2591_v38 }
 0xe42   : > { %4377 = vmatprep.subr.bf16.mxu0 %v4647_v10 }
 0xe44   : > { %4166 = vmatmul.mubr.msk.f32.vlgmr.msra.gmra.mrb[20].mxu0 %vm1505_vm3, %v2515_v41 }
 0xe45   : > { %4379 = vmatpush3.bf16.msra.mxu0 %v4378_v40  ;;  %4181 = vmatprep.mubr.msk.f32.mxu0 %vm4648_vm1, %v4649_v14  ;;  %v1215_v40 = vld [vmem:[%s5338_s2 + $0x8] sm:$0xff]  ;;  %s5340_s2 = sld [smem:[#allocation27_spill]] }
 0xe46   : > { %v2666_v46 = vpop.f32.mrb[18].mxu0  ;;  %4380 = vmatprep.subr.bf16.mxu0 %v4647_v10  ;;  %v4399_v42 = vpack.c.bf16 %v1215_v40, %v1214_v39 }
 0xe47   : > { %v2667_v49 = vadd.f32 %v3819_v44, %v2666_v46  ;;  %v4162_v50 = vpop.f32.mrb[19].mxu0 }
 0xe49   : > { %4169 = vmatpush3.msk.msra.mxu1 %vm2763_vm8, %v2667_v49  ;;  %4382 = vmatpush3.bf16.msra.mxu0 %v4381_v45 }
 0xe4a   : > { %4389 = vmatprep.subr.bf16.mxu0 %v4647_v10  ;;  %4383 = vmatprep.subr.bf16.mxu1 %v4647_v10 }
 0xe4c   : > { %4182 = vmatmul.mubr.msk.f32.vlgmr.msra.gmra.mrb[22].mxu0 %vm1279_vm2, %v5079_v21 }
 0xe4d   : > { %4391 = vmatpush3.bf16.msra.mxu0 %v4390_v51  ;;  %4203 = vmatprep.mubr.msk.f32.mxu0 %vm4648_vm1, %v4649_v14  ;;  %v3837_v51 = vld [vmem:[%s5339_s3] ss:$0 sm:$0xff]  ;;  %s5342_s3 = sld [smem:[#allocation25_spill]] }
 0xe4e   : > { %4392 = vmatprep.subr.bf16.mxu0 %v4647_v10 }
 0xe51   : > { %4394 = vmatpush3.bf16.msra.mxu0 %v4393_v54 }
 0xe52   : > { %4395 = vmatprep.subr.bf16.mxu0 %v4647_v10 }
 0xe54   : > { %4204 = vmatmul.mubr.msk.f32.vlgmr.msra.gmra.mrb[24].mxu0 %vm1279_vm2, %v5079_v21 }
 0xe55   : > { %4220 = vmatprep.mubr.msk.f32.mxu0 %vm4648_vm1, %v4649_v14  ;;  %4397 = vmatpush3.bf16.msra.mxu0 %v4396_v37 }
 0xe56   : > { %4401 = vmatprep.subr.bf16.mxu0 %v4647_v10 }
 0xf17   : > { %v2742_v55 = vpop.f32.mrb[20].mxu0 }
 0xf18   : > { %v2746_v56 = vmul.f32 0.25, %v2742_v55  ;;  %v4167_v57 = vpop.f32.mrb[21].mxu0 }
 0xf1a   : > { %v2748_v59 = vsel %vm2747_vm9, %v2746_v56, -inf }
 0xf1b   : > { %2749 = vmax.xlane.f32.xlu0 %v2748_v59 }
 0xf1f   : > { %v2909_v61 = vpop.f32.mrb[22].mxu0 }
 0xf20   : > { %v4183_v62 = vpop.f32.mrb[23].mxu0  ;;  %v2910_v25 = vadd.f32 %v3825_v20, %v2909_v61  ;;  %v1231_v20 = vld [vmem:[%s5341_s5 + $0x28] sm:$0xff] }
 0xf21   : > { %v1221_v62 = vld [vmem:[%s5340_s2] sm:$0xff] }
 0xf27   : > { %v3061_v63 = vpop.f32.mrb[24].mxu0 }
 0xf28   : > { %v4205_v1 = vpop.f32.mrb[25].mxu0  ;;  %v3062_v27 = vadd.f32 %v3829_v24, %v3061_v63  ;;  %v1222_v63 = vld [vmem:[%s5340_s2 + $0x8] sm:$0xff] }
 0xf29   : > { %v1223_v1 = vld [vmem:[%s5340_s2 + $0x10] sm:$0xff] }
 0xfa8   : > { %v2750_v2 = vpop.xlane.xlu0 %2749 }
 0xfa9   : > { %v2751_v3 = vsub.f32 %v2746_v56, %v2750_v2  ;;  %v1224_v2 = vld [vmem:[%s5340_s2 + $0x18] sm:$0xff]  ;;  %s3844_s2 = sshll.u32 %s4867_s0, 4  ;;  %s4650_s0 = smov [#allocation2]  }
 0xfaa   : > { %s5232_s9 = scalar_lea.hbm %s4844_s4, %s3844_s2  ;;  %s4550_s13 = sshll.u32 %s4650_s0, 4  ;;  %s4551_s13 = int_to_ptr.vmem [resolvable:$false] %s4550_s13 }
 0xfab   : > { %v2752_v0 = vmul.f32 1.442695, %v2751_v3  ;;  %v4405_v3 = vpack.c.bf16 %v1224_v2, %v1223_v1  ;;  %v3595_v2 = vld [vmem:[%s4834_s30 + $0x10] sm:$0xff]  ;;  %s4552_s14 = scalar_lea.vmem %s4551_s13, 32 }
 0xfad   : > { %4532 = vpow2.f32 %v2752_v0  ;;  %v1226_v0 = vld [vmem:[%s5341_s5] sm:$0xff] }
 0xfb7   : > { %v4533_v4 = vpop.eup %4532 }
 0xfb8   : > { %v2754_v5 = vsel %vm2747_vm9, %v4533_v4, 0.0 }
 0xfb9   : > { %2755 = vadd.xlane.f32.xlu1 %v2754_v5 }
0x1046   : > { %v2756_v58 = vpop.xlane.xlu1 %2755 }
0x1047   : > { %4534 = vrcp.f32 %v2756_v58 }
0x1051   : > { %v4535_v8 = vpop.eup %4534 }
0x1052   : > { %v2758_v11 = vmul.f32 %v4535_v8, %v4533_v4  ;;  %v1227_v4 = vld [vmem:[%s5341_s5 + $0x8] sm:$0xff] }
0x1053   : > { %v4408_v5 = vpack.c.bf16 %v1227_v4, %v1226_v0 }
0x1054   : > { %4171 = vmatmul.mubr.msk.f32.vlgmr.msra.gmra.mrb[14].mxu1 %vm2759_vm10, %v2758_v11 }
0x1055   : > { %4385 = vmatpush3.bf16.msra.mxu1 %v4384_v9  ;;  %4192 = vmatprep.mubr.msk.f32.mxu1 %vm4648_vm1, %v4649_v14  ;;  %v3838_v9 = vld [vmem:[%s5342_s3] ss:$0 sm:$0xff]  ;;  %s5345_s3 = sld [smem:[#allocation30_spill]] }
0x1056   : > { %4386 = vmatprep.subr.bf16.mxu1 %v4647_v10 }
0x1059   : > { %4388 = vmatpush3.bf16.msra.mxu1 %v4387_v15 }
0x105a   : > { %4206 = vmatprep.subr.mxu1 %v4649_v14 }
0x105c   : > { %4193 = vmatmul.mubr.msk.f32.vlgmr.msra.gmra.mrb[16].mxu1 %vm1279_vm2, %v5079_v21 }
0x105d   : > { %4208 = vmatprep.mubr.msk.f32.mxu1 %vm4648_vm1, %v4649_v14 }
0x1127   : > { %v2833_v16 = vpop.f32.mrb[14].mxu1 }
0x1128   : > { %v4172_v17 = vpop.f32.mrb[15].mxu1 }
0x1129   : > { %v1229_v17 = vld [vmem:[%s5341_s5 + $0x18] sm:$0xff] }
0x112f   : > { %v2985_v19 = vpop.f32.mrb[16].mxu1 }
0x1130   : > { %v2986_v22 = vadd.f32 %v3827_v18, %v2985_v19  ;;  %v4194_v23 = vpop.f32.mrb[17].mxu1  ;;  %v1230_v19 = vld [vmem:[%s5341_s5 + $0x20] sm:$0xff] }
0x1131   : > { %v1232_v23 = vld [vmem:[%s5341_s5 + $0x30] sm:$0xff] }
0x1132   : > { %4207 = vmatpush3.xpose.msk.msra.mxu1 %vm1505_vm3, %v2986_v22  ;;  %v4414_v22 = vpack.c.bf16 %v1231_v20, %v1230_v19 }
0x1133   : > { %4211 = vmatprep.subr.mxu1 %v4649_v14 }
0x1135   : > { %4209 = vmatmul.mubr.msk.f32.vlgmr.msra.gmra.mrb[18].mxu1 %vm1505_vm3, %v2910_v25  ;;  %v1234_v25 = vld [vmem:[%s5341_s5 + $0x40] sm:$0xff] }
0x1136   : > { %4212 = vmatpush3.msk.msra.mxu1 %vm2763_vm8, %v3062_v27  ;;  %4213 = vmatprep.mubr.msk.f32.mxu1 %vm4648_vm1, %v4649_v14  ;;  %v1235_v27 = vld [vmem:[%s5341_s5 + $0x48] sm:$0xff] }
0x1137   : > { %4398 = vmatprep.subr.bf16.mxu1 %v4647_v10 }
0x1208   : > { %v3137_v21 = vpop.f32.mrb[18].mxu1 }
0x1209   : > { %v3141_v28 = vmul.f32 0.25, %v3137_v21  ;;  %v4210_v29 = vpop.f32.mrb[19].mxu1  ;;  %v4420_v21 = vpack.c.bf16 %v1235_v27, %v1234_v25 }
0x120a   : > { %v1237_v29 = vld [vmem:[%s5341_s5 + $0x58] sm:$0xff] }
0x120b   : > { %v3142_v30 = vsel %vm2747_vm9, %v3141_v28, -inf }
0x120c   : > { %3143 = vmax.xlane.f32.xlu0 %v3142_v30 }
0x1299   : > { %v3144_v31 = vpop.xlane.xlu0 %3143 }
0x129a   : > { %v3145_v26 = vsub.f32 %v3141_v28, %v3144_v31  ;;  %v1236_v28 = vld [vmem:[%s5341_s5 + $0x50] sm:$0xff]  ;;  %v1238_v31 = vld [vmem:[%s5341_s5 + $0x60] sm:$0xff] }
0x129b   : > { %v4423_v30 = vpack.c.bf16 %v1237_v29, %v1236_v28 }
0x129c   : > { %v3146_v32 = vmul.f32 1.442695, %v3145_v26  ;;  %v1239_v26 = vld [vmem:[%s5341_s5 + $0x68] sm:$0xff] }
0x129e   : > { %4536 = vpow2.f32 %v3146_v32  ;;  %v4426_v32 = vpack.c.bf16 %v1239_v26, %v1238_v31 }
0x12a8   : > { %v4537_v33 = vpop.eup %4536 }
0x12a9   : > { %v3148_v34 = vsel %vm2747_vm9, %v4537_v33, 0.0 }
0x12aa   : > { %3149 = vadd.xlane.f32.xlu1 %v3148_v34  ;;  %v1241_v34 = vld [vmem:[%s5341_s5 + $0x78] sm:$0xff] }
0x1337   : > { %v3150_v38 = vpop.xlane.xlu1 %3149 }
0x1338   : > { %4538 = vrcp.f32 %v3150_v38 }
0x1342   : > { %v4539_v41 = vpop.eup %4538 }
0x1343   : > { %v3152_v43 = vmul.f32 %v4539_v41, %v4537_v33  ;;  %v1240_v33 = vld [vmem:[%s5341_s5 + $0x70] sm:$0xff] }
0x1344   : > { %v4429_v35 = vpack.c.bf16 %v1241_v34, %v1240_v33 }
0x1345   : > { %4214 = vmatmul.mubr.msk.f32.vlgmr.msra.gmra.mrb[20].mxu1 %vm2759_vm10, %v3152_v43 }
0x1346   : > { %4400 = vmatpush3.bf16.msra.mxu1 %v4399_v42  ;;  %4227 = vmatprep.mubr.msk.f32.mxu1 %vm4648_vm1, %v4649_v14 }
0x1347   : > { %4407 = vmatprep.subr.bf16.mxu1 %v4647_v10 }
0x1349   : > { %4228 = vmatmul.mubr.msk.f32.vlgmr.msra.gmra.mrb[22].mxu1 %vm1505_vm3, %v2833_v16  ;;  %v1228_v16 = vld [vmem:[%s5341_s5 + $0x10] sm:$0xff] }
0x134a   : > { %4273 = vmatprep.mubr.msk.f32.mxu1 %vm4648_vm1, %v4649_v14  ;;  %4409 = vmatpush3.bf16.msra.mxu1 %v4408_v5  ;;  %v4411_v18 = vpack.c.bf16 %v1229_v17, %v1228_v16 }
0x134b   : > { %4410 = vmatprep.subr.bf16.mxu1 %v4647_v10 }
0x134e   : > { %4412 = vmatpush3.bf16.msra.mxu1 %v4411_v18 }
0x134f   : > { %4413 = vmatprep.subr.bf16.mxu1 %v4647_v10 }
0x1352   : > { %4415 = vmatpush3.bf16.msra.mxu1 %v4414_v22 }
0x1353   : > { %4416 = vmatprep.subr.bf16.mxu1 %v4647_v10 }
0x1418   : > { %v3225_v44 = vpop.f32.mrb[20].mxu1 }
0x1419   : > { %v4215_v45 = vpop.f32.mrb[21].mxu1  ;;  %4221 = vmatmul.mubr.msk.f32.vlgmr.msra.gmra.mrb[26].mxu0 %vm1505_vm3, %v3225_v44 }
0x141a   : > { %4238 = vmatprep.mubr.msk.f32.mxu0 %vm4648_vm1, %v4649_v14 }
0x141c   : > { %v3371_v46 = vpop.f32.mrb[22].mxu1 }
0x141d   : > { %v4229_v47 = vpop.f32.mrb[23].mxu1 }
0x14ec   : > { %v3298_v48 = vpop.f32.mrb[26].mxu0 }
0x14ed   : > { %v3372_v49 = vadd.f32 %v3371_v46, %v3298_v48  ;;  %v4222_v50 = vpop.f32.mrb[27].mxu0 }
0x14ef   : > { %v3375_v52 = vadd.f32 %v3372_v49, %v5063_v60  ;;  %v4402_v60 = vpack.c.bf16 %v1222_v63, %v1221_v62  ;;  %v3842_v49 = vld [vmem:[%s5345_s3] ss:$0 sm:$0xff]  ;;  %s1115_s3 = sand.u32 1, %s4600_s10  }
0x14f0   : > { %v3593_v63 = vld [vmem:[%s4834_s30] sm:$0xff] }
0x14f1   : > { %v5177_v53 = vadd.f32 %v3837_v51, %v3375_v52  ;;  %4403 = vmatpush3.bf16.msra.mxu0 %v4402_v60  ;;  %v3594_v60 = vld [vmem:[%s4834_s30 + $0x8] sm:$0xff] }
0x14f2   : > { %4404 = vmatprep.subr.bf16.mxu0 %v4647_v10  ;;  %v4432_v1 = vpack.c.bf16 %v3594_v60, %v3593_v63 }
0x14f3   : > { %v3383_v54 = vsel %vm2411_vm7, %v5177_v53, 0.0 }
0x14f4   : > { %3384 = vadd.xlane.f32.xlu0 %v3383_v54 }
0x14f5   : > { %4406 = vmatpush3.bf16.msra.mxu0 %v4405_v3 }
0x14f6   : > { %4431 = vmatprep.subr.bf16.mxu0 %v4647_v10 }
0x1581   : > { %v3385_v55 = vpop.xlane.xlu0 %3384 }
0x1582   : > { %v3386_v56 = vmul.f32 0.03125, %v3385_v55 }
0x1584   : > { %v3387_v57 = vsub.f32 %v5177_v53, %v3386_v56 }
0x1586   : > { %v3388_v59 = vmul.f32 %v3387_v57, %v3387_v57 }
0x1588   : > { %v3389_v61 = vsel %vm2411_vm7, %v3388_v59, 0.0 }
0x1589   : > { %3390 = vadd.xlane.f32.xlu1 %v3389_v61 }
0x1616   : > { %v3391_v58 = vpop.xlane.xlu1 %3390 }
0x1617   : > { %v3392_v6 = vmul.f32 0.03125, %v3391_v58 }
0x1619   : > { %v3393_v7 = vadd.f32 1e-06, %v3392_v6  ;;  %v3575_v6 = vld [vmem:[%s5346_s6] sm:$0x1]  ;;  %s3674_s6 = scalar_lea.sflag [#allocation3], %s1115_s3 }
0x161b   : > { %4540 = vrsqrt.f32 %v3393_v7 }
0x1625   : > { %v4541_v8 = vpop.eup %4540 }
0x1626   : > { %v3395_v11 = vmul.f32 %v4541_v8, %v3387_v57  ;;  %v3576_v8 = vld [vmem:[%s5347_s12] sm:$0x1] }
0x1628   : > { %v3402_v13 = vmul.f32 %v3838_v9, %v3395_v11 }
0x162a   : > { %v3409_v15 = vadd.f32 %v3839_v12, %v3402_v13 }
0x162c   : > { %4239 = vmatmul.mubr.msk.f32.vlgmr.msra.gmra.mrb[28].mxu0 %vm1279_vm2, %v3409_v15 }
0x162d   : > { %4284 = vmatprep.mubr.msk.f32.mxu0 %vm4648_vm1, %v4649_v14  ;;  %v1233_v14 = vld [vmem:[%s5341_s5 + $0x38] sm:$0xff]  ;;  %4433 = vmatpush3.bf16.msra.mxu0 %v4432_v1  ;;  %s1116_s5 = scalar_lea.vmem [#allocation2], %s1115_s3 }
0x162e   : > { %v4417_v24 = vpack.c.bf16 %v1233_v14, %v1232_v23  ;;  %4434 = vmatprep.subr.bf16.mxu0 %v4647_v10  ;;  %s3686_s8 = sshll.u32 %s1116_s5, 4  ;;  %s5234_s8 = int_to_ptr.vmem [resolvable:$true] %s3686_s8 }
0x162f   : > { %s4546_s12 = scalar_lea.vmem %s5234_s8, 16  ;;  %p4553_p0 = scmp.lt.s32.totalorder %s5234_s8, %s4551_s13 }
0x1630   : > { %4418 = vmatpush3.bf16.msra.mxu1 %v4417_v24  ;;  %p4547_p11 = scmp.ne.s32.totalorder %s5234_s8, %s4546_s12  ;;  %p4554_p1 = scmp.lt.s32.totalorder %s4552_s14, %s4546_s12 }
0x1631   : > { %4419 = vmatprep.subr.bf16.mxu1 %v4647_v10 }
0x1632   : > { %p4548_p12 = pnand %p4547_p11, %p4884_p5  ;;  %p4555_p2 = por %p4554_p1, %p4553_p0 }
0x1634   : > { %4421 = vmatpush3.bf16.msra.mxu1 %v4420_v21  ;;  %p4549_p13 = pneg %p4548_p12 }
0x1635   : > { %4422 = vmatprep.subr.bf16.mxu1 %v4647_v10 }
0x1636   : > { %p4556_p3 = pnand %p4555_p2, %p4549_p13 }
0x1638   : > { %4424 = vmatpush3.bf16.msra.mxu1 %v4423_v30 }
0x1639   : > { %4425 = vmatprep.subr.bf16.mxu1 %v4647_v10 }
0x163c   : > { %4427 = vmatpush3.bf16.msra.mxu1 %v4426_v32 }
0x163d   : > { %4428 = vmatprep.subr.bf16.mxu1 %v4647_v10  ;;  %v3597_v10 = vld [vmem:[%s4839_s27] sm:$0x1] }
0x1640   : > { %4430 = vmatpush3.bf16.msra.mxu1 %v4429_v35 }
0x16ff   : > { %v3485_v37 = vpop.f32.mrb[28].mxu0 }
0x1700   : > { %v3486_v38 = vadd.f32 %v3840_v36, %v3485_v37  ;;  %v4240_v39 = vpop.f32.mrb[29].mxu0 }
0x1702   : > { %v3489_v40 = vmul.f32 %v3486_v38, %v3486_v38 }
0x1704   : > { %v3490_v41 = vmul.f32 %v3489_v40, %v3486_v38 }
0x1706   : > { %v3491_v42 = vmul.f32 0.044715, %v3490_v41 }
0x1708   : > { %v3492_v43 = vadd.f32 %v3491_v42, %v3486_v38 }
0x170a   : > { %v3493_v44 = vmul.f32 0.7978846, %v3492_v43 }
0x170c   : > { %4542 = vtanh.f32 %v3493_v44 }
0x1716   : > { %v4543_v45 = vpop.eup %4542 }
0x1717   : > { %v3495_v46 = vadd.f32 1.0, %v4543_v45 }
0x1719   : > { %v3496_v47 = vmul.f32 0.5, %v3495_v46 }
0x171b   : > { %v3497_v48 = vmul.f32 %v3496_v47, %v3486_v38 }
0x171d   : > { %4274 = vmatmul.mubr.f32.vlgmr.msra.gmra.mrb[24].mxu1 %v3497_v48 }
0x17f0   : > { %v3570_v50 = vpop.f32.mrb[24].mxu1 }
0x17f1   : > { %v3571_v51 = vadd.f32 %v3842_v49, %v3570_v50  ;;  %v4275_v52 = vpop.f32.mrb[25].mxu1 }
0x17f3   : > { %v3574_v54 = vadd.f32 %v3571_v51, %v5177_v53  ;;  %v3596_v53 = vld [vmem:[%s4834_s30 + $0x18] sm:$0xff] }
0x17f4   : > { %v4435_v3 = vpack.c.bf16 %v3596_v53, %v3595_v2 }
0x17f5   : > { %v3578_v55 = vsel %vm3577_vm11, %v3574_v54, 0.0 }
0x17f6   : > { %3579 = vadd.xlane.f32.xlu0 %v3578_v55  ;;  %4436 = vmatpush3.bf16.msra.mxu0 %v4435_v3 }
0x1883   : > { %v3580_v56 = vpop.xlane.xlu0 %3579 }
0x1884   : > { %v3581_v57 = vmul.f32 0.03125, %v3580_v56 }
0x1886   : > { %v3582_v59 = vsub.f32 %v3574_v54, %v3581_v57 }
0x1888   : > { %v3583_v61 = vmul.f32 %v3582_v59, %v3582_v59 }
0x188a   : > { %v3584_v62 = vsel %vm3577_vm11, %v3583_v61, 0.0 }
0x188b   : > { %3585 = vadd.xlane.f32.xlu1 %v3584_v62 }
0x1918   : > { %v3586_v0 = vpop.xlane.xlu1 %3585 }
0x1919   : > { %v3587_v4 = vmul.f32 0.03125, %v3586_v0 }
0x191b   : > { %v3588_v5 = vadd.f32 1e-06, %v3587_v4 }
0x191d   : > { %4544 = vrsqrt.f32 %v3588_v5 }
0x1927   : > { %v4545_v58 = vpop.eup %4544 }
0x1928   : > { %v3590_v7 = vmul.f32 %v4545_v58, %v3582_v59 }
0x192a   : > { %v3591_v9 = vmul.f32 %v3590_v7, %v3575_v6 }
0x192c   : > { %v3592_v11 = vadd.f32 %v3591_v9, %v3576_v8 }
0x192e   : > { %4285 = vmatmul.mubr.msk.f32.vlgmr.msra.gmra.mrb[30].mxu0 %vm1279_vm2, %v3592_v11 }
0x1a01   : > { %v3667_v12 = vpop.f32.mrb[30].mxu0 }
0x1a02   : > { %v3668_v13 = vadd.f32 %v3667_v12, %v3597_v10  ;;  %v4286_v15 = vpop.f32.mrb[31].mxu0 }
0x1a04   : > { %3672 = vst.msk [vmem:[%s1116_s5] sm:$0x1] %vm3671_vm12, %v3668_v13 }
0x1a05   : > { %4559 = shalt.err (!%p4556_p3)
}
0x1a06   : > { %s4560_s5 = scalar_lea.hbm %s5232_s9, 16  ;;  %s4564_s2 = scalar_lea.hbm %s4844_s4, 32 }
0x1a07   : > { %p4561_p4 = scmp.ne.s32.totalorder %s5232_s9, %s4560_s5  ;;  %p4565_p9 = scmp.lt.u32.totalorder %s5232_s9, %s4844_s4 }
0x1a08   : > { %p4566_p10 = scmp.lt.u32.totalorder %s4564_s2, %s4560_s5  ;;  %p4568_p12 = scmp.lt.u32.totalorder %s4560_s5, %s5232_s9 }
0x1a09   : > { %p4562_p7 = pnand %p4561_p4, %p4884_p5 }
0x1a0a   : > { %p4567_p11 = por %p4566_p10, %p4565_p9 }
0x1a0b   : > { %p4563_p8 = pneg %p4562_p7 }
0x1a0c   : > { %p4569_p0 = por %p4568_p12, %p4567_p11 }
0x1a0e   : > { %p4570_p13 = pnand %p4569_p0, %p4563_p8 }
0x1a10   : > { %4573 = shalt.err (!%p4570_p13)
}
0x1a11   : > { %4437 = dma.vmem_to_hbm [thread:$0]  (%p4884_p5), %s5234_s8, 16, %s5232_s9, %s3674_s6  }
0x1a12 PF: > { %p4443_p1 = scmp.ge.s32.totalorder %s4608_s15, 2  ;;  %s3698_s13 = sand.u32 1, %s4596_s7  }
0x1a13   : > { %s3699_s14 = scalar_lea.sflag [#allocation3], %s3698_s13 }
0x1a14   : > { %p4440_p2 = pnand %p4443_p1, %p4888_p6 }
0x1a16   : > { %4591 = dma.done.wait (!%p4440_p2), %s3699_s14, 16  }
0x1a17   : > { %4593 = vsyncadd (!%p4440_p2), %s3699_s14, 4294967280  ;;  %p85_p3 = scmp.ge.s32.totalorder %s4871_s18, 4   ;;  %s5348_s7 = smov %s4600_s10 }
0x1a18   : > { %s5349_s10 = smov %s4604_s11  ;;  %s5350_s11 = smov %s4882_s26 }
0x1a19   : > { %s5351_s15 = smov %s4871_s18  ;;  %87 = sbr.rel (!%p85_p3) target bundleno = 70 (0x46), region = 240 }
0x1a20   :  { %3703 = vsyncpa [#allocation3], 1 }
0x1a21   :  { %3705 = vsyncpa [#allocation3 + $0x1], 1 }

</bundles_post_ra>
